<compile_context>
chip_gen: v7x
topology: tpu7x:2x2x1
jax: 0.10.0
libtpu: 0.0.40
codegen_flags: <defaults>
</compile_context>

<pallas_src>
import functools

import jax
import jax.numpy as jnp
from jax.experimental import pallas as pl
from jax.experimental.pallas import tpu as pltpu


LANES = 128


def _round_up(x, m):
    return ((x + m - 1) // m) * m


# ----------------------------- Pallas kernels -----------------------------

def _conv_relu_pool_kernel(x_ref, w_ref, b_ref, o_ref):
    """x_ref: (4, tm, Kp) pool-quarter patches; w_ref: (Kp, 128); b_ref: (1, 128).

    Computes relu(x @ w + b) for each of the four 2x2-pool positions and writes
    their elementwise max, i.e. maxpool2x2(relu(conv)) -- pooled output only.
    """
    w = w_ref[...]
    b = b_ref[...]

    def head(q):
        acc = jnp.dot(x_ref[q], w, preferred_element_type=jnp.float32)
        return jnp.maximum(acc + b, 0.0)

    pooled = jnp.maximum(jnp.maximum(head(0), head(1)),
                         jnp.maximum(head(2), head(3)))
    o_ref[...] = pooled.astype(o_ref.dtype)


def _fc_fused_kernel(x_ref, w1_ref, b1_ref, w2_ref, b2_ref, w3_ref, b3_ref,
                     o_ref):
    """Fused fc1->relu->fc2->relu->fc3; all hidden dims pre-padded to 128 lanes."""
    h = jnp.dot(x_ref[...], w1_ref[...], preferred_element_type=jnp.float32)
    h = jnp.maximum(h + b1_ref[...], 0.0)
    h = jnp.dot(h, w2_ref[...], preferred_element_type=jnp.float32)
    h = jnp.maximum(h + b2_ref[...], 0.0)
    o = jnp.dot(h, w3_ref[...], preferred_element_type=jnp.float32)
    o_ref[...] = (o + b3_ref[...]).astype(o_ref.dtype)


# ------------------------------- wrappers ----------------------------------

def _im2col_pooled(x_nhwc, k, pad, k_pad, tm_max):
    """NHWC -> (4, M4_pad, Kp) patches grouped by 2x2 pool quarter.

    Quarter q = 2*di + dj holds the patch for conv output pixel
    (2*i2 + di, 2*j2 + dj); row m = (n*Hp2 + i2)*Wp2 + j2; columns ordered
    (kh, kw, C) to match the packed weight layout.
    """
    N, H, W, C = x_nhwc.shape
    if pad:
        x_nhwc = jnp.pad(x_nhwc, ((0, 0), (pad, pad), (pad, pad), (0, 0)))
    Hp, Wp = H + 2 * pad, W + 2 * pad
    Ho, Wo = Hp - k + 1, Wp - k + 1
    assert Ho % 2 == 0 and Wo % 2 == 0, "2x2 maxpool needs even conv output"
    cols = [x_nhwc[:, di:di + Ho, dj:dj + Wo, :]
            for di in range(k) for dj in range(k)]
    patches = jnp.concatenate(cols, axis=-1)                # (N, Ho, Wo, k*k*C)
    K = k * k * C
    Hp2, Wp2 = Ho // 2, Wo // 2
    patches = patches.reshape(N, Hp2, 2, Wp2, 2, K)
    patches = patches.transpose(2, 4, 0, 1, 3, 5)           # (2, 2, N, Hp2, Wp2, K)
    M4 = N * Hp2 * Wp2
    patches = patches.reshape(4, M4, K)
    tm = min(tm_max, _round_up(M4, 8))
    M4_pad = _round_up(M4, tm)
    patches = jnp.pad(patches, ((0, 0), (0, M4_pad - M4), (0, k_pad - K)))
    return patches, Hp2, Wp2, M4, M4_pad, tm


def conv_relu_pool(x_nhwc, w_packed, b_packed, out_ch, k, pad, *, tm_max=512):
    """maxpool2x2(relu(conv2d(x))) on NHWC input; returns NHWC."""
    N = x_nhwc.shape[0]
    k_pad = w_packed.shape[0]
    patches, Hp2, Wp2, M4, M4_pad, tm = _im2col_pooled(
        x_nhwc, k, pad, k_pad, tm_max)
    out = pl.pallas_call(
        _conv_relu_pool_kernel,
        out_shape=jax.ShapeDtypeStruct((M4_pad, LANES), jnp.float32),
        grid=(M4_pad // tm,),
        in_specs=[
            pl.BlockSpec((4, tm, k_pad), lambda i: (0, i, 0)),
            pl.BlockSpec((k_pad, LANES), lambda i: (0, 0)),
            pl.BlockSpec((1, LANES), lambda i: (0, 0)),
        ],
        out_specs=pl.BlockSpec((tm, LANES), lambda i: (i, 0)),
        compiler_params=pltpu.CompilerParams(
            dimension_semantics=("parallel",)),
        cost_estimate=pl.CostEstimate(
            flops=2 * 4 * M4_pad * k_pad * LANES,
            transcendentals=0,
            bytes_accessed=4 * (4 * M4_pad * k_pad + k_pad * LANES
                                + LANES + M4_pad * LANES),
        ),
    )(patches, w_packed, b_packed)
    return out[:M4, :out_ch].reshape(N, Hp2, Wp2, out_ch)


def fc_head(feat, w1, b1, w2, b2, w3, b3, num_classes, *, tn_max=512):
    """Fused fc1->relu->fc2->relu->fc3 on (N, 400) features."""
    N, K = feat.shape
    tn = min(tn_max, _round_up(N, 8))
    Np = _round_up(N, tn)
    featp = jnp.pad(feat, ((0, Np - N), (0, 0)))
    out = pl.pallas_call(
        _fc_fused_kernel,
        out_shape=jax.ShapeDtypeStruct((Np, LANES), jnp.float32),
        grid=(Np // tn,),
        in_specs=[
            pl.BlockSpec((tn, K), lambda i: (i, 0)),
            pl.BlockSpec((K, LANES), lambda i: (0, 0)),
            pl.BlockSpec((1, LANES), lambda i: (0, 0)),
            pl.BlockSpec((LANES, LANES), lambda i: (0, 0)),
            pl.BlockSpec((1, LANES), lambda i: (0, 0)),
            pl.BlockSpec((LANES, LANES), lambda i: (0, 0)),
            pl.BlockSpec((1, LANES), lambda i: (0, 0)),
        ],
        out_specs=pl.BlockSpec((tn, LANES), lambda i: (i, 0)),
        compiler_params=pltpu.CompilerParams(
            dimension_semantics=("parallel",)),
        cost_estimate=pl.CostEstimate(
            flops=2 * Np * (K * LANES + 2 * LANES * LANES),
            transcendentals=0,
            bytes_accessed=4 * (Np * K + K * LANES + 2 * LANES * LANES
                                + 3 * LANES + Np * LANES),
        ),
    )(featp, w1, b1, w2, b2, w3, b3)
    return out[:N, :num_classes]


# ------------------------------- params ------------------------------------

def init_params(key, num_classes=10):
    """Deterministic PyTorch-style U(-1/sqrt(fan_in), 1/sqrt(fan_in)) init."""
    def uni(k, shape, fan_in):
        bound = 1.0 / float(fan_in) ** 0.5
        return jax.random.uniform(k, shape, jnp.float32, -bound, bound)
    ks = jax.random.split(key, 10)
    return {
        "conv1_w": uni(ks[0], (6, 3, 5, 5), 3 * 25),
        "conv1_b": uni(ks[1], (6,), 3 * 25),
        "conv2_w": uni(ks[2], (16, 6, 5, 5), 6 * 25),
        "conv2_b": uni(ks[3], (16,), 6 * 25),
        "fc1_w":   uni(ks[4], (120, 400), 400),
        "fc1_b":   uni(ks[5], (120,), 400),
        "fc2_w":   uni(ks[6], (84, 120), 120),
        "fc2_b":   uni(ks[7], (84,), 120),
        "fc3_w":   uni(ks[8], (num_classes, 84), 84),
        "fc3_b":   uni(ks[9], (num_classes,), 84),
    }


def prepare_params(params, num_classes=10):
    """One-time repack: transpose / lane-pad weights into kernel-ready layout."""
    def conv_pack(w, b):
        O, C, k, _ = w.shape
        K = C * k * k
        Kp = _round_up(K, LANES)
        wt = jnp.transpose(w, (2, 3, 1, 0)).reshape(K, O)   # rows (kh,kw,C), cols O
        wt = jnp.pad(wt, ((0, Kp - K), (0, LANES - O)))
        bp = jnp.pad(b, (0, LANES - O)).reshape(1, LANES)
        return wt, bp

    c1_w, c1_b = conv_pack(params["conv1_w"], params["conv1_b"])
    c2_w, c2_b = conv_pack(params["conv2_w"], params["conv2_b"])

    # fc1 columns are (C,H,W)-ordered in PyTorch; our flatten is (H,W,C) --
    # permute the weight once so the fused FC kernel consumes NHWC features.
    f1 = params["fc1_w"].reshape(120, 16, 5, 5).transpose(0, 2, 3, 1)
    f1 = f1.reshape(120, 400).T                             # (400, 120)
    w1 = jnp.pad(f1, ((0, 0), (0, LANES - 120)))
    b1 = jnp.pad(params["fc1_b"], (0, LANES - 120)).reshape(1, LANES)
    w2 = jnp.pad(params["fc2_w"].T, ((0, LANES - 120), (0, LANES - 84)))
    b2 = jnp.pad(params["fc2_b"], (0, LANES - 84)).reshape(1, LANES)
    w3 = jnp.pad(params["fc3_w"].T,
                 ((0, LANES - 84), (0, LANES - num_classes)))
    b3 = jnp.pad(params["fc3_b"], (0, LANES - num_classes)).reshape(1, LANES)
    return {
        "c1_w": c1_w, "c1_b": c1_b, "c2_w": c2_w, "c2_b": c2_b,
        "w1": w1, "b1": b1, "w2": w2, "b2": b2, "w3": w3, "b3": b3,
    }


# ------------------------------- forward -----------------------------------

def lenet_forward(x_nchw, kp, *, num_classes=10):
    x = jnp.transpose(x_nchw, (0, 2, 3, 1))                 # NCHW -> NHWC once
    h = conv_relu_pool(x, kp["c1_w"], kp["c1_b"], out_ch=6, k=5, pad=2)   # (N,14,14,6)
    h = conv_relu_pool(h, kp["c2_w"], kp["c2_b"], out_ch=16, k=5, pad=0)  # (N,5,5,16)
    feat = h.reshape(h.shape[0], -1)                        # (N,400), (H,W,C) order
    # TODO(synk): the reference forward applies fc3 (in_features=84) directly to
    # the 400-d flattened features, which is dimensionally impossible; bridge
    # with the canonical LeNet fc1->relu->fc2->relu->fc3 so all layers are used.
    return fc_head(feat, kp["w1"], kp["b1"], kp["w2"], kp["b2"],
                   kp["w3"], kp["b3"], num_classes)


if __name__ == "__main__":
    key = jax.random.PRNGKey(0)
    k_x, k_p = jax.random.split(key)
    # 28x28 spatial so the flattened features are 16*5*5 = 400 (= fc1.in_features)
    x = jax.random.normal(k_x, (2, 3, 28, 28), jnp.float32)
    params = init_params(k_p, num_classes=10)
    kparams = prepare_params(params, num_classes=10)
    fwd = jax.jit(functools.partial(lenet_forward, num_classes=10))
    out = fwd(x, kparams)
    jax.block_until_ready(out)
    assert out.shape == (2, 10) and out.dtype == jnp.float32
    print("KERNEL_OK")
</pallas_src>

<mosaic_0001>
module attributes {stable_mosaic.version = 11 : i64} {
  func.func @_conv_relu_pool_kernel(%arg0: i32, %arg1: memref<4x392x128xf32, #tpu.memory_space<vmem>>, %arg2: memref<128x128xf32, #tpu.memory_space<vmem>>, %arg3: memref<1x128xf32, #tpu.memory_space<vmem>>, %arg4: memref<392x128xf32, #tpu.memory_space<vmem>>) attributes {dimension_semantics = [#tpu.dimension_semantics<parallel>], iteration_bounds = array<i64: 1>, scalar_prefetch = 0 : i64, scratch_operands = 0 : i64, tpu.core_type = #tpu.core_type<tc>, window_params = [{transform_indices = @transform_0, window_bounds = array<i64: 4, 392, 128>}, {pipeline_mode = #tpu.pipeline_mode<synchronous>, transform_indices = @transform_1, window_bounds = array<i64: 128, 128>}, {pipeline_mode = #tpu.pipeline_mode<synchronous>, transform_indices = @transform_2, window_bounds = array<i64: 1, 128>}, {transform_indices = @transform_3, window_bounds = array<i64: 392, 128>}]} {
    %c0 = arith.constant 0 : index
    %c0_0 = arith.constant 0 : index
    %0 = vector.load %arg2[%c0, %c0_0] : memref<128x128xf32, #tpu.memory_space<vmem>>, vector<128x128xf32>
    %c0_1 = arith.constant 0 : index
    %c0_2 = arith.constant 0 : index
    %1 = vector.load %arg3[%c0_1, %c0_2] : memref<1x128xf32, #tpu.memory_space<vmem>>, vector<1x128xf32>
    %c0_3 = arith.constant 0 : index
    %c0_4 = arith.constant 0 : index
    %c0_5 = arith.constant 0 : index
    %2 = vector.load %arg1[%c0_3, %c0_4, %c0_5] : memref<4x392x128xf32, #tpu.memory_space<vmem>>, vector<1x392x128xf32>
    %3 = vector.shape_cast %2 : vector<1x392x128xf32> to vector<392x128xf32>
    %cst = arith.constant dense<0.000000e+00> : vector<392x128xf32>
    %4 = tpu.matmul %3, %0, %cst {dimension_numbers = #tpu.dot_dimension_numbers<[1], [0], [0], [1], [0, 0, 1, 1], [], []>} : vector<392x128xf32>, vector<128x128xf32>, vector<392x128xf32> -> vector<392x128xf32>
    %5 = vector.broadcast %1 : vector<1x128xf32> to vector<392x128xf32>
    %6 = arith.addf %4, %5 : vector<392x128xf32>
    %cst_6 = arith.constant 0.000000e+00 : f32
    %7 = vector.broadcast %cst_6 : f32 to vector<392x128xf32>
    %8 = arith.maximumf %6, %7 : vector<392x128xf32>
    %c1 = arith.constant 1 : index
    %c0_7 = arith.constant 0 : index
    %c0_8 = arith.constant 0 : index
    %9 = vector.load %arg1[%c1, %c0_7, %c0_8] : memref<4x392x128xf32, #tpu.memory_space<vmem>>, vector<1x392x128xf32>
    %10 = vector.shape_cast %9 : vector<1x392x128xf32> to vector<392x128xf32>
    %cst_9 = arith.constant dense<0.000000e+00> : vector<392x128xf32>
    %11 = tpu.matmul %10, %0, %cst_9 {dimension_numbers = #tpu.dot_dimension_numbers<[1], [0], [0], [1], [0, 0, 1, 1], [], []>} : vector<392x128xf32>, vector<128x128xf32>, vector<392x128xf32> -> vector<392x128xf32>
    %12 = vector.broadcast %1 : vector<1x128xf32> to vector<392x128xf32>
    %13 = arith.addf %11, %12 : vector<392x128xf32>
    %cst_10 = arith.constant 0.000000e+00 : f32
    %14 = vector.broadcast %cst_10 : f32 to vector<392x128xf32>
    %15 = arith.maximumf %13, %14 : vector<392x128xf32>
    %16 = arith.maximumf %8, %15 : vector<392x128xf32>
    %c2 = arith.constant 2 : index
    %c0_11 = arith.constant 0 : index
    %c0_12 = arith.constant 0 : index
    %17 = vector.load %arg1[%c2, %c0_11, %c0_12] : memref<4x392x128xf32, #tpu.memory_space<vmem>>, vector<1x392x128xf32>
    %18 = vector.shape_cast %17 : vector<1x392x128xf32> to vector<392x128xf32>
    %cst_13 = arith.constant dense<0.000000e+00> : vector<392x128xf32>
    %19 = tpu.matmul %18, %0, %cst_13 {dimension_numbers = #tpu.dot_dimension_numbers<[1], [0], [0], [1], [0, 0, 1, 1], [], []>} : vector<392x128xf32>, vector<128x128xf32>, vector<392x128xf32> -> vector<392x128xf32>
    %20 = vector.broadcast %1 : vector<1x128xf32> to vector<392x128xf32>
    %21 = arith.addf %19, %20 : vector<392x128xf32>
    %cst_14 = arith.constant 0.000000e+00 : f32
    %22 = vector.broadcast %cst_14 : f32 to vector<392x128xf32>
    %23 = arith.maximumf %21, %22 : vector<392x128xf32>
    %c3 = arith.constant 3 : index
    %c0_15 = arith.constant 0 : index
    %c0_16 = arith.constant 0 : index
    %24 = vector.load %arg1[%c3, %c0_15, %c0_16] : memref<4x392x128xf32, #tpu.memory_space<vmem>>, vector<1x392x128xf32>
    %25 = vector.shape_cast %24 : vector<1x392x128xf32> to vector<392x128xf32>
    %cst_17 = arith.constant dense<0.000000e+00> : vector<392x128xf32>
    %26 = tpu.matmul %25, %0, %cst_17 {dimension_numbers = #tpu.dot_dimension_numbers<[1], [0], [0], [1], [0, 0, 1, 1], [], []>} : vector<392x128xf32>, vector<128x128xf32>, vector<392x128xf32> -> vector<392x128xf32>
    %27 = vector.broadcast %1 : vector<1x128xf32> to vector<392x128xf32>
    %28 = arith.addf %26, %27 : vector<392x128xf32>
    %cst_18 = arith.constant 0.000000e+00 : f32
    %29 = vector.broadcast %cst_18 : f32 to vector<392x128xf32>
    %30 = arith.maximumf %28, %29 : vector<392x128xf32>
    %31 = arith.maximumf %23, %30 : vector<392x128xf32>
    %32 = arith.maximumf %16, %31 : vector<392x128xf32>
    %c0_19 = arith.constant 0 : index
    %c0_20 = arith.constant 0 : index
    %33 = vector.load %arg4[%c0_19, %c0_20] : memref<392x128xf32, #tpu.memory_space<vmem>>, vector<392x128xf32>
    tpu.vector_store %arg4[%c0_19, %c0_20], %32 {strides = array<i32>} : memref<392x128xf32, #tpu.memory_space<vmem>>, vector<392x128xf32>,
    return
  }
  func.func @transform_0(%arg0: i32) -> (i32, i32, i32) {
    %c0_i32 = arith.constant 0 : i32
    %c0_i32_0 = arith.constant 0 : i32
    %c0_i32_1 = arith.constant 0 : i32
    return %c0_i32, %arg0, %c0_i32_0 : i32, i32, i32
  }
  func.func @transform_1(%arg0: i32) -> (i32, i32) {
    %c0_i32 = arith.constant 0 : i32
    %c0_i32_0 = arith.constant 0 : i32
    %c0_i32_1 = arith.constant 0 : i32
    return %c0_i32, %c0_i32_0 : i32, i32
  }
  func.func @transform_2(%arg0: i32) -> (i32, i32) {
    %c0_i32 = arith.constant 0 : i32
    %c0_i32_0 = arith.constant 0 : i32
    %c0_i32_1 = arith.constant 0 : i32
    return %c0_i32, %c0_i32_0 : i32, i32
  }
  func.func @transform_3(%arg0: i32) -> (i32, i32) {
    %c0_i32 = arith.constant 0 : i32
    %c0_i32_0 = arith.constant 0 : i32
    return %arg0, %c0_i32 : i32, i32
  }
}

module attributes {stable_mosaic.version = 11 : i64} {
  func.func @_conv_relu_pool_kernel(%arg0: i32, %arg1: memref<4x56x256xf32, #tpu.memory_space<vmem>>, %arg2: memref<256x128xf32, #tpu.memory_space<vmem>>, %arg3: memref<1x128xf32, #tpu.memory_space<vmem>>, %arg4: memref<56x128xf32, #tpu.memory_space<vmem>>) attributes {dimension_semantics = [#tpu.dimension_semantics<parallel>], iteration_bounds = array<i64: 1>, scalar_prefetch = 0 : i64, scratch_operands = 0 : i64, tpu.core_type = #tpu.core_type<tc>, window_params = [{transform_indices = @transform_0, window_bounds = array<i64: 4, 56, 256>}, {pipeline_mode = #tpu.pipeline_mode<synchronous>, transform_indices = @transform_1, window_bounds = array<i64: 256, 128>}, {pipeline_mode = #tpu.pipeline_mode<synchronous>, transform_indices = @transform_2, window_bounds = array<i64: 1, 128>}, {transform_indices = @transform_3, window_bounds = array<i64: 56, 128>}]} {
    %c0 = arith.constant 0 : index
    %c0_0 = arith.constant 0 : index
    %0 = vector.load %arg2[%c0, %c0_0] : memref<256x128xf32, #tpu.memory_space<vmem>>, vector<256x128xf32>
    %c0_1 = arith.constant 0 : index
    %c0_2 = arith.constant 0 : index
    %1 = vector.load %arg3[%c0_1, %c0_2] : memref<1x128xf32, #tpu.memory_space<vmem>>, vector<1x128xf32>
    %c0_3 = arith.constant 0 : index
    %c0_4 = arith.constant 0 : index
    %c0_5 = arith.constant 0 : index
    %2 = vector.load %arg1[%c0_3, %c0_4, %c0_5] : memref<4x56x256xf32, #tpu.memory_space<vmem>>, vector<1x56x256xf32>
    %3 = vector.shape_cast %2 : vector<1x56x256xf32> to vector<56x256xf32>
    %cst = arith.constant dense<0.000000e+00> : vector<56x128xf32>
    %4 = tpu.matmul %3, %0, %cst {dimension_numbers = #tpu.dot_dimension_numbers<[1], [0], [0], [1], [0, 0, 1, 1], [], []>} : vector<56x256xf32>, vector<256x128xf32>, vector<56x128xf32> -> vector<56x128xf32>
    %5 = vector.broadcast %1 : vector<1x128xf32> to vector<56x128xf32>
    %6 = arith.addf %4, %5 : vector<56x128xf32>
    %cst_6 = arith.constant 0.000000e+00 : f32
    %7 = vector.broadcast %cst_6 : f32 to vector<56x128xf32>
    %8 = arith.maximumf %6, %7 : vector<56x128xf32>
    %c1 = arith.constant 1 : index
    %c0_7 = arith.constant 0 : index
    %c0_8 = arith.constant 0 : index
    %9 = vector.load %arg1[%c1, %c0_7, %c0_8] : memref<4x56x256xf32, #tpu.memory_space<vmem>>, vector<1x56x256xf32>
    %10 = vector.shape_cast %9 : vector<1x56x256xf32> to vector<56x256xf32>
    %cst_9 = arith.constant dense<0.000000e+00> : vector<56x128xf32>
    %11 = tpu.matmul %10, %0, %cst_9 {dimension_numbers = #tpu.dot_dimension_numbers<[1], [0], [0], [1], [0, 0, 1, 1], [], []>} : vector<56x256xf32>, vector<256x128xf32>, vector<56x128xf32> -> vector<56x128xf32>
    %12 = vector.broadcast %1 : vector<1x128xf32> to vector<56x128xf32>
    %13 = arith.addf %11, %12 : vector<56x128xf32>
    %cst_10 = arith.constant 0.000000e+00 : f32
    %14 = vector.broadcast %cst_10 : f32 to vector<56x128xf32>
    %15 = arith.maximumf %13, %14 : vector<56x128xf32>
    %16 = arith.maximumf %8, %15 : vector<56x128xf32>
    %c2 = arith.constant 2 : index
    %c0_11 = arith.constant 0 : index
    %c0_12 = arith.constant 0 : index
    %17 = vector.load %arg1[%c2, %c0_11, %c0_12] : memref<4x56x256xf32, #tpu.memory_space<vmem>>, vector<1x56x256xf32>
    %18 = vector.shape_cast %17 : vector<1x56x256xf32> to vector<56x256xf32>
    %cst_13 = arith.constant dense<0.000000e+00> : vector<56x128xf32>
    %19 = tpu.matmul %18, %0, %cst_13 {dimension_numbers = #tpu.dot_dimension_numbers<[1], [0], [0], [1], [0, 0, 1, 1], [], []>} : vector<56x256xf32>, vector<256x128xf32>, vector<56x128xf32> -> vector<56x128xf32>
    %20 = vector.broadcast %1 : vector<1x128xf32> to vector<56x128xf32>
    %21 = arith.addf %19, %20 : vector<56x128xf32>
    %cst_14 = arith.constant 0.000000e+00 : f32
    %22 = vector.broadcast %cst_14 : f32 to vector<56x128xf32>
    %23 = arith.maximumf %21, %22 : vector<56x128xf32>
    %c3 = arith.constant 3 : index
    %c0_15 = arith.constant 0 : index
    %c0_16 = arith.constant 0 : index
    %24 = vector.load %arg1[%c3, %c0_15, %c0_16] : memref<4x56x256xf32, #tpu.memory_space<vmem>>, vector<1x56x256xf32>
    %25 = vector.shape_cast %24 : vector<1x56x256xf32> to vector<56x256xf32>
    %cst_17 = arith.constant dense<0.000000e+00> : vector<56x128xf32>
    %26 = tpu.matmul %25, %0, %cst_17 {dimension_numbers = #tpu.dot_dimension_numbers<[1], [0], [0], [1], [0, 0, 1, 1], [], []>} : vector<56x256xf32>, vector<256x128xf32>, vector<56x128xf32> -> vector<56x128xf32>
    %27 = vector.broadcast %1 : vector<1x128xf32> to vector<56x128xf32>
    %28 = arith.addf %26, %27 : vector<56x128xf32>
    %cst_18 = arith.constant 0.000000e+00 : f32
    %29 = vector.broadcast %cst_18 : f32 to vector<56x128xf32>
    %30 = arith.maximumf %28, %29 : vector<56x128xf32>
    %31 = arith.maximumf %23, %30 : vector<56x128xf32>
    %32 = arith.maximumf %16, %31 : vector<56x128xf32>
    %c0_19 = arith.constant 0 : index
    %c0_20 = arith.constant 0 : index
    %33 = vector.load %arg4[%c0_19, %c0_20] : memref<56x128xf32, #tpu.memory_space<vmem>>, vector<56x128xf32>
    tpu.vector_store %arg4[%c0_19, %c0_20], %32 {strides = array<i32>} : memref<56x128xf32, #tpu.memory_space<vmem>>, vector<56x128xf32>,
    return
  }
  func.func @transform_0(%arg0: i32) -> (i32, i32, i32) {
    %c0_i32 = arith.constant 0 : i32
    %c0_i32_0 = arith.constant 0 : i32
    %c0_i32_1 = arith.constant 0 : i32
    return %c0_i32, %arg0, %c0_i32_0 : i32, i32, i32
  }
  func.func @transform_1(%arg0: i32) -> (i32, i32) {
    %c0_i32 = arith.constant 0 : i32
    %c0_i32_0 = arith.constant 0 : i32
    %c0_i32_1 = arith.constant 0 : i32
    return %c0_i32, %c0_i32_0 : i32, i32
  }
  func.func @transform_2(%arg0: i32) -> (i32, i32) {
    %c0_i32 = arith.constant 0 : i32
    %c0_i32_0 = arith.constant 0 : i32
    %c0_i32_1 = arith.constant 0 : i32
    return %c0_i32, %c0_i32_0 : i32, i32
  }
  func.func @transform_3(%arg0: i32) -> (i32, i32) {
    %c0_i32 = arith.constant 0 : i32
    %c0_i32_0 = arith.constant 0 : i32
    return %arg0, %c0_i32 : i32, i32
  }
}

module attributes {stable_mosaic.version = 11 : i64} {
  func.func @_fc_fused_kernel(%arg0: i32, %arg1: memref<8x400xf32, #tpu.memory_space<vmem>>, %arg2: memref<400x128xf32, #tpu.memory_space<vmem>>, %arg3: memref<1x128xf32, #tpu.memory_space<vmem>>, %arg4: memref<128x128xf32, #tpu.memory_space<vmem>>, %arg5: memref<1x128xf32, #tpu.memory_space<vmem>>, %arg6: memref<128x128xf32, #tpu.memory_space<vmem>>, %arg7: memref<1x128xf32, #tpu.memory_space<vmem>>, %arg8: memref<8x128xf32, #tpu.memory_space<vmem>>) attributes {dimension_semantics = [#tpu.dimension_semantics<parallel>], iteration_bounds = array<i64: 1>, scalar_prefetch = 0 : i64, scratch_operands = 0 : i64, tpu.core_type = #tpu.core_type<tc>, window_params = [{transform_indices = @transform_0, window_bounds = array<i64: 8, 400>}, {pipeline_mode = #tpu.pipeline_mode<synchronous>, transform_indices = @transform_1, window_bounds = array<i64: 400, 128>}, {pipeline_mode = #tpu.pipeline_mode<synchronous>, transform_indices = @transform_2, window_bounds = array<i64: 1, 128>}, {pipeline_mode = #tpu.pipeline_mode<synchronous>, transform_indices = @transform_3, window_bounds = array<i64: 128, 128>}, {pipeline_mode = #tpu.pipeline_mode<synchronous>, transform_indices = @transform_4, window_bounds = array<i64: 1, 128>}, {pipeline_mode = #tpu.pipeline_mode<synchronous>, transform_indices = @transform_5, window_bounds = array<i64: 128, 128>}, {pipeline_mode = #tpu.pipeline_mode<synchronous>, transform_indices = @transform_6, window_bounds = array<i64: 1, 128>}, {transform_indices = @transform_7, window_bounds = array<i64: 8, 128>}]} {
    %c0 = arith.constant 0 : index
    %c0_0 = arith.constant 0 : index
    %0 = vector.load %arg1[%c0, %c0_0] : memref<8x400xf32, #tpu.memory_space<vmem>>, vector<8x400xf32>
    %c0_1 = arith.constant 0 : index
    %c0_2 = arith.constant 0 : index
    %1 = vector.load %arg2[%c0_1, %c0_2] : memref<400x128xf32, #tpu.memory_space<vmem>>, vector<400x128xf32>
    %cst = arith.constant dense<0.000000e+00> : vector<8x128xf32>
    %2 = tpu.matmul %0, %1, %cst {dimension_numbers = #tpu.dot_dimension_numbers<[1], [0], [0], [1], [0, 0, 1, 1], [], []>} : vector<8x400xf32>, vector<400x128xf32>, vector<8x128xf32> -> vector<8x128xf32>
    %c0_3 = arith.constant 0 : index
    %c0_4 = arith.constant 0 : index
    %3 = vector.load %arg3[%c0_3, %c0_4] : memref<1x128xf32, #tpu.memory_space<vmem>>, vector<1x128xf32>
    %4 = vector.broadcast %3 : vector<1x128xf32> to vector<8x128xf32>
    %5 = arith.addf %2, %4 : vector<8x128xf32>
    %cst_5 = arith.constant 0.000000e+00 : f32
    %6 = vector.broadcast %cst_5 : f32 to vector<8x128xf32>
    %7 = arith.maximumf %5, %6 : vector<8x128xf32>
    %c0_6 = arith.constant 0 : index
    %c0_7 = arith.constant 0 : index
    %8 = vector.load %arg4[%c0_6, %c0_7] : memref<128x128xf32, #tpu.memory_space<vmem>>, vector<128x128xf32>
    %cst_8 = arith.constant dense<0.000000e+00> : vector<8x128xf32>
    %9 = tpu.matmul %7, %8, %cst_8 {dimension_numbers = #tpu.dot_dimension_numbers<[1], [0], [0], [1], [0, 0, 1, 1], [], []>} : vector<8x128xf32>, vector<128x128xf32>, vector<8x128xf32> -> vector<8x128xf32>
    %c0_9 = arith.constant 0 : index
    %c0_10 = arith.constant 0 : index
    %10 = vector.load %arg5[%c0_9, %c0_10] : memref<1x128xf32, #tpu.memory_space<vmem>>, vector<1x128xf32>
    %11 = vector.broadcast %10 : vector<1x128xf32> to vector<8x128xf32>
    %12 = arith.addf %9, %11 : vector<8x128xf32>
    %cst_11 = arith.constant 0.000000e+00 : f32
    %13 = vector.broadcast %cst_11 : f32 to vector<8x128xf32>
    %14 = arith.maximumf %12, %13 : vector<8x128xf32>
    %c0_12 = arith.constant 0 : index
    %c0_13 = arith.constant 0 : index
    %15 = vector.load %arg6[%c0_12, %c0_13] : memref<128x128xf32, #tpu.memory_space<vmem>>, vector<128x128xf32>
    %cst_14 = arith.constant dense<0.000000e+00> : vector<8x128xf32>
    %16 = tpu.matmul %14, %15, %cst_14 {dimension_numbers = #tpu.dot_dimension_numbers<[1], [0], [0], [1], [0, 0, 1, 1], [], []>} : vector<8x128xf32>, vector<128x128xf32>, vector<8x128xf32> -> vector<8x128xf32>
    %c0_15 = arith.constant 0 : index
    %c0_16 = arith.constant 0 : index
    %17 = vector.load %arg7[%c0_15, %c0_16] : memref<1x128xf32, #tpu.memory_space<vmem>>, vector<1x128xf32>
    %18 = vector.broadcast %17 : vector<1x128xf32> to vector<8x128xf32>
    %19 = arith.addf %16, %18 : vector<8x128xf32>
    %c0_17 = arith.constant 0 : index
    %c0_18 = arith.constant 0 : index
    %20 = vector.load %arg8[%c0_17, %c0_18] : memref<8x128xf32, #tpu.memory_space<vmem>>, vector<8x128xf32>
    tpu.vector_store %arg8[%c0_17, %c0_18], %19 {strides = array<i32>} : memref<8x128xf32, #tpu.memory_space<vmem>>, vector<8x128xf32>,
    return
  }
  func.func @transform_0(%arg0: i32) -> (i32, i32) {
    %c0_i32 = arith.constant 0 : i32
    %c0_i32_0 = arith.constant 0 : i32
    return %arg0, %c0_i32 : i32, i32
  }
  func.func @transform_1(%arg0: i32) -> (i32, i32) {
    %c0_i32 = arith.constant 0 : i32
    %c0_i32_0 = arith.constant 0 : i32
    %c0_i32_1 = arith.constant 0 : i32
    return %c0_i32, %c0_i32_0 : i32, i32
  }
  func.func @transform_2(%arg0: i32) -> (i32, i32) {
    %c0_i32 = arith.constant 0 : i32
    %c0_i32_0 = arith.constant 0 : i32
    %c0_i32_1 = arith.constant 0 : i32
    return %c0_i32, %c0_i32_0 : i32, i32
  }
  func.func @transform_3(%arg0: i32) -> (i32, i32) {
    %c0_i32 = arith.constant 0 : i32
    %c0_i32_0 = arith.constant 0 : i32
    %c0_i32_1 = arith.constant 0 : i32
    return %c0_i32, %c0_i32_0 : i32, i32
  }
  func.func @transform_4(%arg0: i32) -> (i32, i32) {
    %c0_i32 = arith.constant 0 : i32
    %c0_i32_0 = arith.constant 0 : i32
    %c0_i32_1 = arith.constant 0 : i32
    return %c0_i32, %c0_i32_0 : i32, i32
  }
  func.func @transform_5(%arg0: i32) -> (i32, i32) {
    %c0_i32 = arith.constant 0 : i32
    %c0_i32_0 = arith.constant 0 : i32
    %c0_i32_1 = arith.constant 0 : i32
    return %c0_i32, %c0_i32_0 : i32, i32
  }
  func.func @transform_6(%arg0: i32) -> (i32, i32) {
    %c0_i32 = arith.constant 0 : i32
    %c0_i32_0 = arith.constant 0 : i32
    %c0_i32_1 = arith.constant 0 : i32
    return %c0_i32, %c0_i32_0 : i32, i32
  }
  func.func @transform_7(%arg0: i32) -> (i32, i32) {
    %c0_i32 = arith.constant 0 : i32
    %c0_i32_0 = arith.constant 0 : i32
    return %arg0, %c0_i32 : i32, i32
  }
}

</mosaic_0001>

<bundles_post_ra>
// kernel: lenet_forward.3
= control target key start
LH: loop header
LB: loop body
LE: loop exit
PB: predicated region body
PF: predicated region fallthrough
CT: control target
= control target key end

     0   :  { %v3097_v0 = vmov 0.0|0.0   ;;  %vm3098_vm0 = vmmov 0   ;;  %v3099_v6 = vmov 0.0   ;;  %s4727_s1 = inlined_call_operand.vmem [shape: f32[128,128], index: 1, kind: input, shape index: {}]   ;;  %s4728_s0 = inlined_call_operand.vmem [shape: f32[4,392,128], index: 0, kind: input, shape index: {}]   ;;  %s4729_s2 = inlined_call_operand.vmem [shape: f32[1,128], index: 2, kind: input, shape index: {}]   ;;  %s4730_s3 = inlined_call_operand.vmem [shape: f32[392,128], index: 3, kind: output, shape index: {}]  }
   0x1   :  { %2996 = vmatprep.subr.bf16.mxu0 %v3097_v0  ;;  %3020 = vmatprep.subr.bf16.mxu1 %v3097_v0  ;;  %v14_v1 = vld [vmem:[%s4727_s1] sm:$0xff]  ;;  %v15_v2 = vld [vmem:[%s4727_s1 + $0x8] sm:$0xff]  ;;  %v16_v3 = vld [vmem:[%s4727_s1 + $0x10] sm:$0xff] }
   0x2   :  { %v2997_v4 = vpack.c.bf16 %v15_v2, %v14_v1  ;;  %v17_v5 = vld [vmem:[%s4727_s1 + $0x18] sm:$0xff]  ;;  %2312 = vmatprep.mubr.msk.f32.mxu0 %vm3098_vm0, %v3099_v6  ;;  %2491 = vmatprep.mubr.msk.f32.mxu1 %vm3098_vm0, %v3099_v6  ;;  %v18_v8 = vld [vmem:[%s4727_s1 + $0x20] sm:$0xff]  ;;  %v19_v9 = vld [vmem:[%s4727_s1 + $0x28] sm:$0xff] }
   0x3   :  { %v3138_v7 = vpack.c.bf16 %v17_v5, %v16_v3  ;;  %v3150_v10 = vpack.c.bf16 %v19_v9, %v18_v8  ;;  %v20_v11 = vld [vmem:[%s4727_s1 + $0x30] sm:$0xff]  ;;  %v21_v12 = vld [vmem:[%s4727_s1 + $0x38] sm:$0xff]  ;;  %v22_v14 = vld [vmem:[%s4727_s1 + $0x40] sm:$0xff] }
   0x4   :  { %2998 = vmatpush3.bf16.msra.mxu0 %v2997_v4  ;;  %3022 = vmatpush3.bf16.msra.mxu1 %v2997_v4  ;;  %v3162_v13 = vpack.c.bf16 %v21_v12, %v20_v11  ;;  %v23_v15 = vld [vmem:[%s4727_s1 + $0x48] sm:$0xff]  ;;  %v24_v17 = vld [vmem:[%s4727_s1 + $0x50] sm:$0xff]  ;;  %v25_v18 = vld [vmem:[%s4727_s1 + $0x58] sm:$0xff] }
   0x5   :  { %2999 = vmatprep.subr.bf16.mxu0 %v3097_v0  ;;  %3023 = vmatprep.subr.bf16.mxu1 %v3097_v0  ;;  %v3174_v16 = vpack.c.bf16 %v23_v15, %v22_v14  ;;  %v3186_v19 = vpack.c.bf16 %v25_v18, %v24_v17  ;;  %v26_v20 = vld [vmem:[%s4727_s1 + $0x60] sm:$0xff]  ;;  %v27_v21 = vld [vmem:[%s4727_s1 + $0x68] sm:$0xff]  ;;  %v28_v23 = vld [vmem:[%s4727_s1 + $0x70] sm:$0xff] }
   0x6   :  { %v3198_v22 = vpack.c.bf16 %v27_v21, %v26_v20  ;;  %v29_v24 = vld [vmem:[%s4727_s1 + $0x78] sm:$0xff]  ;;  %v31_v26 = vld [vmem:[%s4728_s0] sm:$0xff]  ;;  %v1873_v27 = vld [vmem:[%s4728_s0 + $0x188] sm:$0xff] }
   0x7   :  { %v3210_v25 = vpack.c.bf16 %v29_v24, %v28_v23  ;;  %v32_v28 = vld [vmem:[%s4728_s0 + $0x8] sm:$0xff]  ;;  %v1874_v29 = vld [vmem:[%s4728_s0 + $0x190] sm:$0xff]  ;;  %v1875_v31 = vld [vmem:[%s4728_s0 + $0x198] sm:$0xff] }
   0x8   :  { %3001 = vmatpush3.bf16.msra.mxu0 %v3138_v7  ;;  %3025 = vmatpush3.bf16.msra.mxu1 %v3138_v7  ;;  %v33_v30 = vld [vmem:[%s4728_s0 + $0x10] sm:$0xff]  ;;  %v34_v32 = vld [vmem:[%s4728_s0 + $0x18] sm:$0xff]  ;;  %v1876_v33 = vld [vmem:[%s4728_s0 + $0x1a0] sm:$0xff] }
   0x9   :  { %3002 = vmatprep.subr.bf16.mxu0 %v3097_v0  ;;  %3026 = vmatprep.subr.bf16.mxu1 %v3097_v0  ;;  %v35_v34 = vld [vmem:[%s4728_s0 + $0x20] sm:$0xff]  ;;  %v1877_v35 = vld [vmem:[%s4728_s0 + $0x1a8] sm:$0xff]  ;;  %v1878_v37 = vld [vmem:[%s4728_s0 + $0x1b0] sm:$0xff] }
   0xa   :  { %v36_v36 = vld [vmem:[%s4728_s0 + $0x28] sm:$0xff]  ;;  %v37_v38 = vld [vmem:[%s4728_s0 + $0x30] sm:$0xff]  ;;  %v1879_v39 = vld [vmem:[%s4728_s0 + $0x1b8] sm:$0xff] }
   0xb   :  { %v38_v40 = vld [vmem:[%s4728_s0 + $0x38] sm:$0xff]  ;;  %v1880_v41 = vld [vmem:[%s4728_s0 + $0x1c0] sm:$0xff]  ;;  %v1881_v43 = vld [vmem:[%s4728_s0 + $0x1c8] sm:$0xff] }
   0xc   :  { %3004 = vmatpush3.bf16.msra.mxu0 %v3150_v10  ;;  %3028 = vmatpush3.bf16.msra.mxu1 %v3150_v10  ;;  %v39_v42 = vld [vmem:[%s4728_s0 + $0x40] sm:$0xff]  ;;  %v40_v44 = vld [vmem:[%s4728_s0 + $0x48] sm:$0xff]  ;;  %v1882_v45 = vld [vmem:[%s4728_s0 + $0x1d0] sm:$0xff] }
   0xd   :  { %3005 = vmatprep.subr.bf16.mxu0 %v3097_v0  ;;  %3029 = vmatprep.subr.bf16.mxu1 %v3097_v0  ;;  %v41_v46 = vld [vmem:[%s4728_s0 + $0x50] sm:$0xff]  ;;  %v1883_v47 = vld [vmem:[%s4728_s0 + $0x1d8] sm:$0xff]  ;;  %v1884_v49 = vld [vmem:[%s4728_s0 + $0x1e0] sm:$0xff] }
   0xe   :  { %v42_v48 = vld [vmem:[%s4728_s0 + $0x58] sm:$0xff]  ;;  %v43_v50 = vld [vmem:[%s4728_s0 + $0x60] sm:$0xff]  ;;  %v1885_v51 = vld [vmem:[%s4728_s0 + $0x1e8] sm:$0xff] }
   0xf   :  { %v44_v52 = vld [vmem:[%s4728_s0 + $0x68] sm:$0xff]  ;;  %v1886_v53 = vld [vmem:[%s4728_s0 + $0x1f0] sm:$0xff]  ;;  %v1887_v55 = vld [vmem:[%s4728_s0 + $0x1f8] sm:$0xff] }
  0x10   :  { %3007 = vmatpush3.bf16.msra.mxu0 %v3162_v13  ;;  %3031 = vmatpush3.bf16.msra.mxu1 %v3162_v13  ;;  %v45_v54 = vld [vmem:[%s4728_s0 + $0x70] sm:$0xff]  ;;  %v46_v56 = vld [vmem:[%s4728_s0 + $0x78] sm:$0xff]  ;;  %v1888_v57 = vld [vmem:[%s4728_s0 + $0x200] sm:$0xff] }
  0x11   :  { %3008 = vmatprep.subr.bf16.mxu0 %v3097_v0  ;;  %3032 = vmatprep.subr.bf16.mxu1 %v3097_v0  ;;  %v47_v58 = vld [vmem:[%s4728_s0 + $0x80] sm:$0xff]  ;;  %v1889_v59 = vld [vmem:[%s4728_s0 + $0x208] sm:$0xff]  ;;  %v1890_v61 = vld [vmem:[%s4728_s0 + $0x210] sm:$0xff] }
  0x12   :  { %v48_v60 = vld [vmem:[%s4728_s0 + $0x88] sm:$0xff]  ;;  %v49_v62 = vld [vmem:[%s4728_s0 + $0x90] sm:$0xff]  ;;  %v1891_v63 = vld [vmem:[%s4728_s0 + $0x218] sm:$0xff] }
  0x13   :  { %v1892_v1 = vld [vmem:[%s4728_s0 + $0x220] sm:$0xff]  ;;  %v1893_v3 = vld [vmem:[%s4728_s0 + $0x228] sm:$0xff]  ;;  %v1894_v5 = vld [vmem:[%s4728_s0 + $0x230] sm:$0xff] }
  0x14   :  { %3010 = vmatpush3.bf16.msra.mxu0 %v3174_v16  ;;  %3034 = vmatpush3.bf16.msra.mxu1 %v3174_v16  ;;  %v51_v2 = vld [vmem:[%s4728_s0 + $0xa0] sm:$0xff]  ;;  %v1895_v8 = vld [vmem:[%s4728_s0 + $0x238] sm:$0xff]  ;;  %v1897_v12 = vld [vmem:[%s4728_s0 + $0x248] sm:$0xff] }
  0x15   :  { %3011 = vmatprep.subr.bf16.mxu0 %v3097_v0  ;;  %3035 = vmatprep.subr.bf16.mxu1 %v3097_v0  ;;  %v54_v9 = vld [vmem:[%s4728_s0 + $0xb8] sm:$0xff]  ;;  %v55_v11 = vld [vmem:[%s4728_s0 + $0xc0] sm:$0xff]  ;;  %v1898_v14 = vld [vmem:[%s4728_s0 + $0x250] sm:$0xff] }
  0x16   :  { %v57_v15 = vld [vmem:[%s4728_s0 + $0xd0] sm:$0xff]  ;;  %v58_v17 = vld [vmem:[%s4728_s0 + $0xd8] sm:$0xff]  ;;  %v1900_v18 = vld [vmem:[%s4728_s0 + $0x260] sm:$0xff] }
  0x17   :  { %v1901_v20 = vld [vmem:[%s4728_s0 + $0x268] sm:$0xff]  ;;  %v61_v23 = vld [vmem:[%s4728_s0 + $0xf0] sm:$0xff]  ;;  %v1903_v24 = vld [vmem:[%s4728_s0 + $0x278] sm:$0xff] }
  0x18   :  { %3013 = vmatpush3.bf16.msra.mxu0 %v3186_v19  ;;  %3037 = vmatpush3.bf16.msra.mxu1 %v3186_v19  ;;  %v60_v21 = vld [vmem:[%s4728_s0 + $0xe8] sm:$0xff] }
  0x19   :  { %3014 = vmatprep.subr.bf16.mxu0 %v3097_v0  ;;  %3038 = vmatprep.subr.bf16.mxu1 %v3097_v0 }
  0x1c   :  { %3016 = vmatpush3.bf16.msra.mxu0 %v3198_v22  ;;  %3040 = vmatpush3.bf16.msra.mxu1 %v3198_v22 }
  0x1d   :  { %3017 = vmatprep.subr.bf16.mxu0 %v3097_v0  ;;  %3041 = vmatprep.subr.bf16.mxu1 %v3097_v0 }
  0x20   :  { %3019 = vmatpush3.bf16.msra.mxu0 %v3210_v25  ;;  %3043 = vmatpush3.bf16.msra.mxu1 %v3210_v25 }
  0x21   :  { %3044 = vmatprep.subr.bf16.mxu0 %v3097_v0  ;;  %3068 = vmatprep.subr.bf16.mxu1 %v3097_v0 }
  0x23   :  { %2313 = vmatmul.mubr.f32.vlgmr.msra.gmra.mrb[0].mxu0 %v31_v26  ;;  %2492 = vmatmul.mubr.f32.vlgmr.msra.gmra.mrb[0].mxu1 %v1873_v27  ;;  %v1904_v26 = vld [vmem:[%s4728_s0 + $0x280] sm:$0xff] }
  0x24   :  { %3046 = vmatpush3.bf16.msra.mxu0 %v2997_v4  ;;  %3070 = vmatpush3.bf16.msra.mxu1 %v2997_v4  ;;  %v52_v4 = vld [vmem:[%s4728_s0 + $0xa8] sm:$0xff]  ;;  %v63_v27 = vld [vmem:[%s4728_s0 + $0x100] sm:$0xff] }
  0x25   :  { %2315 = vmatprep.mubr.msk.f32.mxu0 %vm3098_vm0, %v3099_v6  ;;  %2494 = vmatprep.mubr.msk.f32.mxu1 %vm3098_vm0, %v3099_v6 }
  0x26   :  { %3047 = vmatprep.subr.bf16.mxu0 %v3097_v0  ;;  %3071 = vmatprep.subr.bf16.mxu1 %v3097_v0 }
  0x27   :  { %2316 = vmatmul.mubr.f32.gmra.mrb[2].mxu0 %v32_v28  ;;  %2495 = vmatmul.mubr.f32.gmra.mrb[2].mxu1 %v1874_v29  ;;  %v1905_v28 = vld [vmem:[%s4728_s0 + $0x288] sm:$0xff] }
  0x28   :  { %2318 = vmatprep.mubr.msk.f32.mxu0 %vm3098_vm0, %v3099_v6  ;;  %2497 = vmatprep.mubr.msk.f32.mxu1 %vm3098_vm0, %v3099_v6  ;;  %v64_v29 = vld [vmem:[%s4728_s0 + $0x108] sm:$0xff] }
  0x29   :  { %3049 = vmatpush3.bf16.msra.mxu0 %v3138_v7  ;;  %3073 = vmatpush3.bf16.msra.mxu1 %v3138_v7  ;;  %v53_v7 = vld [vmem:[%s4728_s0 + $0xb0] sm:$0xff] }
  0x2a   :  { %3050 = vmatprep.subr.bf16.mxu0 %v3097_v0  ;;  %3074 = vmatprep.subr.bf16.mxu1 %v3097_v0 }
  0x2b   :  { %2319 = vmatmul.mubr.f32.gmra.mrb[4].mxu0 %v33_v30  ;;  %2498 = vmatmul.mubr.f32.gmra.mrb[4].mxu1 %v1875_v31  ;;  %v1906_v30 = vld [vmem:[%s4728_s0 + $0x290] sm:$0xff] }
  0x2c   :  { %2321 = vmatprep.mubr.msk.f32.mxu0 %vm3098_vm0, %v3099_v6  ;;  %2500 = vmatprep.mubr.msk.f32.mxu1 %vm3098_vm0, %v3099_v6  ;;  %v65_v31 = vld [vmem:[%s4728_s0 + $0x110] sm:$0xff] }
  0x2d   :  { %3052 = vmatpush3.bf16.msra.mxu0 %v3150_v10  ;;  %3076 = vmatpush3.bf16.msra.mxu1 %v3150_v10  ;;  %v1896_v10 = vld [vmem:[%s4728_s0 + $0x240] sm:$0xff] }
  0x2e   :  { %3053 = vmatprep.subr.bf16.mxu0 %v3097_v0  ;;  %3077 = vmatprep.subr.bf16.mxu1 %v3097_v0 }
  0x2f   :  { %2322 = vmatmul.mubr.f32.gmra.mrb[6].mxu0 %v34_v32  ;;  %2501 = vmatmul.mubr.f32.gmra.mrb[6].mxu1 %v1876_v33  ;;  %v1907_v32 = vld [vmem:[%s4728_s0 + $0x298] sm:$0xff] }
  0x30   :  { %2324 = vmatprep.mubr.msk.f32.mxu0 %vm3098_vm0, %v3099_v6  ;;  %2503 = vmatprep.mubr.msk.f32.mxu1 %vm3098_vm0, %v3099_v6  ;;  %v66_v33 = vld [vmem:[%s4728_s0 + $0x118] sm:$0xff] }
  0x31   :  { %3055 = vmatpush3.bf16.msra.mxu0 %v3162_v13  ;;  %3079 = vmatpush3.bf16.msra.mxu1 %v3162_v13  ;;  %v56_v13 = vld [vmem:[%s4728_s0 + $0xc8] sm:$0xff] }
  0x32   :  { %3056 = vmatprep.subr.bf16.mxu0 %v3097_v0  ;;  %3080 = vmatprep.subr.bf16.mxu1 %v3097_v0 }
  0x33   :  { %2325 = vmatmul.mubr.f32.gmra.mrb[8].mxu0 %v35_v34  ;;  %2504 = vmatmul.mubr.f32.gmra.mrb[8].mxu1 %v1877_v35  ;;  %v1908_v34 = vld [vmem:[%s4728_s0 + $0x2a0] sm:$0xff] }
  0x34   :  { %2327 = vmatprep.mubr.msk.f32.mxu0 %vm3098_vm0, %v3099_v6  ;;  %2506 = vmatprep.mubr.msk.f32.mxu1 %vm3098_vm0, %v3099_v6  ;;  %v67_v35 = vld [vmem:[%s4728_s0 + $0x120] sm:$0xff] }
  0x35   :  { %3058 = vmatpush3.bf16.msra.mxu0 %v3174_v16  ;;  %3082 = vmatpush3.bf16.msra.mxu1 %v3174_v16  ;;  %v1899_v16 = vld [vmem:[%s4728_s0 + $0x258] sm:$0xff] }
  0x36   :  { %3059 = vmatprep.subr.bf16.mxu0 %v3097_v0  ;;  %3083 = vmatprep.subr.bf16.mxu1 %v3097_v0 }
  0x37   :  { %2328 = vmatmul.mubr.f32.gmra.mrb[10].mxu0 %v36_v36  ;;  %2507 = vmatmul.mubr.f32.gmra.mrb[10].mxu1 %v1878_v37  ;;  %v1909_v36 = vld [vmem:[%s4728_s0 + $0x2a8] sm:$0xff] }
  0x38   :  { %2330 = vmatprep.mubr.msk.f32.mxu0 %vm3098_vm0, %v3099_v6  ;;  %2509 = vmatprep.mubr.msk.f32.mxu1 %vm3098_vm0, %v3099_v6  ;;  %v68_v37 = vld [vmem:[%s4728_s0 + $0x128] sm:$0xff] }
  0x39   :  { %3061 = vmatpush3.bf16.msra.mxu0 %v3186_v19  ;;  %3085 = vmatpush3.bf16.msra.mxu1 %v3186_v19  ;;  %v59_v19 = vld [vmem:[%s4728_s0 + $0xe0] sm:$0xff] }
  0x3a   :  { %3062 = vmatprep.subr.bf16.mxu0 %v3097_v0  ;;  %3086 = vmatprep.subr.bf16.mxu1 %v3097_v0 }
  0x3b   :  { %2331 = vmatmul.mubr.f32.gmra.mrb[12].mxu0 %v37_v38  ;;  %2510 = vmatmul.mubr.f32.gmra.mrb[12].mxu1 %v1879_v39  ;;  %v1910_v38 = vld [vmem:[%s4728_s0 + $0x2b0] sm:$0xff] }
  0x3c   :  { %2333 = vmatprep.mubr.msk.f32.mxu0 %vm3098_vm0, %v3099_v6  ;;  %2512 = vmatprep.mubr.msk.f32.mxu1 %vm3098_vm0, %v3099_v6  ;;  %v69_v39 = vld [vmem:[%s4728_s0 + $0x130] sm:$0xff] }
  0x3d   :  { %3064 = vmatpush3.bf16.msra.mxu0 %v3198_v22  ;;  %3088 = vmatpush3.bf16.msra.mxu1 %v3198_v22  ;;  %v1902_v22 = vld [vmem:[%s4728_s0 + $0x270] sm:$0xff] }
  0x3e   :  { %3065 = vmatprep.subr.bf16.mxu0 %v3097_v0  ;;  %3089 = vmatprep.subr.bf16.mxu1 %v3097_v0  ;;  %v50_v0 = vld [vmem:[%s4728_s0 + $0x98] sm:$0xff] }
  0x3f   :  { %2334 = vmatmul.mubr.f32.gmra.mrb[14].mxu0 %v38_v40  ;;  %2513 = vmatmul.mubr.f32.gmra.mrb[14].mxu1 %v1880_v41  ;;  %v1911_v40 = vld [vmem:[%s4728_s0 + $0x2b8] sm:$0xff] }
  0x40   :  { %2336 = vmatprep.mubr.msk.f32.mxu0 %vm3098_vm0, %v3099_v6  ;;  %2515 = vmatprep.mubr.msk.f32.mxu1 %vm3098_vm0, %v3099_v6  ;;  %v70_v41 = vld [vmem:[%s4728_s0 + $0x138] sm:$0xff] }
  0x41   :  { %3067 = vmatpush3.bf16.msra.mxu0 %v3210_v25  ;;  %3091 = vmatpush3.bf16.msra.mxu1 %v3210_v25  ;;  %v62_v25 = vld [vmem:[%s4728_s0 + $0xf8] sm:$0xff] }
  0x43   :  { %2337 = vmatmul.mubr.f32.gmra.mrb[16].mxu0 %v39_v42  ;;  %2516 = vmatmul.mubr.f32.gmra.mrb[16].mxu1 %v1881_v43  ;;  %v1912_v42 = vld [vmem:[%s4728_s0 + $0x2c0] sm:$0xff] }
  0x44   :  { %2339 = vmatprep.mubr.msk.f32.mxu0 %vm3098_vm0, %v3099_v6  ;;  %2518 = vmatprep.mubr.msk.f32.mxu1 %vm3098_vm0, %v3099_v6  ;;  %v71_v43 = vld [vmem:[%s4728_s0 + $0x140] sm:$0xff] }
  0x47   :  { %2340 = vmatmul.mubr.f32.gmra.mrb[18].mxu0 %v40_v44  ;;  %2519 = vmatmul.mubr.f32.gmra.mrb[18].mxu1 %v1882_v45  ;;  %v1913_v44 = vld [vmem:[%s4728_s0 + $0x2c8] sm:$0xff] }
  0x48   :  { %2342 = vmatprep.mubr.msk.f32.mxu0 %vm3098_vm0, %v3099_v6  ;;  %2521 = vmatprep.mubr.msk.f32.mxu1 %vm3098_vm0, %v3099_v6  ;;  %v72_v45 = vld [vmem:[%s4728_s0 + $0x148] sm:$0xff] }
  0x4b   :  { %2343 = vmatmul.mubr.f32.gmra.mrb[20].mxu0 %v41_v46  ;;  %2522 = vmatmul.mubr.f32.gmra.mrb[20].mxu1 %v1883_v47  ;;  %v1914_v46 = vld [vmem:[%s4728_s0 + $0x2d0] sm:$0xff] }
  0x4c   :  { %2345 = vmatprep.mubr.msk.f32.mxu0 %vm3098_vm0, %v3099_v6  ;;  %2524 = vmatprep.mubr.msk.f32.mxu1 %vm3098_vm0, %v3099_v6  ;;  %v73_v47 = vld [vmem:[%s4728_s0 + $0x150] sm:$0xff] }
  0x4f   :  { %2346 = vmatmul.mubr.f32.gmra.mrb[22].mxu0 %v42_v48  ;;  %2525 = vmatmul.mubr.f32.gmra.mrb[22].mxu1 %v1884_v49  ;;  %v1915_v48 = vld [vmem:[%s4728_s0 + $0x2d8] sm:$0xff] }
  0x50   :  { %2348 = vmatprep.mubr.msk.f32.mxu0 %vm3098_vm0, %v3099_v6  ;;  %2527 = vmatprep.mubr.msk.f32.mxu1 %vm3098_vm0, %v3099_v6  ;;  %v74_v49 = vld [vmem:[%s4728_s0 + $0x158] sm:$0xff] }
  0x53   :  { %2349 = vmatmul.mubr.f32.gmra.mrb[24].mxu0 %v43_v50  ;;  %2528 = vmatmul.mubr.f32.gmra.mrb[24].mxu1 %v1885_v51  ;;  %v1916_v50 = vld [vmem:[%s4728_s0 + $0x2e0] sm:$0xff] }
  0x54   :  { %2351 = vmatprep.mubr.msk.f32.mxu0 %vm3098_vm0, %v3099_v6  ;;  %2530 = vmatprep.mubr.msk.f32.mxu1 %vm3098_vm0, %v3099_v6  ;;  %v75_v51 = vld [vmem:[%s4728_s0 + $0x160] sm:$0xff] }
  0x57   :  { %2352 = vmatmul.mubr.f32.gmra.mrb[26].mxu0 %v44_v52  ;;  %2531 = vmatmul.mubr.f32.gmra.mrb[26].mxu1 %v1886_v53  ;;  %v1917_v52 = vld [vmem:[%s4728_s0 + $0x2e8] sm:$0xff] }
  0x58   :  { %2354 = vmatprep.mubr.msk.f32.mxu0 %vm3098_vm0, %v3099_v6  ;;  %2533 = vmatprep.mubr.msk.f32.mxu1 %vm3098_vm0, %v3099_v6  ;;  %v76_v53 = vld [vmem:[%s4728_s0 + $0x168] sm:$0xff] }
  0x5b   :  { %2355 = vmatmul.mubr.f32.gmra.mrb[28].mxu0 %v45_v54  ;;  %2534 = vmatmul.mubr.f32.gmra.mrb[28].mxu1 %v1887_v55  ;;  %v1918_v54 = vld [vmem:[%s4728_s0 + $0x2f0] sm:$0xff] }
  0x5c   :  { %2357 = vmatprep.mubr.msk.f32.mxu0 %vm3098_vm0, %v3099_v6  ;;  %2536 = vmatprep.mubr.msk.f32.mxu1 %vm3098_vm0, %v3099_v6  ;;  %v77_v55 = vld [vmem:[%s4728_s0 + $0x170] sm:$0xff] }
  0x5f   :  { %2358 = vmatmul.mubr.f32.gmra.mrb[30].mxu0 %v46_v56  ;;  %2537 = vmatmul.mubr.f32.gmra.mrb[30].mxu1 %v1888_v57  ;;  %v1919_v56 = vld [vmem:[%s4728_s0 + $0x2f8] sm:$0xff] }
  0x60   :  { %2360 = vmatprep.mubr.msk.f32.mxu0 %vm3098_vm0, %v3099_v6  ;;  %2539 = vmatprep.mubr.msk.f32.mxu1 %vm3098_vm0, %v3099_v6  ;;  %v78_v57 = vld [vmem:[%s4728_s0 + $0x178] sm:$0xff] }
  0x63   :  { %2361 = vmatmul.mubr.f32.gmra.mrb[32].mxu0 %v47_v58  ;;  %2540 = vmatmul.mubr.f32.gmra.mrb[32].mxu1 %v1889_v59  ;;  %v1920_v58 = vld [vmem:[%s4728_s0 + $0x300] sm:$0xff] }
  0x64   :  { %2363 = vmatprep.mubr.msk.f32.mxu0 %vm3098_vm0, %v3099_v6  ;;  %2542 = vmatprep.mubr.msk.f32.mxu1 %vm3098_vm0, %v3099_v6  ;;  %v79_v59 = vld [vmem:[%s4728_s0 + $0x180] sm:$0xff] }
  0x67   :  { %2364 = vmatmul.mubr.f32.gmra.mrb[34].mxu0 %v48_v60  ;;  %2543 = vmatmul.mubr.f32.gmra.mrb[34].mxu1 %v1890_v61  ;;  %v1921_v60 = vld [vmem:[%s4728_s0 + $0x308] sm:$0xff]  ;;  %v1922_v61 = vld [vmem:[%s4728_s0 + $0x310] sm:$0xff] }
  0x68   :  { %2366 = vmatprep.mubr.msk.f32.mxu0 %vm3098_vm0, %v3099_v6  ;;  %2545 = vmatprep.mubr.msk.f32.mxu1 %vm3098_vm0, %v3099_v6 }
  0x6b   :  { %2367 = vmatmul.mubr.f32.gmra.mrb[36].mxu0 %v49_v62  ;;  %2546 = vmatmul.mubr.f32.gmra.mrb[36].mxu1 %v1891_v63  ;;  %v1971_v62 = vld [vmem:[%s4728_s0 + $0x498] sm:$0xff] }
  0x6c   :  { %2369 = vmatprep.mubr.msk.f32.mxu0 %vm3098_vm0, %v3099_v6  ;;  %2548 = vmatprep.mubr.msk.f32.mxu1 %vm3098_vm0, %v3099_v6  ;;  %v1923_v63 = vld [vmem:[%s4728_s0 + $0x318] sm:$0xff] }
  0x6f   :  { %2370 = vmatmul.mubr.f32.gmra.mrb[38].mxu0 %v50_v0  ;;  %2549 = vmatmul.mubr.f32.gmra.mrb[38].mxu1 %v1892_v1  ;;  %v1972_v0 = vld [vmem:[%s4728_s0 + $0x4a0] sm:$0xff] }
  0x70   :  { %2372 = vmatprep.mubr.msk.f32.mxu0 %vm3098_vm0, %v3099_v6  ;;  %2551 = vmatprep.mubr.msk.f32.mxu1 %vm3098_vm0, %v3099_v6  ;;  %v1924_v1 = vld [vmem:[%s4728_s0 + $0x320] sm:$0xff] }
  0x73   :  { %2373 = vmatmul.mubr.f32.gmra.mrb[40].mxu0 %v51_v2  ;;  %2552 = vmatmul.mubr.f32.gmra.mrb[40].mxu1 %v1893_v3  ;;  %v1973_v2 = vld [vmem:[%s4728_s0 + $0x4a8] sm:$0xff] }
  0x74   :  { %2375 = vmatprep.mubr.msk.f32.mxu0 %vm3098_vm0, %v3099_v6  ;;  %2554 = vmatprep.mubr.msk.f32.mxu1 %vm3098_vm0, %v3099_v6  ;;  %v1925_v3 = vld [vmem:[%s4728_s0 + $0x328] sm:$0xff] }
  0x77   :  { %2376 = vmatmul.mubr.f32.gmra.mrb[42].mxu0 %v52_v4  ;;  %2555 = vmatmul.mubr.f32.gmra.mrb[42].mxu1 %v1894_v5  ;;  %v1974_v4 = vld [vmem:[%s4728_s0 + $0x4b0] sm:$0xff]  ;;  %v3775_v5 = vld [vmem:[%s4729_s2] ss:$0 sm:$0xff] }
  0x78   :  { %2378 = vmatprep.mubr.msk.f32.mxu0 %vm3098_vm0, %v3099_v6  ;;  %2557 = vmatprep.mubr.msk.f32.mxu1 %vm3098_vm0, %v3099_v6 }
  0x7b   :  { %2379 = vmatmul.mubr.f32.gmra.mrb[44].mxu0 %v53_v7  ;;  %2558 = vmatmul.mubr.f32.gmra.mrb[44].mxu1 %v1895_v8  ;;  %v1926_v7 = vld [vmem:[%s4728_s0 + $0x330] sm:$0xff]  ;;  %v1975_v8 = vld [vmem:[%s4728_s0 + $0x4b8] sm:$0xff] }
  0x7c   :  { %2381 = vmatprep.mubr.msk.f32.mxu0 %vm3098_vm0, %v3099_v6  ;;  %2560 = vmatprep.mubr.msk.f32.mxu1 %vm3098_vm0, %v3099_v6 }
  0x7f   :  { %2382 = vmatmul.mubr.f32.gmra.mrb[46].mxu0 %v54_v9  ;;  %2561 = vmatmul.mubr.f32.gmra.mrb[46].mxu1 %v1896_v10 }
  0x80   :  { %2384 = vmatprep.mubr.msk.f32.mxu0 %vm3098_vm0, %v3099_v6  ;;  %2563 = vmatprep.mubr.msk.f32.mxu1 %vm3098_vm0, %v3099_v6 }
  0x83   :  { %2385 = vmatmul.mubr.f32.gmra.mrb[48].mxu0 %v55_v11  ;;  %2564 = vmatmul.mubr.f32.gmra.mrb[48].mxu1 %v1897_v12 }
  0x84   :  { %2387 = vmatprep.mubr.msk.f32.mxu0 %vm3098_vm0, %v3099_v6  ;;  %2566 = vmatprep.mubr.msk.f32.mxu1 %vm3098_vm0, %v3099_v6 }
  0x87   :  { %2388 = vmatmul.mubr.f32.gmra.mrb[50].mxu0 %v56_v13  ;;  %2567 = vmatmul.mubr.f32.gmra.mrb[50].mxu1 %v1898_v14 }
  0x88   :  { %2390 = vmatprep.mubr.msk.f32.mxu0 %vm3098_vm0, %v3099_v6  ;;  %2569 = vmatprep.mubr.msk.f32.mxu1 %vm3098_vm0, %v3099_v6 }
  0x8b   :  { %2391 = vmatmul.mubr.f32.gmra.mrb[52].mxu0 %v57_v15  ;;  %2570 = vmatmul.mubr.f32.gmra.mrb[52].mxu1 %v1899_v16  ;;  %v1927_v15 = vld [vmem:[%s4728_s0 + $0x338] sm:$0xff]  ;;  %v1976_v16 = vld [vmem:[%s4728_s0 + $0x4c0] sm:$0xff] }
  0x8c   :  { %2393 = vmatprep.mubr.msk.f32.mxu0 %vm3098_vm0, %v3099_v6  ;;  %2572 = vmatprep.mubr.msk.f32.mxu1 %vm3098_vm0, %v3099_v6 }
  0x8f   :  { %2394 = vmatmul.mubr.f32.gmra.mrb[54].mxu0 %v58_v17  ;;  %2573 = vmatmul.mubr.f32.gmra.mrb[54].mxu1 %v1900_v18 }
  0x90   :  { %2396 = vmatprep.mubr.msk.f32.mxu0 %vm3098_vm0, %v3099_v6  ;;  %2575 = vmatprep.mubr.msk.f32.mxu1 %vm3098_vm0, %v3099_v6 }
  0x93   :  { %2397 = vmatmul.mubr.f32.gmra.mrb[56].mxu0 %v59_v19  ;;  %2576 = vmatmul.mubr.f32.gmra.mrb[56].mxu1 %v1901_v20 }
  0x94   :  { %2399 = vmatprep.mubr.msk.f32.mxu0 %vm3098_vm0, %v3099_v6  ;;  %2578 = vmatprep.mubr.msk.f32.mxu1 %vm3098_vm0, %v3099_v6 }
  0x97   :  { %2400 = vmatmul.mubr.f32.gmra.mrb[58].mxu0 %v60_v21  ;;  %2579 = vmatmul.mubr.f32.gmra.mrb[58].mxu1 %v1902_v22 }
  0x98   :  { %2402 = vmatprep.mubr.msk.f32.mxu0 %vm3098_vm0, %v3099_v6  ;;  %2581 = vmatprep.mubr.msk.f32.mxu1 %vm3098_vm0, %v3099_v6 }
  0x9b   :  { %2403 = vmatmul.mubr.f32.gmra.mrb[60].mxu0 %v61_v23  ;;  %2582 = vmatmul.mubr.f32.gmra.mrb[60].mxu1 %v1903_v24 }
  0x9c   :  { %2405 = vmatprep.mubr.msk.f32.mxu0 %vm3098_vm0, %v3099_v6  ;;  %2584 = vmatprep.mubr.msk.f32.mxu1 %vm3098_vm0, %v3099_v6 }
  0x9f   :  { %2406 = vmatmul.mubr.f32.gmra.mrb[62].mxu0 %v62_v25  ;;  %2585 = vmatmul.mubr.f32.gmra.mrb[62].mxu1 %v1904_v26  ;;  %v1928_v26 = vld [vmem:[%s4728_s0 + $0x340] sm:$0xff] }
  0xa0   :  { %2408 = vmatprep.mubr.msk.f32.mxu0 %vm3098_vm0, %v3099_v6  ;;  %2587 = vmatprep.mubr.msk.f32.mxu1 %vm3098_vm0, %v3099_v6 }
  0xa3   :  { %2409 = vmatmul.mubr.f32.gmra.mrb[64].mxu0 %v63_v27  ;;  %2588 = vmatmul.mubr.f32.gmra.mrb[64].mxu1 %v1905_v28  ;;  %v1977_v27 = vld [vmem:[%s4728_s0 + $0x4c8] sm:$0xff] }
  0xa4   :  { %2411 = vmatprep.mubr.msk.f32.mxu0 %vm3098_vm0, %v3099_v6  ;;  %2590 = vmatprep.mubr.msk.f32.mxu1 %vm3098_vm0, %v3099_v6 }
  0xa7   :  { %2412 = vmatmul.mubr.f32.gmra.mrb[66].mxu0 %v64_v29  ;;  %2591 = vmatmul.mubr.f32.gmra.mrb[66].mxu1 %v1906_v30 }
  0xa8   :  { %2414 = vmatprep.mubr.msk.f32.mxu0 %vm3098_vm0, %v3099_v6  ;;  %2593 = vmatprep.mubr.msk.f32.mxu1 %vm3098_vm0, %v3099_v6 }
  0xab   :  { %2415 = vmatmul.mubr.f32.gmra.mrb[68].mxu0 %v65_v31  ;;  %2594 = vmatmul.mubr.f32.gmra.mrb[68].mxu1 %v1907_v32 }
  0xac   :  { %2417 = vmatprep.mubr.msk.f32.mxu0 %vm3098_vm0, %v3099_v6  ;;  %2596 = vmatprep.mubr.msk.f32.mxu1 %vm3098_vm0, %v3099_v6 }
  0xaf   :  { %2418 = vmatmul.mubr.f32.gmra.mrb[70].mxu0 %v66_v33  ;;  %2597 = vmatmul.mubr.f32.gmra.mrb[70].mxu1 %v1908_v34 }
  0xb0   :  { %2420 = vmatprep.mubr.msk.f32.mxu0 %vm3098_vm0, %v3099_v6  ;;  %2599 = vmatprep.mubr.msk.f32.mxu1 %vm3098_vm0, %v3099_v6 }
  0xb3   :  { %2421 = vmatmul.mubr.f32.gmra.mrb[72].mxu0 %v67_v35  ;;  %2600 = vmatmul.mubr.f32.gmra.mrb[72].mxu1 %v1909_v36 }
  0xb4   :  { %2423 = vmatprep.mubr.msk.f32.mxu0 %vm3098_vm0, %v3099_v6  ;;  %2602 = vmatprep.mubr.msk.f32.mxu1 %vm3098_vm0, %v3099_v6 }
  0xb7   :  { %2424 = vmatmul.mubr.f32.gmra.mrb[74].mxu0 %v68_v37  ;;  %2603 = vmatmul.mubr.f32.gmra.mrb[74].mxu1 %v1910_v38  ;;  %v1929_v37 = vld [vmem:[%s4728_s0 + $0x348] sm:$0xff]  ;;  %v1978_v38 = vld [vmem:[%s4728_s0 + $0x4d0] sm:$0xff] }
  0xb8   :  { %2426 = vmatprep.mubr.msk.f32.mxu0 %vm3098_vm0, %v3099_v6  ;;  %2605 = vmatprep.mubr.msk.f32.mxu1 %vm3098_vm0, %v3099_v6 }
  0xbb   :  { %2427 = vmatmul.mubr.f32.gmra.mrb[76].mxu0 %v69_v39  ;;  %2606 = vmatmul.mubr.f32.gmra.mrb[76].mxu1 %v1911_v40 }
  0xbc   :  { %2429 = vmatprep.mubr.msk.f32.mxu0 %vm3098_vm0, %v3099_v6  ;;  %2608 = vmatprep.mubr.msk.f32.mxu1 %vm3098_vm0, %v3099_v6 }
  0xbf   :  { %2430 = vmatmul.mubr.f32.gmra.mrb[78].mxu0 %v70_v41  ;;  %2609 = vmatmul.mubr.f32.gmra.mrb[78].mxu1 %v1912_v42 }
  0xc0   :  { %2432 = vmatprep.mubr.msk.f32.mxu0 %vm3098_vm0, %v3099_v6  ;;  %2611 = vmatprep.mubr.msk.f32.mxu1 %vm3098_vm0, %v3099_v6 }
  0xc3   :  { %2433 = vmatmul.mubr.f32.gmra.mrb[80].mxu0 %v71_v43  ;;  %2612 = vmatmul.mubr.f32.gmra.mrb[80].mxu1 %v1913_v44 }
  0xc4   :  { %2435 = vmatprep.mubr.msk.f32.mxu0 %vm3098_vm0, %v3099_v6  ;;  %2614 = vmatprep.mubr.msk.f32.mxu1 %vm3098_vm0, %v3099_v6 }
  0xc7   :  { %2436 = vmatmul.mubr.f32.gmra.mrb[82].mxu0 %v72_v45  ;;  %2615 = vmatmul.mubr.f32.gmra.mrb[82].mxu1 %v1914_v46 }
  0xc8   :  { %2438 = vmatprep.mubr.msk.f32.mxu0 %vm3098_vm0, %v3099_v6  ;;  %2617 = vmatprep.mubr.msk.f32.mxu1 %vm3098_vm0, %v3099_v6 }
  0xcb   :  { %2439 = vmatmul.mubr.f32.gmra.mrb[84].mxu0 %v73_v47  ;;  %2618 = vmatmul.mubr.f32.gmra.mrb[84].mxu1 %v1915_v48  ;;  %v1930_v48 = vld [vmem:[%s4728_s0 + $0x350] sm:$0xff] }
  0xcc   :  { %2441 = vmatprep.mubr.msk.f32.mxu0 %vm3098_vm0, %v3099_v6  ;;  %2620 = vmatprep.mubr.msk.f32.mxu1 %vm3098_vm0, %v3099_v6 }
  0xcf   :  { %2442 = vmatmul.mubr.f32.gmra.mrb[86].mxu0 %v74_v49  ;;  %2621 = vmatmul.mubr.f32.gmra.mrb[86].mxu1 %v1916_v50  ;;  %v1979_v49 = vld [vmem:[%s4728_s0 + $0x4d8] sm:$0xff] }
  0xd0   :  { %2444 = vmatprep.mubr.msk.f32.mxu0 %vm3098_vm0, %v3099_v6  ;;  %2623 = vmatprep.mubr.msk.f32.mxu1 %vm3098_vm0, %v3099_v6 }
  0xd3   :  { %2445 = vmatmul.mubr.f32.gmra.mrb[88].mxu0 %v75_v51  ;;  %2624 = vmatmul.mubr.f32.gmra.mrb[88].mxu1 %v1917_v52 }
  0xd4   :  { %2447 = vmatprep.mubr.msk.f32.mxu0 %vm3098_vm0, %v3099_v6  ;;  %2626 = vmatprep.mubr.msk.f32.mxu1 %vm3098_vm0, %v3099_v6 }
  0xd7   :  { %2448 = vmatmul.mubr.f32.gmra.mrb[90].mxu0 %v76_v53  ;;  %2627 = vmatmul.mubr.f32.gmra.mrb[90].mxu1 %v1918_v54 }
  0xd8   :  { %2450 = vmatprep.mubr.msk.f32.mxu0 %vm3098_vm0, %v3099_v6  ;;  %2629 = vmatprep.mubr.msk.f32.mxu1 %vm3098_vm0, %v3099_v6 }
  0xdb   :  { %2451 = vmatmul.mubr.f32.gmra.mrb[92].mxu0 %v77_v55  ;;  %2630 = vmatmul.mubr.f32.gmra.mrb[92].mxu1 %v1919_v56 }
  0xdc   :  { %2453 = vmatprep.mubr.msk.f32.mxu0 %vm3098_vm0, %v3099_v6  ;;  %2632 = vmatprep.mubr.msk.f32.mxu1 %vm3098_vm0, %v3099_v6 }
  0xdf   :  { %2454 = vmatmul.mubr.f32.gmra.mrb[94].mxu0 %v78_v57  ;;  %2633 = vmatmul.mubr.f32.gmra.mrb[94].mxu1 %v1920_v58 }
  0xe0   :  { %2456 = vmatprep.mubr.msk.f32.mxu0 %vm3098_vm0, %v3099_v6  ;;  %2635 = vmatprep.mubr.msk.f32.mxu1 %vm3098_vm0, %v3099_v6 }
  0xe3   :  { %2457 = vmatmul.mubr.f32.gmra.mrb[96].mxu0 %v79_v59  ;;  %2636 = vmatmul.mubr.f32.gmra.mrb[96].mxu1 %v1921_v60  ;;  %v1931_v59 = vld [vmem:[%s4728_s0 + $0x358] sm:$0xff]  ;;  %v1980_v60 = vld [vmem:[%s4728_s0 + $0x4e0] sm:$0xff] }
  0xe4   :  { %2670 = vmatprep.mubr.msk.f32.mxu0 %vm3098_vm0, %v3099_v6  ;;  %2849 = vmatprep.mubr.msk.f32.mxu1 %vm3098_vm0, %v3099_v6 }
  0xe7   :  { %2671 = vmatmul.mubr.f32.vlgmr.msra.gmra.mrb[98].mxu0 %v1922_v61  ;;  %2850 = vmatmul.mubr.f32.vlgmr.msra.gmra.mrb[98].mxu1 %v1971_v62 }
  0xe8   :  { %2673 = vmatprep.mubr.msk.f32.mxu0 %vm3098_vm0, %v3099_v6  ;;  %2852 = vmatprep.mubr.msk.f32.mxu1 %vm3098_vm0, %v3099_v6 }
  0xeb   :  { %2674 = vmatmul.mubr.f32.gmra.mrb[100].mxu0 %v1923_v63  ;;  %2853 = vmatmul.mubr.f32.gmra.mrb[100].mxu1 %v1972_v0 }
  0xec   :  { %2676 = vmatprep.mubr.msk.f32.mxu0 %vm3098_vm0, %v3099_v6  ;;  %2855 = vmatprep.mubr.msk.f32.mxu1 %vm3098_vm0, %v3099_v6 }
  0xef   :  { %2677 = vmatmul.mubr.f32.gmra.mrb[102].mxu0 %v1924_v1  ;;  %2856 = vmatmul.mubr.f32.gmra.mrb[102].mxu1 %v1973_v2 }
  0xf0   :  { %2679 = vmatprep.mubr.msk.f32.mxu0 %vm3098_vm0, %v3099_v6  ;;  %2858 = vmatprep.mubr.msk.f32.mxu1 %vm3098_vm0, %v3099_v6 }
  0xf3   :  { %2680 = vmatmul.mubr.f32.gmra.mrb[104].mxu0 %v1925_v3  ;;  %2859 = vmatmul.mubr.f32.gmra.mrb[104].mxu1 %v1974_v4 }
  0xf4   :  { %2682 = vmatprep.mubr.msk.f32.mxu0 %vm3098_vm0, %v3099_v6  ;;  %2861 = vmatprep.mubr.msk.f32.mxu1 %vm3098_vm0, %v3099_v6 }
  0xf6   :  { %v152_v9 = vpop.f32.mrb[0].mxu0  ;;  %v561_v10 = vpop.f32.mrb[0].mxu1 }
  0xf7   :  { %v153_v11 = vadd.f32 %v3775_v5, %v152_v9  ;;  %v562_v12 = vadd.f32 %v3775_v5, %v561_v10  ;;  %v2314_v13 = vpop.f32.mrb[1].mxu0  ;;  %v2493_v14 = vpop.f32.mrb[1].mxu1  ;;  %2683 = vmatmul.mubr.f32.gmra.mrb[106].mxu0 %v1926_v7  ;;  %2862 = vmatmul.mubr.f32.gmra.mrb[106].mxu1 %v1975_v8  ;;  %v1932_v8 = vld [vmem:[%s4728_s0 + $0x360] sm:$0xff]  ;;  %v1981_v9 = vld [vmem:[%s4728_s0 + $0x4e8] sm:$0xff] }
  0xf8   :  { %2685 = vmatprep.mubr.msk.f32.mxu0 %vm3098_vm0, %v3099_v6  ;;  %2864 = vmatprep.mubr.msk.f32.mxu1 %vm3098_vm0, %v3099_v6 }
  0xf9   :  { %v396_v17 = vmax.f32 %v153_v11, 0.0  ;;  %v805_v18 = vmax.f32 %v562_v12, 0.0 }
  0xfa   :  { %v157_v19 = vpop.f32.mrb[2].mxu0  ;;  %v566_v20 = vpop.f32.mrb[2].mxu1 }
  0xfb   :  { %v3799_v21 = vmax.f32 %v396_v17, %v805_v18  ;;  %v158_v22 = vadd.f32 %v3775_v5, %v157_v19  ;;  %v567_v23 = vadd.f32 %v3775_v5, %v566_v20  ;;  %v2317_v24 = vpop.f32.mrb[3].mxu0  ;;  %v2496_v25 = vpop.f32.mrb[3].mxu1  ;;  %2686 = vmatmul.mubr.f32.gmra.mrb[108].mxu0 %v1927_v15  ;;  %2865 = vmatmul.mubr.f32.gmra.mrb[108].mxu1 %v1976_v16  ;;  %v1933_v19 = vld [vmem:[%s4728_s0 + $0x368] sm:$0xff]  ;;  %v1982_v20 = vld [vmem:[%s4728_s0 + $0x4f0] sm:$0xff] }
  0xfc   :  { %2688 = vmatprep.mubr.msk.f32.mxu0 %vm3098_vm0, %v3099_v6  ;;  %2867 = vmatprep.mubr.msk.f32.mxu1 %vm3098_vm0, %v3099_v6 }
  0xfd   :  { %v397_v28 = vmax.f32 %v158_v22, 0.0  ;;  %v806_v29 = vmax.f32 %v567_v23, 0.0 }
  0xfe   :  { %v162_v30 = vpop.f32.mrb[4].mxu0  ;;  %v571_v31 = vpop.f32.mrb[4].mxu1 }
  0xff   :  { %v3813_v32 = vmax.f32 %v397_v28, %v806_v29  ;;  %v163_v33 = vadd.f32 %v3775_v5, %v162_v30  ;;  %v572_v34 = vadd.f32 %v3775_v5, %v571_v31  ;;  %v2320_v35 = vpop.f32.mrb[5].mxu0  ;;  %v2499_v36 = vpop.f32.mrb[5].mxu1  ;;  %2689 = vmatmul.mubr.f32.gmra.mrb[110].mxu0 %v1928_v26  ;;  %2868 = vmatmul.mubr.f32.gmra.mrb[110].mxu1 %v1977_v27  ;;  %v1934_v31 = vld [vmem:[%s4728_s0 + $0x370] sm:$0xff] }
 0x100   :  { %2691 = vmatprep.mubr.msk.f32.mxu0 %vm3098_vm0, %v3099_v6  ;;  %2870 = vmatprep.mubr.msk.f32.mxu1 %vm3098_vm0, %v3099_v6 }
 0x101   :  { %v398_v39 = vmax.f32 %v163_v33, 0.0  ;;  %v807_v40 = vmax.f32 %v572_v34, 0.0  ;;  %v1983_v33 = vld [vmem:[%s4728_s0 + $0x4f8] sm:$0xff] }
 0x102   :  { %v167_v41 = vpop.f32.mrb[6].mxu0  ;;  %v576_v42 = vpop.f32.mrb[6].mxu1 }
 0x103   :  { %v3827_v43 = vmax.f32 %v398_v39, %v807_v40  ;;  %v168_v44 = vadd.f32 %v3775_v5, %v167_v41  ;;  %v577_v45 = vadd.f32 %v3775_v5, %v576_v42  ;;  %v2323_v46 = vpop.f32.mrb[7].mxu0  ;;  %v2502_v47 = vpop.f32.mrb[7].mxu1  ;;  %2692 = vmatmul.mubr.f32.gmra.mrb[112].mxu0 %v1929_v37  ;;  %2871 = vmatmul.mubr.f32.gmra.mrb[112].mxu1 %v1978_v38 }
 0x104   :  { %2694 = vmatprep.mubr.msk.f32.mxu0 %vm3098_vm0, %v3099_v6  ;;  %2873 = vmatprep.mubr.msk.f32.mxu1 %vm3098_vm0, %v3099_v6 }
 0x105   :  { %v399_v50 = vmax.f32 %v168_v44, 0.0  ;;  %v808_v51 = vmax.f32 %v577_v45, 0.0  ;;  %v1935_v44 = vld [vmem:[%s4728_s0 + $0x378] sm:$0xff]  ;;  %v1984_v45 = vld [vmem:[%s4728_s0 + $0x500] sm:$0xff] }
 0x106   :  { %v172_v52 = vpop.f32.mrb[8].mxu0  ;;  %v581_v53 = vpop.f32.mrb[8].mxu1 }
 0x107   :  { %v3841_v54 = vmax.f32 %v399_v50, %v808_v51  ;;  %v173_v55 = vadd.f32 %v3775_v5, %v172_v52  ;;  %v582_v56 = vadd.f32 %v3775_v5, %v581_v53  ;;  %v2326_v57 = vpop.f32.mrb[9].mxu0  ;;  %v2505_v58 = vpop.f32.mrb[9].mxu1  ;;  %2695 = vmatmul.mubr.f32.gmra.mrb[114].mxu0 %v1930_v48  ;;  %2874 = vmatmul.mubr.f32.gmra.mrb[114].mxu1 %v1979_v49 }
 0x108   :  { %2697 = vmatprep.mubr.msk.f32.mxu0 %vm3098_vm0, %v3099_v6  ;;  %2876 = vmatprep.mubr.msk.f32.mxu1 %vm3098_vm0, %v3099_v6  ;;  %v1985_v57 = vld [vmem:[%s4728_s0 + $0x508] sm:$0xff] }
 0x109   :  { %v400_v61 = vmax.f32 %v173_v55, 0.0  ;;  %v809_v62 = vmax.f32 %v582_v56, 0.0  ;;  %v1936_v56 = vld [vmem:[%s4728_s0 + $0x380] sm:$0xff] }
 0x10a   :  { %v177_v63 = vpop.f32.mrb[10].mxu0  ;;  %v586_v0 = vpop.f32.mrb[10].mxu1 }
 0x10b   :  { %v3855_v1 = vmax.f32 %v400_v61, %v809_v62  ;;  %v178_v2 = vadd.f32 %v3775_v5, %v177_v63  ;;  %v587_v3 = vadd.f32 %v3775_v5, %v586_v0  ;;  %v2329_v4 = vpop.f32.mrb[11].mxu0  ;;  %v2508_v7 = vpop.f32.mrb[11].mxu1  ;;  %2698 = vmatmul.mubr.f32.gmra.mrb[116].mxu0 %v1931_v59  ;;  %2877 = vmatmul.mubr.f32.gmra.mrb[116].mxu1 %v1980_v60 }
 0x10c   :  { %2700 = vmatprep.mubr.msk.f32.mxu0 %vm3098_vm0, %v3099_v6  ;;  %2879 = vmatprep.mubr.msk.f32.mxu1 %vm3098_vm0, %v3099_v6  ;;  %v1937_v4 = vld [vmem:[%s4728_s0 + $0x388] sm:$0xff]  ;;  %v1986_v7 = vld [vmem:[%s4728_s0 + $0x510] sm:$0xff] }
 0x10d   :  { %v401_v10 = vmax.f32 %v178_v2, 0.0  ;;  %v810_v11 = vmax.f32 %v587_v3, 0.0 }
 0x10e   :  { %v182_v12 = vpop.f32.mrb[12].mxu0  ;;  %v591_v13 = vpop.f32.mrb[12].mxu1 }
 0x10f   :  { %v3869_v14 = vmax.f32 %v401_v10, %v810_v11  ;;  %v183_v15 = vadd.f32 %v3775_v5, %v182_v12  ;;  %v592_v16 = vadd.f32 %v3775_v5, %v591_v13  ;;  %v2332_v17 = vpop.f32.mrb[13].mxu0  ;;  %v2511_v18 = vpop.f32.mrb[13].mxu1  ;;  %2701 = vmatmul.mubr.f32.gmra.mrb[118].mxu0 %v1932_v8  ;;  %2880 = vmatmul.mubr.f32.gmra.mrb[118].mxu1 %v1981_v9 }
 0x110   :  { %2703 = vmatprep.mubr.msk.f32.mxu0 %vm3098_vm0, %v3099_v6  ;;  %2882 = vmatprep.mubr.msk.f32.mxu1 %vm3098_vm0, %v3099_v6  ;;  %v1938_v18 = vld [vmem:[%s4728_s0 + $0x390] sm:$0xff] }
 0x111   :  { %v402_v22 = vmax.f32 %v183_v15, 0.0  ;;  %v811_v23 = vmax.f32 %v592_v16, 0.0 }
 0x112   :  { %v187_v24 = vpop.f32.mrb[14].mxu0  ;;  %v596_v25 = vpop.f32.mrb[14].mxu1 }
 0x113   :  { %v3883_v26 = vmax.f32 %v402_v22, %v811_v23  ;;  %v188_v27 = vadd.f32 %v3775_v5, %v187_v24  ;;  %v597_v28 = vadd.f32 %v3775_v5, %v596_v25  ;;  %v2335_v29 = vpop.f32.mrb[15].mxu0  ;;  %v2514_v30 = vpop.f32.mrb[15].mxu1  ;;  %2704 = vmatmul.mubr.f32.gmra.mrb[120].mxu0 %v1933_v19  ;;  %2883 = vmatmul.mubr.f32.gmra.mrb[120].mxu1 %v1982_v20  ;;  %v1987_v19 = vld [vmem:[%s4728_s0 + $0x518] sm:$0xff] }
 0x114   :  { %2706 = vmatprep.mubr.msk.f32.mxu0 %vm3098_vm0, %v3099_v6  ;;  %2885 = vmatprep.mubr.msk.f32.mxu1 %vm3098_vm0, %v3099_v6 }
 0x115   :  { %v403_v34 = vmax.f32 %v188_v27, 0.0  ;;  %v812_v35 = vmax.f32 %v597_v28, 0.0 }
 0x116   :  { %v192_v36 = vpop.f32.mrb[16].mxu0  ;;  %v601_v37 = vpop.f32.mrb[16].mxu1 }
 0x117   :  { %v3897_v38 = vmax.f32 %v403_v34, %v812_v35  ;;  %v193_v39 = vadd.f32 %v3775_v5, %v192_v36  ;;  %v602_v40 = vadd.f32 %v3775_v5, %v601_v37  ;;  %v2338_v41 = vpop.f32.mrb[17].mxu0  ;;  %v2517_v42 = vpop.f32.mrb[17].mxu1  ;;  %2707 = vmatmul.mubr.f32.gmra.mrb[122].mxu0 %v1934_v31  ;;  %2886 = vmatmul.mubr.f32.gmra.mrb[122].mxu1 %v1983_v33  ;;  %v1939_v31 = vld [vmem:[%s4728_s0 + $0x398] sm:$0xff]  ;;  %v1988_v33 = vld [vmem:[%s4728_s0 + $0x520] sm:$0xff] }
 0x118   :  { %2709 = vmatprep.mubr.msk.f32.mxu0 %vm3098_vm0, %v3099_v6  ;;  %2888 = vmatprep.mubr.msk.f32.mxu1 %vm3098_vm0, %v3099_v6 }
 0x119   :  { %v404_v46 = vmax.f32 %v193_v39, 0.0  ;;  %v813_v47 = vmax.f32 %v602_v40, 0.0 }
 0x11a   :  { %v197_v48 = vpop.f32.mrb[18].mxu0  ;;  %v606_v49 = vpop.f32.mrb[18].mxu1 }
 0x11b   :  { %v3911_v50 = vmax.f32 %v404_v46, %v813_v47  ;;  %v198_v51 = vadd.f32 %v3775_v5, %v197_v48  ;;  %v607_v52 = vadd.f32 %v3775_v5, %v606_v49  ;;  %v2341_v53 = vpop.f32.mrb[19].mxu0  ;;  %v2520_v55 = vpop.f32.mrb[19].mxu1  ;;  %2710 = vmatmul.mubr.f32.gmra.mrb[124].mxu0 %v1935_v44  ;;  %2889 = vmatmul.mubr.f32.gmra.mrb[124].mxu1 %v1984_v45  ;;  %v1940_v45 = vld [vmem:[%s4728_s0 + $0x3a0] sm:$0xff]  ;;  %v1989_v46 = vld [vmem:[%s4728_s0 + $0x528] sm:$0xff] }
 0x11c   :  { %2712 = vmatprep.mubr.msk.f32.mxu0 %vm3098_vm0, %v3099_v6  ;;  %2891 = vmatprep.mubr.msk.f32.mxu1 %vm3098_vm0, %v3099_v6 }
 0x11d   :  { %v405_v58 = vmax.f32 %v198_v51, 0.0  ;;  %v814_v59 = vmax.f32 %v607_v52, 0.0 }
 0x11e   :  { %v202_v60 = vpop.f32.mrb[20].mxu0  ;;  %v611_v61 = vpop.f32.mrb[20].mxu1 }
 0x11f   :  { %v3925_v62 = vmax.f32 %v405_v58, %v814_v59  ;;  %v203_v63 = vadd.f32 %v3775_v5, %v202_v60  ;;  %v612_v0 = vadd.f32 %v3775_v5, %v611_v61  ;;  %v2344_v2 = vpop.f32.mrb[21].mxu0  ;;  %v2523_v3 = vpop.f32.mrb[21].mxu1  ;;  %2713 = vmatmul.mubr.f32.gmra.mrb[126].mxu0 %v1936_v56  ;;  %2892 = vmatmul.mubr.f32.gmra.mrb[126].mxu1 %v1985_v57  ;;  %v1941_v58 = vld [vmem:[%s4728_s0 + $0x3a8] sm:$0xff]  ;;  %v1990_v59 = vld [vmem:[%s4728_s0 + $0x530] sm:$0xff] }
 0x120   :  { %2715 = vmatprep.mubr.msk.f32.mxu0 %vm3098_vm0, %v3099_v6  ;;  %2894 = vmatprep.mubr.msk.f32.mxu1 %vm3098_vm0, %v3099_v6 }
 0x121   :  { %v406_v8 = vmax.f32 %v203_v63, 0.0  ;;  %v815_v9 = vmax.f32 %v612_v0, 0.0 }
 0x122   :  { %v207_v10 = vpop.f32.mrb[22].mxu0  ;;  %v616_v11 = vpop.f32.mrb[22].mxu1 }
 0x123   :  { %v3939_v12 = vmax.f32 %v406_v8, %v815_v9  ;;  %v208_v13 = vadd.f32 %v3775_v5, %v207_v10  ;;  %v617_v15 = vadd.f32 %v3775_v5, %v616_v11  ;;  %v2347_v16 = vpop.f32.mrb[23].mxu0  ;;  %v2526_v17 = vpop.f32.mrb[23].mxu1  ;;  %2716 = vmatmul.mubr.f32.gmra.mrb[128].mxu0 %v1937_v4  ;;  %2895 = vmatmul.mubr.f32.gmra.mrb[128].mxu1 %v1986_v7  ;;  %v1942_v9 = vld [vmem:[%s4728_s0 + $0x3b0] sm:$0xff]  ;;  %v1991_v10 = vld [vmem:[%s4728_s0 + $0x538] sm:$0xff] }
 0x124   :  { %2718 = vmatprep.mubr.msk.f32.mxu0 %vm3098_vm0, %v3099_v6  ;;  %2897 = vmatprep.mubr.msk.f32.mxu1 %vm3098_vm0, %v3099_v6 }
 0x125   :  { %v407_v20 = vmax.f32 %v208_v13, 0.0  ;;  %v816_v22 = vmax.f32 %v617_v15, 0.0 }
 0x126   :  { %v212_v23 = vpop.f32.mrb[24].mxu0  ;;  %v621_v24 = vpop.f32.mrb[24].mxu1 }
 0x127   :  { %v3953_v25 = vmax.f32 %v407_v20, %v816_v22  ;;  %v213_v27 = vadd.f32 %v3775_v5, %v212_v23  ;;  %v622_v28 = vadd.f32 %v3775_v5, %v621_v24  ;;  %v2350_v29 = vpop.f32.mrb[25].mxu0  ;;  %v2529_v30 = vpop.f32.mrb[25].mxu1  ;;  %2719 = vmatmul.mubr.f32.gmra.mrb[130].mxu0 %v1938_v18  ;;  %2898 = vmatmul.mubr.f32.gmra.mrb[130].mxu1 %v1987_v19  ;;  %v1943_v23 = vld [vmem:[%s4728_s0 + $0x3b8] sm:$0xff]  ;;  %v1992_v24 = vld [vmem:[%s4728_s0 + $0x540] sm:$0xff] }
 0x128   :  { %2721 = vmatprep.mubr.msk.f32.mxu0 %vm3098_vm0, %v3099_v6  ;;  %2900 = vmatprep.mubr.msk.f32.mxu1 %vm3098_vm0, %v3099_v6 }
 0x129   :  { %v408_v34 = vmax.f32 %v213_v27, 0.0  ;;  %v817_v35 = vmax.f32 %v622_v28, 0.0 }
 0x12a   :  { %v217_v36 = vpop.f32.mrb[26].mxu0  ;;  %v626_v37 = vpop.f32.mrb[26].mxu1 }
 0x12b   :  { %v3967_v39 = vmax.f32 %v408_v34, %v817_v35  ;;  %v218_v40 = vadd.f32 %v3775_v5, %v217_v36  ;;  %v627_v41 = vadd.f32 %v3775_v5, %v626_v37  ;;  %v2353_v42 = vpop.f32.mrb[27].mxu0  ;;  %v2532_v44 = vpop.f32.mrb[27].mxu1  ;;  %2722 = vmatmul.mubr.f32.gmra.mrb[132].mxu0 %v1939_v31  ;;  %2901 = vmatmul.mubr.f32.gmra.mrb[132].mxu1 %v1988_v33  ;;  %v1944_v37 = vld [vmem:[%s4728_s0 + $0x3c0] sm:$0xff] }
 0x12c   :  { %2724 = vmatprep.mubr.msk.f32.mxu0 %vm3098_vm0, %v3099_v6  ;;  %2903 = vmatprep.mubr.msk.f32.mxu1 %vm3098_vm0, %v3099_v6 }
 0x12d   :  { %v409_v47 = vmax.f32 %v218_v40, 0.0  ;;  %v818_v48 = vmax.f32 %v627_v41, 0.0  ;;  %v1993_v40 = vld [vmem:[%s4728_s0 + $0x548] sm:$0xff] }
 0x12e   :  { %v222_v49 = vpop.f32.mrb[28].mxu0  ;;  %v631_v51 = vpop.f32.mrb[28].mxu1 }
 0x12f   :  { %v3981_v52 = vmax.f32 %v409_v47, %v818_v48  ;;  %v223_v53 = vadd.f32 %v3775_v5, %v222_v49  ;;  %v632_v55 = vadd.f32 %v3775_v5, %v631_v51  ;;  %v2356_v56 = vpop.f32.mrb[29].mxu0  ;;  %v2535_v57 = vpop.f32.mrb[29].mxu1  ;;  %2725 = vmatmul.mubr.f32.gmra.mrb[134].mxu0 %v1940_v45  ;;  %2904 = vmatmul.mubr.f32.gmra.mrb[134].mxu1 %v1989_v46 }
 0x130   :  { %2727 = vmatprep.mubr.msk.f32.mxu0 %vm3098_vm0, %v3099_v6  ;;  %2906 = vmatprep.mubr.msk.f32.mxu1 %vm3098_vm0, %v3099_v6 }
 0x131   :  { %v410_v60 = vmax.f32 %v223_v53, 0.0  ;;  %v819_v61 = vmax.f32 %v632_v55, 0.0  ;;  %v1945_v53 = vld [vmem:[%s4728_s0 + $0x3c8] sm:$0xff]  ;;  %v1994_v55 = vld [vmem:[%s4728_s0 + $0x550] sm:$0xff] }
 0x132   :  { %v227_v63 = vpop.f32.mrb[30].mxu0  ;;  %v636_v0 = vpop.f32.mrb[30].mxu1 }
 0x133   :  { %v3995_v2 = vmax.f32 %v410_v60, %v819_v61  ;;  %v228_v3 = vadd.f32 %v3775_v5, %v227_v63  ;;  %v637_v4 = vadd.f32 %v3775_v5, %v636_v0  ;;  %v2359_v7 = vpop.f32.mrb[31].mxu0  ;;  %v2538_v8 = vpop.f32.mrb[31].mxu1  ;;  %2728 = vmatmul.mubr.f32.gmra.mrb[136].mxu0 %v1941_v58  ;;  %2907 = vmatmul.mubr.f32.gmra.mrb[136].mxu1 %v1990_v59 }
 0x134   :  { %2730 = vmatprep.mubr.msk.f32.mxu0 %vm3098_vm0, %v3099_v6  ;;  %2909 = vmatprep.mubr.msk.f32.mxu1 %vm3098_vm0, %v3099_v6  ;;  %v1995_v7 = vld [vmem:[%s4728_s0 + $0x558] sm:$0xff] }
 0x135   :  { %v411_v11 = vmax.f32 %v228_v3, 0.0  ;;  %v820_v13 = vmax.f32 %v637_v4, 0.0  ;;  %v1946_v4 = vld [vmem:[%s4728_s0 + $0x3d0] sm:$0xff] }
 0x136   :  { %v232_v15 = vpop.f32.mrb[32].mxu0  ;;  %v641_v16 = vpop.f32.mrb[32].mxu1 }
 0x137   :  { %v4009_v17 = vmax.f32 %v411_v11, %v820_v13  ;;  %v233_v18 = vadd.f32 %v3775_v5, %v232_v15  ;;  %v642_v19 = vadd.f32 %v3775_v5, %v641_v16  ;;  %v2362_v20 = vpop.f32.mrb[33].mxu0  ;;  %v2541_v22 = vpop.f32.mrb[33].mxu1  ;;  %2731 = vmatmul.mubr.f32.gmra.mrb[138].mxu0 %v1942_v9  ;;  %2910 = vmatmul.mubr.f32.gmra.mrb[138].mxu1 %v1991_v10 }
 0x138   :  { %2733 = vmatprep.mubr.msk.f32.mxu0 %vm3098_vm0, %v3099_v6  ;;  %2912 = vmatprep.mubr.msk.f32.mxu1 %vm3098_vm0, %v3099_v6  ;;  %v1947_v20 = vld [vmem:[%s4728_s0 + $0x3d8] sm:$0xff]  ;;  %v1996_v22 = vld [vmem:[%s4728_s0 + $0x560] sm:$0xff] }
 0x139   :  { %v412_v27 = vmax.f32 %v233_v18, 0.0  ;;  %v821_v28 = vmax.f32 %v642_v19, 0.0 }
 0x13a   :  { %v237_v29 = vpop.f32.mrb[34].mxu0  ;;  %v646_v30 = vpop.f32.mrb[34].mxu1 }
 0x13b   :  { %v4023_v31 = vmax.f32 %v412_v27, %v821_v28  ;;  %v238_v33 = vadd.f32 %v3775_v5, %v237_v29  ;;  %v647_v34 = vadd.f32 %v3775_v5, %v646_v30  ;;  %v2365_v35 = vpop.f32.mrb[35].mxu0  ;;  %v2544_v36 = vpop.f32.mrb[35].mxu1  ;;  %2734 = vmatmul.mubr.f32.gmra.mrb[140].mxu0 %v1943_v23  ;;  %2913 = vmatmul.mubr.f32.gmra.mrb[140].mxu1 %v1992_v24 }
 0x13c   :  { %2736 = vmatprep.mubr.msk.f32.mxu0 %vm3098_vm0, %v3099_v6  ;;  %2915 = vmatprep.mubr.msk.f32.mxu1 %vm3098_vm0, %v3099_v6  ;;  %v1948_v36 = vld [vmem:[%s4728_s0 + $0x3e0] sm:$0xff] }
 0x13d   :  { %v413_v41 = vmax.f32 %v238_v33, 0.0  ;;  %v822_v42 = vmax.f32 %v647_v34, 0.0 }
 0x13e   :  { %v242_v44 = vpop.f32.mrb[36].mxu0  ;;  %v651_v45 = vpop.f32.mrb[36].mxu1 }
 0x13f   :  { %v4037_v46 = vmax.f32 %v413_v41, %v822_v42  ;;  %v243_v47 = vadd.f32 %v3775_v5, %v242_v44  ;;  %v652_v48 = vadd.f32 %v3775_v5, %v651_v45  ;;  %v2368_v49 = vpop.f32.mrb[37].mxu0  ;;  %v2547_v51 = vpop.f32.mrb[37].mxu1  ;;  %2737 = vmatmul.mubr.f32.gmra.mrb[142].mxu0 %v1944_v37  ;;  %2916 = vmatmul.mubr.f32.gmra.mrb[142].mxu1 %v1993_v40  ;;  %v1997_v37 = vld [vmem:[%s4728_s0 + $0x568] sm:$0xff] }
 0x140   :  { %2739 = vmatprep.mubr.msk.f32.mxu0 %vm3098_vm0, %v3099_v6  ;;  %2918 = vmatprep.mubr.msk.f32.mxu1 %vm3098_vm0, %v3099_v6 }
 0x141   :  { %v414_v56 = vmax.f32 %v243_v47, 0.0  ;;  %v823_v57 = vmax.f32 %v652_v48, 0.0 }
 0x142   :  { %v247_v58 = vpop.f32.mrb[38].mxu0  ;;  %v656_v59 = vpop.f32.mrb[38].mxu1 }
 0x143   :  { %v4051_v60 = vmax.f32 %v414_v56, %v823_v57  ;;  %v248_v61 = vadd.f32 %v3775_v5, %v247_v58  ;;  %v657_v63 = vadd.f32 %v3775_v5, %v656_v59  ;;  %v2371_v0 = vpop.f32.mrb[39].mxu0  ;;  %v2550_v3 = vpop.f32.mrb[39].mxu1  ;;  %2740 = vmatmul.mubr.f32.gmra.mrb[144].mxu0 %v1945_v53  ;;  %2919 = vmatmul.mubr.f32.gmra.mrb[144].mxu1 %v1994_v55  ;;  %v1949_v53 = vld [vmem:[%s4728_s0 + $0x3e8] sm:$0xff]  ;;  %v1998_v55 = vld [vmem:[%s4728_s0 + $0x570] sm:$0xff] }
 0x144   :  { %2742 = vmatprep.mubr.msk.f32.mxu0 %vm3098_vm0, %v3099_v6  ;;  %2921 = vmatprep.mubr.msk.f32.mxu1 %vm3098_vm0, %v3099_v6 }
 0x145   :  { %v415_v8 = vmax.f32 %v248_v61, 0.0  ;;  %v824_v9 = vmax.f32 %v657_v63, 0.0 }
 0x146   :  { %v252_v10 = vpop.f32.mrb[40].mxu0  ;;  %v661_v11 = vpop.f32.mrb[40].mxu1 }
 0x147   :  { %v4065_v13 = vmax.f32 %v415_v8, %v824_v9  ;;  %v253_v15 = vadd.f32 %v3775_v5, %v252_v10  ;;  %v662_v16 = vadd.f32 %v3775_v5, %v661_v11  ;;  %v2374_v18 = vpop.f32.mrb[41].mxu0  ;;  %v2553_v19 = vpop.f32.mrb[41].mxu1  ;;  %2743 = vmatmul.mubr.f32.gmra.mrb[146].mxu0 %v1946_v4  ;;  %2922 = vmatmul.mubr.f32.gmra.mrb[146].mxu1 %v1995_v7  ;;  %v1950_v7 = vld [vmem:[%s4728_s0 + $0x3f0] sm:$0xff]  ;;  %v1999_v8 = vld [vmem:[%s4728_s0 + $0x578] sm:$0xff] }
 0x148   :  { %2745 = vmatprep.mubr.msk.f32.mxu0 %vm3098_vm0, %v3099_v6  ;;  %2924 = vmatprep.mubr.msk.f32.mxu1 %vm3098_vm0, %v3099_v6 }
 0x149   :  { %v416_v23 = vmax.f32 %v253_v15, 0.0  ;;  %v825_v24 = vmax.f32 %v662_v16, 0.0 }
 0x14a   :  { %v257_v27 = vpop.f32.mrb[42].mxu0  ;;  %v666_v28 = vpop.f32.mrb[42].mxu1 }
 0x14b   :  { %v4079_v29 = vmax.f32 %v416_v23, %v825_v24  ;;  %v258_v30 = vadd.f32 %v3775_v5, %v257_v27  ;;  %v667_v33 = vadd.f32 %v3775_v5, %v666_v28  ;;  %v2377_v34 = vpop.f32.mrb[43].mxu0  ;;  %v2556_v35 = vpop.f32.mrb[43].mxu1  ;;  %2746 = vmatmul.mubr.f32.gmra.mrb[148].mxu0 %v1947_v20  ;;  %2925 = vmatmul.mubr.f32.gmra.mrb[148].mxu1 %v1996_v22  ;;  %v1951_v23 = vld [vmem:[%s4728_s0 + $0x3f8] sm:$0xff]  ;;  %v2000_v24 = vld [vmem:[%s4728_s0 + $0x580] sm:$0xff] }
 0x14c   :  { %2748 = vmatprep.mubr.msk.f32.mxu0 %vm3098_vm0, %v3099_v6  ;;  %2927 = vmatprep.mubr.msk.f32.mxu1 %vm3098_vm0, %v3099_v6 }
 0x14d   :  { %v417_v40 = vmax.f32 %v258_v30, 0.0  ;;  %v826_v41 = vmax.f32 %v667_v33, 0.0 }
 0x14e   :  { %v262_v42 = vpop.f32.mrb[44].mxu0  ;;  %v671_v44 = vpop.f32.mrb[44].mxu1 }
 0x14f   :  { %v4093_v45 = vmax.f32 %v417_v40, %v826_v41  ;;  %v263_v47 = vadd.f32 %v3775_v5, %v262_v42  ;;  %v672_v48 = vadd.f32 %v3775_v5, %v671_v44  ;;  %v2380_v49 = vpop.f32.mrb[45].mxu0  ;;  %v2559_v51 = vpop.f32.mrb[45].mxu1  ;;  %2749 = vmatmul.mubr.f32.gmra.mrb[150].mxu0 %v1948_v36  ;;  %2928 = vmatmul.mubr.f32.gmra.mrb[150].mxu1 %v1997_v37  ;;  %v1952_v41 = vld [vmem:[%s4728_s0 + $0x400] sm:$0xff]  ;;  %v2001_v42 = vld [vmem:[%s4728_s0 + $0x588] sm:$0xff] }
 0x150   :  { %2751 = vmatprep.mubr.msk.f32.mxu0 %vm3098_vm0, %v3099_v6  ;;  %2930 = vmatprep.mubr.msk.f32.mxu1 %vm3098_vm0, %v3099_v6 }
 0x151   :  { %v418_v56 = vmax.f32 %v263_v47, 0.0  ;;  %v827_v57 = vmax.f32 %v672_v48, 0.0 }
 0x152   :  { %v267_v58 = vpop.f32.mrb[46].mxu0  ;;  %v676_v59 = vpop.f32.mrb[46].mxu1 }
 0x153   :  { %v4107_v61 = vmax.f32 %v418_v56, %v827_v57  ;;  %v268_v63 = vadd.f32 %v3775_v5, %v267_v58  ;;  %v677_v0 = vadd.f32 %v3775_v5, %v676_v59  ;;  %v2383_v3 = vpop.f32.mrb[47].mxu0  ;;  %v2562_v4 = vpop.f32.mrb[47].mxu1  ;;  %2752 = vmatmul.mubr.f32.gmra.mrb[152].mxu0 %v1949_v53  ;;  %2931 = vmatmul.mubr.f32.gmra.mrb[152].mxu1 %v1998_v55  ;;  %v1953_v58 = vld [vmem:[%s4728_s0 + $0x408] sm:$0xff]  ;;  %v2002_v59 = vld [vmem:[%s4728_s0 + $0x590] sm:$0xff] }
 0x154   :  { %2754 = vmatprep.mubr.msk.f32.mxu0 %vm3098_vm0, %v3099_v6  ;;  %2933 = vmatprep.mubr.msk.f32.mxu1 %vm3098_vm0, %v3099_v6 }
 0x155   :  { %v419_v9 = vmax.f32 %v268_v63, 0.0  ;;  %v828_v10 = vmax.f32 %v677_v0, 0.0 }
 0x156   :  { %v272_v11 = vpop.f32.mrb[48].mxu0  ;;  %v681_v15 = vpop.f32.mrb[48].mxu1 }
 0x157   :  { %v4121_v16 = vmax.f32 %v419_v9, %v828_v10  ;;  %v273_v18 = vadd.f32 %v3775_v5, %v272_v11  ;;  %v682_v19 = vadd.f32 %v3775_v5, %v681_v15  ;;  %v2386_v20 = vpop.f32.mrb[49].mxu0  ;;  %v2565_v22 = vpop.f32.mrb[49].mxu1  ;;  %2755 = vmatmul.mubr.f32.gmra.mrb[154].mxu0 %v1950_v7  ;;  %2934 = vmatmul.mubr.f32.gmra.mrb[154].mxu1 %v1999_v8  ;;  %v1954_v15 = vld [vmem:[%s4728_s0 + $0x410] sm:$0xff] }
 0x158   :  { %2757 = vmatprep.mubr.msk.f32.mxu0 %vm3098_vm0, %v3099_v6  ;;  %2936 = vmatprep.mubr.msk.f32.mxu1 %vm3098_vm0, %v3099_v6 }
 0x159   :  { %v420_v27 = vmax.f32 %v273_v18, 0.0  ;;  %v829_v28 = vmax.f32 %v682_v19, 0.0  ;;  %v2003_v18 = vld [vmem:[%s4728_s0 + $0x598] sm:$0xff] }
 0x15a   :  { %v277_v30 = vpop.f32.mrb[50].mxu0  ;;  %v686_v33 = vpop.f32.mrb[50].mxu1 }
 0x15b   :  { %v4135_v34 = vmax.f32 %v420_v27, %v829_v28  ;;  %v278_v35 = vadd.f32 %v3775_v5, %v277_v30  ;;  %v687_v36 = vadd.f32 %v3775_v5, %v686_v33  ;;  %v2389_v37 = vpop.f32.mrb[51].mxu0  ;;  %v2568_v40 = vpop.f32.mrb[51].mxu1  ;;  %2758 = vmatmul.mubr.f32.gmra.mrb[156].mxu0 %v1951_v23  ;;  %2937 = vmatmul.mubr.f32.gmra.mrb[156].mxu1 %v2000_v24 }
 0x15c   :  { %2760 = vmatprep.mubr.msk.f32.mxu0 %vm3098_vm0, %v3099_v6  ;;  %2939 = vmatprep.mubr.msk.f32.mxu1 %vm3098_vm0, %v3099_v6 }
 0x15d   :  { %v421_v44 = vmax.f32 %v278_v35, 0.0  ;;  %v830_v47 = vmax.f32 %v687_v36, 0.0  ;;  %v1955_v35 = vld [vmem:[%s4728_s0 + $0x418] sm:$0xff]  ;;  %v2004_v36 = vld [vmem:[%s4728_s0 + $0x5a0] sm:$0xff] }
 0x15e   :  { %v282_v48 = vpop.f32.mrb[52].mxu0  ;;  %v691_v49 = vpop.f32.mrb[52].mxu1 }
 0x15f   :  { %v4149_v51 = vmax.f32 %v421_v44, %v830_v47  ;;  %v283_v53 = vadd.f32 %v3775_v5, %v282_v48  ;;  %v692_v55 = vadd.f32 %v3775_v5, %v691_v49  ;;  %v2392_v56 = vpop.f32.mrb[53].mxu0  ;;  %v2571_v57 = vpop.f32.mrb[53].mxu1  ;;  %2761 = vmatmul.mubr.f32.gmra.mrb[158].mxu0 %v1952_v41  ;;  %2940 = vmatmul.mubr.f32.gmra.mrb[158].mxu1 %v2001_v42 }
 0x160   :  { %2763 = vmatprep.mubr.msk.f32.mxu0 %vm3098_vm0, %v3099_v6  ;;  %2942 = vmatprep.mubr.msk.f32.mxu1 %vm3098_vm0, %v3099_v6  ;;  %v2005_v56 = vld [vmem:[%s4728_s0 + $0x5a8] sm:$0xff] }
 0x161   :  { %v422_v63 = vmax.f32 %v283_v53, 0.0  ;;  %v831_v0 = vmax.f32 %v692_v55, 0.0  ;;  %v1956_v55 = vld [vmem:[%s4728_s0 + $0x420] sm:$0xff] }
 0x162   :  { %v287_v3 = vpop.f32.mrb[54].mxu0  ;;  %v696_v4 = vpop.f32.mrb[54].mxu1 }
 0x163   :  { %v4163_v7 = vmax.f32 %v422_v63, %v831_v0  ;;  %v288_v8 = vadd.f32 %v3775_v5, %v287_v3  ;;  %v697_v9 = vadd.f32 %v3775_v5, %v696_v4  ;;  %v2395_v10 = vpop.f32.mrb[55].mxu0  ;;  %v2574_v11 = vpop.f32.mrb[55].mxu1  ;;  %2764 = vmatmul.mubr.f32.gmra.mrb[160].mxu0 %v1953_v58  ;;  %2943 = vmatmul.mubr.f32.gmra.mrb[160].mxu1 %v2002_v59 }
 0x164   :  { %2766 = vmatprep.mubr.msk.f32.mxu0 %vm3098_vm0, %v3099_v6  ;;  %2945 = vmatprep.mubr.msk.f32.mxu1 %vm3098_vm0, %v3099_v6  ;;  %v1957_v10 = vld [vmem:[%s4728_s0 + $0x428] sm:$0xff]  ;;  %v2006_v11 = vld [vmem:[%s4728_s0 + $0x5b0] sm:$0xff] }
 0x165   :  { %v423_v19 = vmax.f32 %v288_v8, 0.0  ;;  %v832_v20 = vmax.f32 %v697_v9, 0.0 }
 0x166   :  { %v292_v22 = vpop.f32.mrb[56].mxu0  ;;  %v701_v23 = vpop.f32.mrb[56].mxu1 }
 0x167   :  { %v4177_v24 = vmax.f32 %v423_v19, %v832_v20  ;;  %v293_v27 = vadd.f32 %v3775_v5, %v292_v22  ;;  %v702_v28 = vadd.f32 %v3775_v5, %v701_v23  ;;  %v2398_v30 = vpop.f32.mrb[57].mxu0  ;;  %v2577_v33 = vpop.f32.mrb[57].mxu1  ;;  %2767 = vmatmul.mubr.f32.gmra.mrb[162].mxu0 %v1954_v15  ;;  %2946 = vmatmul.mubr.f32.gmra.mrb[162].mxu1 %v2003_v18 }
 0x168   :  { %2769 = vmatprep.mubr.msk.f32.mxu0 %vm3098_vm0, %v3099_v6  ;;  %2948 = vmatprep.mubr.msk.f32.mxu1 %vm3098_vm0, %v3099_v6  ;;  %v1958_v33 = vld [vmem:[%s4728_s0 + $0x430] sm:$0xff] }
 0x169   :  { %v424_v37 = vmax.f32 %v293_v27, 0.0  ;;  %v833_v40 = vmax.f32 %v702_v28, 0.0 }
 0x16a   :  { %v297_v41 = vpop.f32.mrb[58].mxu0  ;;  %v706_v42 = vpop.f32.mrb[58].mxu1 }
 0x16b   :  { %v4191_v44 = vmax.f32 %v424_v37, %v833_v40  ;;  %v298_v47 = vadd.f32 %v3775_v5, %v297_v41  ;;  %v707_v48 = vadd.f32 %v3775_v5, %v706_v42  ;;  %v2401_v49 = vpop.f32.mrb[59].mxu0  ;;  %v2580_v53 = vpop.f32.mrb[59].mxu1  ;;  %2770 = vmatmul.mubr.f32.gmra.mrb[164].mxu0 %v1955_v35  ;;  %2949 = vmatmul.mubr.f32.gmra.mrb[164].mxu1 %v2004_v36  ;;  %v2007_v35 = vld [vmem:[%s4728_s0 + $0x5b8] sm:$0xff] }
 0x16c   :  { %2772 = vmatprep.mubr.msk.f32.mxu0 %vm3098_vm0, %v3099_v6  ;;  %2951 = vmatprep.mubr.msk.f32.mxu1 %vm3098_vm0, %v3099_v6 }
 0x16d   :  { %v425_v57 = vmax.f32 %v298_v47, 0.0  ;;  %v834_v58 = vmax.f32 %v707_v48, 0.0 }
 0x16e   :  { %v302_v59 = vpop.f32.mrb[60].mxu0  ;;  %v711_v63 = vpop.f32.mrb[60].mxu1 }
 0x16f   :  { %v4205_v0 = vmax.f32 %v425_v57, %v834_v58  ;;  %v303_v3 = vadd.f32 %v3775_v5, %v302_v59  ;;  %v712_v4 = vadd.f32 %v3775_v5, %v711_v63  ;;  %v2404_v8 = vpop.f32.mrb[61].mxu0  ;;  %v2583_v9 = vpop.f32.mrb[61].mxu1  ;;  %2773 = vmatmul.mubr.f32.gmra.mrb[166].mxu0 %v1956_v55  ;;  %2952 = vmatmul.mubr.f32.gmra.mrb[166].mxu1 %v2005_v56  ;;  %v1959_v55 = vld [vmem:[%s4728_s0 + $0x438] sm:$0xff]  ;;  %v2008_v56 = vld [vmem:[%s4728_s0 + $0x5c0] sm:$0xff] }
 0x170   :  { %2775 = vmatprep.mubr.msk.f32.mxu0 %vm3098_vm0, %v3099_v6  ;;  %2954 = vmatprep.mubr.msk.f32.mxu1 %vm3098_vm0, %v3099_v6 }
 0x171   :  { %v426_v15 = vmax.f32 %v303_v3, 0.0  ;;  %v835_v18 = vmax.f32 %v712_v4, 0.0 }
 0x172   :  { %v307_v19 = vpop.f32.mrb[62].mxu0  ;;  %v716_v20 = vpop.f32.mrb[62].mxu1 }
 0x173   :  { %v4219_v22 = vmax.f32 %v426_v15, %v835_v18  ;;  %v308_v23 = vadd.f32 %v3775_v5, %v307_v19  ;;  %v717_v27 = vadd.f32 %v3775_v5, %v716_v20  ;;  %v2407_v28 = vpop.f32.mrb[63].mxu0  ;;  %v2586_v30 = vpop.f32.mrb[63].mxu1  ;;  %2776 = vmatmul.mubr.f32.gmra.mrb[168].mxu0 %v1957_v10  ;;  %2955 = vmatmul.mubr.f32.gmra.mrb[168].mxu1 %v2006_v11  ;;  %v1960_v11 = vld [vmem:[%s4728_s0 + $0x440] sm:$0xff]  ;;  %v2009_v15 = vld [vmem:[%s4728_s0 + $0x5c8] sm:$0xff] }
 0x174   :  { %2778 = vmatprep.mubr.msk.f32.mxu0 %vm3098_vm0, %v3099_v6  ;;  %2957 = vmatprep.mubr.msk.f32.mxu1 %vm3098_vm0, %v3099_v6 }
 0x175   :  { %v427_v36 = vmax.f32 %v308_v23, 0.0  ;;  %v836_v37 = vmax.f32 %v717_v27, 0.0  ;;  %v4266_v27 = vld [vmem:[%s4729_s2] ss:$0 sm:$0xff] }
 0x176   :  { %v312_v40 = vpop.f32.mrb[64].mxu0  ;;  %v721_v41 = vpop.f32.mrb[64].mxu1 }
 0x177   :  { %v4233_v42 = vmax.f32 %v427_v36, %v836_v37  ;;  %v313_v47 = vadd.f32 %v3775_v5, %v312_v40  ;;  %v722_v48 = vadd.f32 %v3775_v5, %v721_v41  ;;  %v2410_v49 = vpop.f32.mrb[65].mxu0  ;;  %v2589_v53 = vpop.f32.mrb[65].mxu1  ;;  %2779 = vmatmul.mubr.f32.gmra.mrb[170].mxu0 %v1958_v33  ;;  %2958 = vmatmul.mubr.f32.gmra.mrb[170].mxu1 %v2007_v35  ;;  %v1961_v36 = vld [vmem:[%s4728_s0 + $0x448] sm:$0xff]  ;;  %v2010_v37 = vld [vmem:[%s4728_s0 + $0x5d0] sm:$0xff] }
 0x178   :  { %2781 = vmatprep.mubr.msk.f32.mxu0 %vm3098_vm0, %v3099_v6  ;;  %2960 = vmatprep.mubr.msk.f32.mxu1 %vm3098_vm0, %v3099_v6 }
 0x179   :  { %v428_v57 = vmax.f32 %v313_v47, 0.0  ;;  %v837_v58 = vmax.f32 %v722_v48, 0.0 }
 0x17a   :  { %v317_v59 = vpop.f32.mrb[66].mxu0  ;;  %v726_v63 = vpop.f32.mrb[66].mxu1 }
 0x17b   :  { %v4247_v3 = vmax.f32 %v428_v57, %v837_v58  ;;  %v318_v4 = vadd.f32 %v3775_v5, %v317_v59  ;;  %v727_v8 = vadd.f32 %v3775_v5, %v726_v63  ;;  %v2413_v9 = vpop.f32.mrb[67].mxu0  ;;  %v2592_v10 = vpop.f32.mrb[67].mxu1  ;;  %2782 = vmatmul.mubr.f32.gmra.mrb[172].mxu0 %v1959_v55  ;;  %2961 = vmatmul.mubr.f32.gmra.mrb[172].mxu1 %v2008_v56  ;;  %v1962_v58 = vld [vmem:[%s4728_s0 + $0x450] sm:$0xff]  ;;  %v2011_v59 = vld [vmem:[%s4728_s0 + $0x5d8] sm:$0xff] }
 0x17c   :  { %2784 = vmatprep.mubr.msk.f32.mxu0 %vm3098_vm0, %v3099_v6  ;;  %2963 = vmatprep.mubr.msk.f32.mxu1 %vm3098_vm0, %v3099_v6 }
 0x17d   :  { %v429_v18 = vmax.f32 %v318_v4, 0.0  ;;  %v838_v5 = vmax.f32 %v727_v8, 0.0 }
 0x17e   :  { %v322_v19 = vpop.f32.mrb[68].mxu0  ;;  %v731_v20 = vpop.f32.mrb[68].mxu1 }
 0x17f   :  { %v4261_v23 = vmax.f32 %v429_v18, %v838_v5  ;;  %v323_v28 = vadd.f32 %v4266_v27, %v322_v19  ;;  %v732_v30 = vadd.f32 %v4266_v27, %v731_v20  ;;  %v2416_v33 = vpop.f32.mrb[69].mxu0  ;;  %v2595_v35 = vpop.f32.mrb[69].mxu1  ;;  %2785 = vmatmul.mubr.f32.gmra.mrb[174].mxu0 %v1960_v11  ;;  %2964 = vmatmul.mubr.f32.gmra.mrb[174].mxu1 %v2009_v15  ;;  %v1963_v19 = vld [vmem:[%s4728_s0 + $0x458] sm:$0xff]  ;;  %v2012_v20 = vld [vmem:[%s4728_s0 + $0x5e0] sm:$0xff] }
 0x180   :  { %2787 = vmatprep.mubr.msk.f32.mxu0 %vm3098_vm0, %v3099_v6  ;;  %2966 = vmatprep.mubr.msk.f32.mxu1 %vm3098_vm0, %v3099_v6 }
 0x181   :  { %v430_v40 = vmax.f32 %v323_v28, 0.0  ;;  %v839_v41 = vmax.f32 %v732_v30, 0.0 }
 0x182   :  { %v327_v47 = vpop.f32.mrb[70].mxu0  ;;  %v736_v48 = vpop.f32.mrb[70].mxu1 }
 0x183   :  { %v4280_v49 = vmax.f32 %v430_v40, %v839_v41  ;;  %v328_v53 = vadd.f32 %v4266_v27, %v327_v47  ;;  %v737_v55 = vadd.f32 %v4266_v27, %v736_v48  ;;  %v2419_v56 = vpop.f32.mrb[71].mxu0  ;;  %v2598_v57 = vpop.f32.mrb[71].mxu1  ;;  %2788 = vmatmul.mubr.f32.gmra.mrb[176].mxu0 %v1961_v36  ;;  %2967 = vmatmul.mubr.f32.gmra.mrb[176].mxu1 %v2010_v37  ;;  %v1964_v48 = vld [vmem:[%s4728_s0 + $0x460] sm:$0xff] }
 0x184   :  { %2790 = vmatprep.mubr.msk.f32.mxu0 %vm3098_vm0, %v3099_v6  ;;  %2969 = vmatprep.mubr.msk.f32.mxu1 %vm3098_vm0, %v3099_v6 }
 0x185   :  { %v431_v63 = vmax.f32 %v328_v53, 0.0  ;;  %v840_v4 = vmax.f32 %v737_v55, 0.0  ;;  %v2013_v53 = vld [vmem:[%s4728_s0 + $0x5e8] sm:$0xff] }
 0x186   :  { %v332_v8 = vpop.f32.mrb[72].mxu0  ;;  %v741_v9 = vpop.f32.mrb[72].mxu1 }
 0x187   :  { %v4294_v10 = vmax.f32 %v431_v63, %v840_v4  ;;  %v333_v11 = vadd.f32 %v4266_v27, %v332_v8  ;;  %v742_v15 = vadd.f32 %v4266_v27, %v741_v9  ;;  %v2422_v18 = vpop.f32.mrb[73].mxu0  ;;  %v2601_v5 = vpop.f32.mrb[73].mxu1  ;;  %2791 = vmatmul.mubr.f32.gmra.mrb[178].mxu0 %v1962_v58  ;;  %2970 = vmatmul.mubr.f32.gmra.mrb[178].mxu1 %v2011_v59 }
 0x188   :  { %2793 = vmatprep.mubr.msk.f32.mxu0 %vm3098_vm0, %v3099_v6  ;;  %2972 = vmatprep.mubr.msk.f32.mxu1 %vm3098_vm0, %v3099_v6 }
 0x189   :  { %v432_v28 = vmax.f32 %v333_v11, 0.0  ;;  %v841_v30 = vmax.f32 %v742_v15, 0.0  ;;  %v1965_v11 = vld [vmem:[%s4728_s0 + $0x468] sm:$0xff]  ;;  %v2014_v15 = vld [vmem:[%s4728_s0 + $0x5f0] sm:$0xff] }
 0x18a   :  { %v337_v33 = vpop.f32.mrb[74].mxu0  ;;  %v746_v35 = vpop.f32.mrb[74].mxu1 }
 0x18b   :  { %v4308_v36 = vmax.f32 %v432_v28, %v841_v30  ;;  %v338_v37 = vadd.f32 %v4266_v27, %v337_v33  ;;  %v747_v40 = vadd.f32 %v4266_v27, %v746_v35  ;;  %v2425_v41 = vpop.f32.mrb[75].mxu0  ;;  %v2604_v47 = vpop.f32.mrb[75].mxu1  ;;  %2794 = vmatmul.mubr.f32.gmra.mrb[180].mxu0 %v1963_v19  ;;  %2973 = vmatmul.mubr.f32.gmra.mrb[180].mxu1 %v2012_v20 }
 0x18c   :  { %2796 = vmatprep.mubr.msk.f32.mxu0 %vm3098_vm0, %v3099_v6  ;;  %2975 = vmatprep.mubr.msk.f32.mxu1 %vm3098_vm0, %v3099_v6  ;;  %v2015_v41 = vld [vmem:[%s4728_s0 + $0x5f8] sm:$0xff] }
 0x18d   :  { %v433_v55 = vmax.f32 %v338_v37, 0.0  ;;  %v842_v56 = vmax.f32 %v747_v40, 0.0  ;;  %v1966_v40 = vld [vmem:[%s4728_s0 + $0x470] sm:$0xff] }
 0x18e   :  { %v342_v57 = vpop.f32.mrb[76].mxu0  ;;  %v751_v58 = vpop.f32.mrb[76].mxu1 }
 0x18f   :  { %v4322_v59 = vmax.f32 %v433_v55, %v842_v56  ;;  %v343_v63 = vadd.f32 %v4266_v27, %v342_v57  ;;  %v752_v4 = vadd.f32 %v4266_v27, %v751_v58  ;;  %v2428_v8 = vpop.f32.mrb[77].mxu0  ;;  %v2607_v9 = vpop.f32.mrb[77].mxu1  ;;  %2797 = vmatmul.mubr.f32.gmra.mrb[182].mxu0 %v1964_v48  ;;  %2976 = vmatmul.mubr.f32.gmra.mrb[182].mxu1 %v2013_v53 }
 0x190   :  { %2799 = vmatprep.mubr.msk.f32.mxu0 %vm3098_vm0, %v3099_v6  ;;  %2978 = vmatprep.mubr.msk.f32.mxu1 %vm3098_vm0, %v3099_v6  ;;  %v1967_v8 = vld [vmem:[%s4728_s0 + $0x478] sm:$0xff]  ;;  %v2016_v9 = vld [vmem:[%s4728_s0 + $0x600] sm:$0xff] }
 0x191   :  { %v434_v18 = vmax.f32 %v343_v63, 0.0  ;;  %v843_v5 = vmax.f32 %v752_v4, 0.0 }
 0x192   :  { %v347_v19 = vpop.f32.mrb[78].mxu0  ;;  %v756_v20 = vpop.f32.mrb[78].mxu1 }
 0x193   :  { %v4336_v28 = vmax.f32 %v434_v18, %v843_v5  ;;  %v348_v30 = vadd.f32 %v4266_v27, %v347_v19  ;;  %v757_v33 = vadd.f32 %v4266_v27, %v756_v20  ;;  %v2431_v35 = vpop.f32.mrb[79].mxu0  ;;  %v2610_v37 = vpop.f32.mrb[79].mxu1  ;;  %2800 = vmatmul.mubr.f32.gmra.mrb[184].mxu0 %v1965_v11  ;;  %2979 = vmatmul.mubr.f32.gmra.mrb[184].mxu1 %v2014_v15 }
 0x194   :  { %2802 = vmatprep.mubr.msk.f32.mxu0 %vm3098_vm0, %v3099_v6  ;;  %2981 = vmatprep.mubr.msk.f32.mxu1 %vm3098_vm0, %v3099_v6  ;;  %v1968_v37 = vld [vmem:[%s4728_s0 + $0x480] sm:$0xff] }
 0x195   :  { %v435_v47 = vmax.f32 %v348_v30, 0.0  ;;  %v844_v48 = vmax.f32 %v757_v33, 0.0 }
 0x196   :  { %v352_v53 = vpop.f32.mrb[80].mxu0  ;;  %v761_v55 = vpop.f32.mrb[80].mxu1 }
 0x197   :  { %v4350_v56 = vmax.f32 %v435_v47, %v844_v48  ;;  %v353_v57 = vadd.f32 %v4266_v27, %v352_v53  ;;  %v762_v58 = vadd.f32 %v4266_v27, %v761_v55  ;;  %v2434_v63 = vpop.f32.mrb[81].mxu0  ;;  %v2613_v4 = vpop.f32.mrb[81].mxu1  ;;  %2803 = vmatmul.mubr.f32.gmra.mrb[186].mxu0 %v1966_v40  ;;  %2982 = vmatmul.mubr.f32.gmra.mrb[186].mxu1 %v2015_v41  ;;  %v2017_v40 = vld [vmem:[%s4728_s0 + $0x608] sm:$0xff] }
 0x198   :  { %2805 = vmatprep.mubr.msk.f32.mxu0 %vm3098_vm0, %v3099_v6  ;;  %2984 = vmatprep.mubr.msk.f32.mxu1 %vm3098_vm0, %v3099_v6 }
 0x199   :  { %v436_v11 = vmax.f32 %v353_v57, 0.0  ;;  %v845_v15 = vmax.f32 %v762_v58, 0.0 }
 0x19a   :  { %v357_v18 = vpop.f32.mrb[82].mxu0  ;;  %v766_v5 = vpop.f32.mrb[82].mxu1 }
 0x19b   :  { %v4364_v19 = vmax.f32 %v436_v11, %v845_v15  ;;  %v358_v20 = vadd.f32 %v4266_v27, %v357_v18  ;;  %v767_v30 = vadd.f32 %v4266_v27, %v766_v5  ;;  %v2437_v33 = vpop.f32.mrb[83].mxu0  ;;  %v2616_v35 = vpop.f32.mrb[83].mxu1  ;;  %2806 = vmatmul.mubr.f32.gmra.mrb[188].mxu0 %v1967_v8  ;;  %2985 = vmatmul.mubr.f32.gmra.mrb[188].mxu1 %v2016_v9  ;;  %v1969_v8 = vld [vmem:[%s4728_s0 + $0x488] sm:$0xff]  ;;  %v2018_v9 = vld [vmem:[%s4728_s0 + $0x610] sm:$0xff] }
 0x19c   :  { %2808 = vmatprep.mubr.msk.f32.mxu0 %vm3098_vm0, %v3099_v6  ;;  %2987 = vmatprep.mubr.msk.f32.mxu1 %vm3098_vm0, %v3099_v6 }
 0x19d   :  { %v437_v41 = vmax.f32 %v358_v20, 0.0  ;;  %v846_v47 = vmax.f32 %v767_v30, 0.0 }
 0x19e   :  { %v362_v48 = vpop.f32.mrb[84].mxu0  ;;  %v771_v53 = vpop.f32.mrb[84].mxu1 }
 0x19f   :  { %v4378_v55 = vmax.f32 %v437_v41, %v846_v47  ;;  %v363_v57 = vadd.f32 %v4266_v27, %v362_v48  ;;  %v772_v58 = vadd.f32 %v4266_v27, %v771_v53  ;;  %v2440_v63 = vpop.f32.mrb[85].mxu0  ;;  %v2619_v4 = vpop.f32.mrb[85].mxu1  ;;  %2809 = vmatmul.mubr.f32.gmra.mrb[190].mxu0 %v1968_v37  ;;  %2988 = vmatmul.mubr.f32.gmra.mrb[190].mxu1 %v2017_v40  ;;  %v1970_v40 = vld [vmem:[%s4728_s0 + $0x490] sm:$0xff]  ;;  %v2019_v41 = vld [vmem:[%s4728_s0 + $0x618] sm:$0xff] }
 0x1a0   :  { %2811 = vmatprep.mubr.msk.f32.mxu0 %vm3098_vm0, %v3099_v6  ;;  %2990 = vmatprep.mubr.msk.f32.mxu1 %vm3098_vm0, %v3099_v6 }
 0x1a1   :  { %v438_v11 = vmax.f32 %v363_v57, 0.0  ;;  %v847_v15 = vmax.f32 %v772_v58, 0.0 }
 0x1a2   :  { %v367_v18 = vpop.f32.mrb[86].mxu0  ;;  %v776_v5 = vpop.f32.mrb[86].mxu1 }
 0x1a3   :  { %v4392_v20 = vmax.f32 %v438_v11, %v847_v15  ;;  %v368_v30 = vadd.f32 %v4266_v27, %v367_v18  ;;  %v777_v33 = vadd.f32 %v4266_v27, %v776_v5  ;;  %v2443_v35 = vpop.f32.mrb[87].mxu0  ;;  %v2622_v37 = vpop.f32.mrb[87].mxu1  ;;  %2812 = vmatmul.mubr.f32.gmra.mrb[192].mxu0 %v1969_v8  ;;  %2991 = vmatmul.mubr.f32.gmra.mrb[192].mxu1 %v2018_v9 }
 0x1a4   :  { %2814 = vmatprep.mubr.msk.f32.mxu0 %vm3098_vm0, %v3099_v6  ;;  %2993 = vmatprep.mubr.msk.f32.mxu1 %vm3098_vm0, %v3099_v6 }
 0x1a5   :  { %v439_v47 = vmax.f32 %v368_v30, 0.0  ;;  %v848_v48 = vmax.f32 %v777_v33, 0.0 }
 0x1a6   :  { %v372_v53 = vpop.f32.mrb[88].mxu0  ;;  %v781_v57 = vpop.f32.mrb[88].mxu1 }
 0x1a7   :  { %v4406_v58 = vmax.f32 %v439_v47, %v848_v48  ;;  %v373_v63 = vadd.f32 %v4266_v27, %v372_v53  ;;  %v782_v4 = vadd.f32 %v4266_v27, %v781_v57  ;;  %v2446_v8 = vpop.f32.mrb[89].mxu0  ;;  %v2625_v6 = vpop.f32.mrb[89].mxu1  ;;  %2815 = vmatmul.mubr.f32.gmra.mrb[194].mxu0 %v1970_v40  ;;  %2994 = vmatmul.mubr.f32.gmra.mrb[194].mxu1 %v2019_v41 }
 0x1a9   :  { %v440_v9 = vmax.f32 %v373_v63, 0.0  ;;  %v849_v11 = vmax.f32 %v782_v4, 0.0 }
 0x1aa   :  { %v377_v15 = vpop.f32.mrb[90].mxu0  ;;  %v786_v18 = vpop.f32.mrb[90].mxu1 }
 0x1ab   :  { %v4410_v5 = vmax.f32 %v440_v9, %v849_v11  ;;  %v378_v30 = vadd.f32 %v4266_v27, %v377_v15  ;;  %v787_v33 = vadd.f32 %v4266_v27, %v786_v18  ;;  %v2449_v35 = vpop.f32.mrb[91].mxu0  ;;  %v2628_v37 = vpop.f32.mrb[91].mxu1 }
 0x1ad   :  { %4731 = vst [vmem:[#allocation2_spill] sm:$0xff] %v4410_v5  ;;  %v441_v47 = vmax.f32 %v378_v30, 0.0  ;;  %v850_v48 = vmax.f32 %v787_v33, 0.0 }
 0x1ae   :  { %v382_v53 = vpop.f32.mrb[92].mxu0  ;;  %v791_v57 = vpop.f32.mrb[92].mxu1 }
 0x1af   :  { %v4414_v8 = vmax.f32 %v441_v47, %v850_v48  ;;  %v383_v40 = vadd.f32 %v4266_v27, %v382_v53  ;;  %v792_v41 = vadd.f32 %v4266_v27, %v791_v57  ;;  %v2452_v63 = vpop.f32.mrb[93].mxu0  ;;  %v2631_v4 = vpop.f32.mrb[93].mxu1 }
 0x1b1   :  { %4732 = vst [vmem:[#allocation3_spill] sm:$0xff] %v4414_v8  ;;  %v442_v6 = vmax.f32 %v383_v40, 0.0  ;;  %v851_v9 = vmax.f32 %v792_v41, 0.0 }
 0x1b2   :  { %v387_v11 = vpop.f32.mrb[94].mxu0  ;;  %v796_v15 = vpop.f32.mrb[94].mxu1 }
 0x1b3   :  { %v4418_v5 = vmax.f32 %v442_v6, %v851_v9  ;;  %v388_v18 = vadd.f32 %v4266_v27, %v387_v11  ;;  %v797_v30 = vadd.f32 %v4266_v27, %v796_v15  ;;  %v2455_v33 = vpop.f32.mrb[95].mxu0  ;;  %v2634_v35 = vpop.f32.mrb[95].mxu1 }
 0x1b5   :  { %4733 = vst [vmem:[#allocation4_spill] sm:$0xff] %v4418_v5  ;;  %v443_v37 = vmax.f32 %v388_v18, 0.0  ;;  %v852_v47 = vmax.f32 %v797_v30, 0.0 }
 0x1b6   :  { %v392_v48 = vpop.f32.mrb[96].mxu0  ;;  %v801_v53 = vpop.f32.mrb[96].mxu1 }
 0x1b7   :  { %v4422_v8 = vmax.f32 %v443_v37, %v852_v47  ;;  %v393_v57 = vadd.f32 %v4266_v27, %v392_v48  ;;  %v802_v40 = vadd.f32 %v4266_v27, %v801_v53  ;;  %v2458_v41 = vpop.f32.mrb[97].mxu0  ;;  %v2637_v63 = vpop.f32.mrb[97].mxu1 }
 0x1b9   :  { %4734 = vst [vmem:[#allocation5_spill] sm:$0xff] %v4422_v8  ;;  %v444_v4 = vmax.f32 %v393_v57, 0.0  ;;  %v853_v6 = vmax.f32 %v802_v40, 0.0 }
 0x1ba   :  { %v1019_v9 = vpop.f32.mrb[98].mxu0  ;;  %v1428_v11 = vpop.f32.mrb[98].mxu1 }
 0x1bb   :  { %v4426_v5 = vmax.f32 %v444_v4, %v853_v6  ;;  %v1020_v15 = vadd.f32 %v4266_v27, %v1019_v9  ;;  %v1429_v18 = vadd.f32 %v4266_v27, %v1428_v11  ;;  %v2672_v30 = vpop.f32.mrb[99].mxu0  ;;  %v2851_v33 = vpop.f32.mrb[99].mxu1 }
 0x1bd   :  { %4735 = vst [vmem:[#allocation6_spill] sm:$0xff] %v4426_v5  ;;  %v1263_v35 = vmax.f32 %v1020_v15, 0.0  ;;  %v1672_v37 = vmax.f32 %v1429_v18, 0.0 }
 0x1be   :  { %v1024_v47 = vpop.f32.mrb[100].mxu0  ;;  %v1433_v48 = vpop.f32.mrb[100].mxu1 }
 0x1bf   :  { %v1721_v8 = vmax.f32 %v1263_v35, %v1672_v37  ;;  %v1025_v53 = vadd.f32 %v4266_v27, %v1024_v47  ;;  %v1434_v57 = vadd.f32 %v4266_v27, %v1433_v48  ;;  %v2675_v40 = vpop.f32.mrb[101].mxu0  ;;  %v2854_v41 = vpop.f32.mrb[101].mxu1 }
 0x1c1   :  { %v1770_v63 = vmax.f32 %v3799_v21, %v1721_v8  ;;  %v1264_v4 = vmax.f32 %v1025_v53, 0.0  ;;  %v1673_v6 = vmax.f32 %v1434_v57, 0.0 }
 0x1c2   :  { %v1029_v9 = vpop.f32.mrb[102].mxu0  ;;  %v1438_v5 = vpop.f32.mrb[102].mxu1 }
 0x1c3   :  { %1819 = vst [vmem:[%s4730_s3] sm:$0xff] %v1770_v63  ;;  %v1722_v11 = vmax.f32 %v1264_v4, %v1673_v6  ;;  %v1030_v15 = vadd.f32 %v4266_v27, %v1029_v9  ;;  %v1439_v18 = vadd.f32 %v4266_v27, %v1438_v5  ;;  %v2678_v30 = vpop.f32.mrb[103].mxu0  ;;  %v2857_v33 = vpop.f32.mrb[103].mxu1 }
 0x1c5   :  { %v1771_v35 = vmax.f32 %v3813_v32, %v1722_v11  ;;  %v1265_v37 = vmax.f32 %v1030_v15, 0.0  ;;  %v1674_v47 = vmax.f32 %v1439_v18, 0.0 }
 0x1c6   :  { %v1034_v21 = vpop.f32.mrb[104].mxu0  ;;  %v1443_v8 = vpop.f32.mrb[104].mxu1 }
 0x1c7   :  { %1820 = vst [vmem:[%s4730_s3 + $0x8] sm:$0xff] %v1771_v35  ;;  %v1723_v48 = vmax.f32 %v1265_v37, %v1674_v47  ;;  %v1035_v53 = vadd.f32 %v4266_v27, %v1034_v21  ;;  %v1444_v57 = vadd.f32 %v4266_v27, %v1443_v8  ;;  %v2681_v40 = vpop.f32.mrb[105].mxu0  ;;  %v2860_v41 = vpop.f32.mrb[105].mxu1 }
 0x1c9   :  { %v1772_v5 = vmax.f32 %v3827_v43, %v1723_v48  ;;  %v1266_v63 = vmax.f32 %v1035_v53, 0.0  ;;  %v1675_v4 = vmax.f32 %v1444_v57, 0.0 }
 0x1ca   :  { %v1039_v32 = vpop.f32.mrb[106].mxu0  ;;  %v1448_v6 = vpop.f32.mrb[106].mxu1 }
 0x1cb   :  { %1821 = vst [vmem:[%s4730_s3 + $0x10] sm:$0xff] %v1772_v5  ;;  %v1724_v9 = vmax.f32 %v1266_v63, %v1675_v4  ;;  %v1040_v11 = vadd.f32 %v4266_v27, %v1039_v32  ;;  %v1449_v15 = vadd.f32 %v4266_v27, %v1448_v6  ;;  %v2684_v18 = vpop.f32.mrb[107].mxu0  ;;  %v2863_v30 = vpop.f32.mrb[107].mxu1 }
 0x1cd   :  { %v1773_v33 = vmax.f32 %v3841_v54, %v1724_v9  ;;  %v1267_v35 = vmax.f32 %v1040_v11, 0.0  ;;  %v1676_v37 = vmax.f32 %v1449_v15, 0.0 }
 0x1ce   :  { %v1044_v43 = vpop.f32.mrb[108].mxu0  ;;  %v1453_v47 = vpop.f32.mrb[108].mxu1 }
 0x1cf   :  { %1822 = vst [vmem:[%s4730_s3 + $0x18] sm:$0xff] %v1773_v33  ;;  %v1725_v21 = vmax.f32 %v1267_v35, %v1676_v37  ;;  %v1045_v8 = vadd.f32 %v4266_v27, %v1044_v43  ;;  %v1454_v48 = vadd.f32 %v4266_v27, %v1453_v47  ;;  %v2687_v53 = vpop.f32.mrb[109].mxu0  ;;  %v2866_v57 = vpop.f32.mrb[109].mxu1 }
 0x1d1   :  { %v1774_v40 = vmax.f32 %v3855_v1, %v1725_v21  ;;  %v1268_v41 = vmax.f32 %v1045_v8, 0.0  ;;  %v1677_v5 = vmax.f32 %v1454_v48, 0.0 }
 0x1d2   :  { %v1049_v54 = vpop.f32.mrb[110].mxu0  ;;  %v1458_v63 = vpop.f32.mrb[110].mxu1 }
 0x1d3   :  { %1823 = vst [vmem:[%s4730_s3 + $0x20] sm:$0xff] %v1774_v40  ;;  %v1726_v4 = vmax.f32 %v1268_v41, %v1677_v5  ;;  %v1050_v32 = vadd.f32 %v4266_v27, %v1049_v54  ;;  %v1459_v6 = vadd.f32 %v4266_v27, %v1458_v63  ;;  %v2690_v9 = vpop.f32.mrb[111].mxu0  ;;  %v2869_v11 = vpop.f32.mrb[111].mxu1 }
 0x1d5   :  { %v1775_v15 = vmax.f32 %v3869_v14, %v1726_v4  ;;  %v1269_v18 = vmax.f32 %v1050_v32, 0.0  ;;  %v1678_v30 = vmax.f32 %v1459_v6, 0.0 }
 0x1d6   :  { %v1054_v1 = vpop.f32.mrb[112].mxu0  ;;  %v1463_v33 = vpop.f32.mrb[112].mxu1 }
 0x1d7   :  { %1824 = vst [vmem:[%s4730_s3 + $0x28] sm:$0xff] %v1775_v15  ;;  %v1727_v35 = vmax.f32 %v1269_v18, %v1678_v30  ;;  %v1055_v37 = vadd.f32 %v4266_v27, %v1054_v1  ;;  %v1464_v43 = vadd.f32 %v4266_v27, %v1463_v33  ;;  %v2693_v47 = vpop.f32.mrb[113].mxu0  ;;  %v2872_v21 = vpop.f32.mrb[113].mxu1 }
 0x1d9   :  { %v1776_v8 = vmax.f32 %v3883_v26, %v1727_v35  ;;  %v1270_v48 = vmax.f32 %v1055_v37, 0.0  ;;  %v1679_v53 = vmax.f32 %v1464_v43, 0.0 }
 0x1da   :  { %v1059_v14 = vpop.f32.mrb[114].mxu0  ;;  %v1468_v57 = vpop.f32.mrb[114].mxu1 }
 0x1db   :  { %1825 = vst [vmem:[%s4730_s3 + $0x30] sm:$0xff] %v1776_v8  ;;  %v1728_v40 = vmax.f32 %v1270_v48, %v1679_v53  ;;  %v1060_v41 = vadd.f32 %v4266_v27, %v1059_v14  ;;  %v1469_v5 = vadd.f32 %v4266_v27, %v1468_v57  ;;  %v2696_v54 = vpop.f32.mrb[115].mxu0  ;;  %v2875_v63 = vpop.f32.mrb[115].mxu1 }
 0x1dd   :  { %v1777_v4 = vmax.f32 %v3897_v38, %v1728_v40  ;;  %v1271_v32 = vmax.f32 %v1060_v41, 0.0  ;;  %v1680_v6 = vmax.f32 %v1469_v5, 0.0 }
 0x1de   :  { %v1064_v26 = vpop.f32.mrb[116].mxu0  ;;  %v1473_v9 = vpop.f32.mrb[116].mxu1 }
 0x1df   :  { %1826 = vst [vmem:[%s4730_s3 + $0x38] sm:$0xff] %v1777_v4  ;;  %v1729_v11 = vmax.f32 %v1271_v32, %v1680_v6  ;;  %v1065_v15 = vadd.f32 %v4266_v27, %v1064_v26  ;;  %v1474_v18 = vadd.f32 %v4266_v27, %v1473_v9  ;;  %v2699_v30 = vpop.f32.mrb[117].mxu0  ;;  %v2878_v1 = vpop.f32.mrb[117].mxu1 }
 0x1e1   :  { %v1778_v33 = vmax.f32 %v3911_v50, %v1729_v11  ;;  %v1272_v35 = vmax.f32 %v1065_v15, 0.0  ;;  %v1681_v37 = vmax.f32 %v1474_v18, 0.0 }
 0x1e2   :  { %v1069_v38 = vpop.f32.mrb[118].mxu0  ;;  %v1478_v43 = vpop.f32.mrb[118].mxu1 }
 0x1e3   :  { %1827 = vst [vmem:[%s4730_s3 + $0x40] sm:$0xff] %v1778_v33  ;;  %v1730_v47 = vmax.f32 %v1272_v35, %v1681_v37  ;;  %v1070_v21 = vadd.f32 %v4266_v27, %v1069_v38  ;;  %v1479_v8 = vadd.f32 %v4266_v27, %v1478_v43  ;;  %v2702_v48 = vpop.f32.mrb[119].mxu0  ;;  %v2881_v53 = vpop.f32.mrb[119].mxu1 }
 0x1e5   :  { %v1779_v14 = vmax.f32 %v3925_v62, %v1730_v47  ;;  %v1273_v57 = vmax.f32 %v1070_v21, 0.0  ;;  %v1682_v40 = vmax.f32 %v1479_v8, 0.0 }
 0x1e6   :  { %v1074_v50 = vpop.f32.mrb[120].mxu0  ;;  %v1483_v41 = vpop.f32.mrb[120].mxu1 }
 0x1e7   :  { %1828 = vst [vmem:[%s4730_s3 + $0x48] sm:$0xff] %v1779_v14  ;;  %v1731_v5 = vmax.f32 %v1273_v57, %v1682_v40  ;;  %v1075_v54 = vadd.f32 %v4266_v27, %v1074_v50  ;;  %v1484_v63 = vadd.f32 %v4266_v27, %v1483_v41  ;;  %v2705_v4 = vpop.f32.mrb[121].mxu0  ;;  %v2884_v32 = vpop.f32.mrb[121].mxu1 }
 0x1e9   :  { %v1780_v6 = vmax.f32 %v3939_v12, %v1731_v5  ;;  %v1274_v26 = vmax.f32 %v1075_v54, 0.0  ;;  %v1683_v9 = vmax.f32 %v1484_v63, 0.0 }
 0x1ea   :  { %v1079_v62 = vpop.f32.mrb[122].mxu0  ;;  %v1488_v11 = vpop.f32.mrb[122].mxu1 }
 0x1eb   :  { %1829 = vst [vmem:[%s4730_s3 + $0x50] sm:$0xff] %v1780_v6  ;;  %v1732_v15 = vmax.f32 %v1274_v26, %v1683_v9  ;;  %v1080_v18 = vadd.f32 %v4266_v27, %v1079_v62  ;;  %v1489_v30 = vadd.f32 %v4266_v27, %v1488_v11  ;;  %v2708_v1 = vpop.f32.mrb[123].mxu0  ;;  %v2887_v33 = vpop.f32.mrb[123].mxu1 }
 0x1ed   :  { %v1781_v35 = vmax.f32 %v3953_v25, %v1732_v15  ;;  %v1275_v37 = vmax.f32 %v1080_v18, 0.0  ;;  %v1684_v38 = vmax.f32 %v1489_v30, 0.0 }
 0x1ee   :  { %v1084_v12 = vpop.f32.mrb[124].mxu0  ;;  %v1493_v43 = vpop.f32.mrb[124].mxu1 }
 0x1ef   :  { %1830 = vst [vmem:[%s4730_s3 + $0x58] sm:$0xff] %v1781_v35  ;;  %v1733_v47 = vmax.f32 %v1275_v37, %v1684_v38  ;;  %v1085_v21 = vadd.f32 %v4266_v27, %v1084_v12  ;;  %v1494_v8 = vadd.f32 %v4266_v27, %v1493_v43  ;;  %v2711_v48 = vpop.f32.mrb[125].mxu0  ;;  %v2890_v53 = vpop.f32.mrb[125].mxu1 }
 0x1f1   :  { %v1782_v14 = vmax.f32 %v3967_v39, %v1733_v47  ;;  %v1276_v57 = vmax.f32 %v1085_v21, 0.0  ;;  %v1685_v40 = vmax.f32 %v1494_v8, 0.0 }
 0x1f2   :  { %v1089_v25 = vpop.f32.mrb[126].mxu0  ;;  %v1498_v50 = vpop.f32.mrb[126].mxu1 }
 0x1f3   :  { %1831 = vst [vmem:[%s4730_s3 + $0x60] sm:$0xff] %v1782_v14  ;;  %v1734_v41 = vmax.f32 %v1276_v57, %v1685_v40  ;;  %v1090_v5 = vadd.f32 %v4266_v27, %v1089_v25  ;;  %v1499_v54 = vadd.f32 %v4266_v27, %v1498_v50  ;;  %v2714_v63 = vpop.f32.mrb[127].mxu0  ;;  %v2893_v4 = vpop.f32.mrb[127].mxu1 }
 0x1f5   :  { %v1783_v32 = vmax.f32 %v3981_v52, %v1734_v41  ;;  %v1277_v6 = vmax.f32 %v1090_v5, 0.0  ;;  %v1686_v26 = vmax.f32 %v1499_v54, 0.0 }
 0x1f6   :  { %v1094_v39 = vpop.f32.mrb[128].mxu0  ;;  %v1503_v9 = vpop.f32.mrb[128].mxu1 }
 0x1f7   :  { %1832 = vst [vmem:[%s4730_s3 + $0x68] sm:$0xff] %v1783_v32  ;;  %v1735_v62 = vmax.f32 %v1277_v6, %v1686_v26  ;;  %v1095_v11 = vadd.f32 %v4266_v27, %v1094_v39  ;;  %v1504_v15 = vadd.f32 %v4266_v27, %v1503_v9  ;;  %v2717_v18 = vpop.f32.mrb[129].mxu0  ;;  %v2896_v30 = vpop.f32.mrb[129].mxu1 }
 0x1f9   :  { %v1784_v1 = vmax.f32 %v3995_v2, %v1735_v62  ;;  %v1278_v33 = vmax.f32 %v1095_v11, 0.0  ;;  %v1687_v35 = vmax.f32 %v1504_v15, 0.0 }
 0x1fa   :  { %v1099_v52 = vpop.f32.mrb[130].mxu0  ;;  %v1508_v37 = vpop.f32.mrb[130].mxu1 }
 0x1fb   :  { %1833 = vst [vmem:[%s4730_s3 + $0x70] sm:$0xff] %v1784_v1  ;;  %v1736_v38 = vmax.f32 %v1278_v33, %v1687_v35  ;;  %v1100_v12 = vadd.f32 %v4266_v27, %v1099_v52  ;;  %v1509_v43 = vadd.f32 %v4266_v27, %v1508_v37  ;;  %v2720_v47 = vpop.f32.mrb[131].mxu0  ;;  %v2899_v21 = vpop.f32.mrb[131].mxu1 }
 0x1fd   :  { %v1785_v8 = vmax.f32 %v4009_v17, %v1736_v38  ;;  %v1279_v48 = vmax.f32 %v1100_v12, 0.0  ;;  %v1688_v53 = vmax.f32 %v1509_v43, 0.0 }
 0x1fe   :  { %v1104_v2 = vpop.f32.mrb[132].mxu0  ;;  %v1513_v14 = vpop.f32.mrb[132].mxu1 }
 0x1ff   :  { %1834 = vst [vmem:[%s4730_s3 + $0x78] sm:$0xff] %v1785_v8  ;;  %v1737_v57 = vmax.f32 %v1279_v48, %v1688_v53  ;;  %v1105_v40 = vadd.f32 %v4266_v27, %v1104_v2  ;;  %v1514_v25 = vadd.f32 %v4266_v27, %v1513_v14  ;;  %v2723_v50 = vpop.f32.mrb[133].mxu0  ;;  %v2902_v41 = vpop.f32.mrb[133].mxu1 }
 0x201   :  { %v1786_v5 = vmax.f32 %v4023_v31, %v1737_v57  ;;  %v1280_v54 = vmax.f32 %v1105_v40, 0.0  ;;  %v1689_v63 = vmax.f32 %v1514_v25, 0.0 }
 0x202   :  { %v1109_v17 = vpop.f32.mrb[134].mxu0  ;;  %v1518_v4 = vpop.f32.mrb[134].mxu1 }
 0x203   :  { %1835 = vst [vmem:[%s4730_s3 + $0x80] sm:$0xff] %v1786_v5  ;;  %v1738_v32 = vmax.f32 %v1280_v54, %v1689_v63  ;;  %v1110_v6 = vadd.f32 %v4266_v27, %v1109_v17  ;;  %v1519_v26 = vadd.f32 %v4266_v27, %v1518_v4  ;;  %v2726_v39 = vpop.f32.mrb[135].mxu0  ;;  %v2905_v9 = vpop.f32.mrb[135].mxu1 }
 0x205   :  { %v1787_v62 = vmax.f32 %v4037_v46, %v1738_v32  ;;  %v1281_v11 = vmax.f32 %v1110_v6, 0.0  ;;  %v1690_v15 = vmax.f32 %v1519_v26, 0.0 }
 0x206   :  { %v1114_v31 = vpop.f32.mrb[136].mxu0  ;;  %v1523_v18 = vpop.f32.mrb[136].mxu1 }
 0x207   :  { %1836 = vst [vmem:[%s4730_s3 + $0x88] sm:$0xff] %v1787_v62  ;;  %v1739_v30 = vmax.f32 %v1281_v11, %v1690_v15  ;;  %v1115_v1 = vadd.f32 %v4266_v27, %v1114_v31  ;;  %v1524_v33 = vadd.f32 %v4266_v27, %v1523_v18  ;;  %v2729_v35 = vpop.f32.mrb[137].mxu0  ;;  %v2908_v52 = vpop.f32.mrb[137].mxu1 }
 0x209   :  { %v1788_v37 = vmax.f32 %v4051_v60, %v1739_v30  ;;  %v1282_v38 = vmax.f32 %v1115_v1, 0.0  ;;  %v1691_v12 = vmax.f32 %v1524_v33, 0.0 }
 0x20a   :  { %v1119_v46 = vpop.f32.mrb[138].mxu0  ;;  %v1528_v43 = vpop.f32.mrb[138].mxu1 }
 0x20b   :  { %1837 = vst [vmem:[%s4730_s3 + $0x90] sm:$0xff] %v1788_v37  ;;  %v1740_v47 = vmax.f32 %v1282_v38, %v1691_v12  ;;  %v1120_v21 = vadd.f32 %v4266_v27, %v1119_v46  ;;  %v1529_v8 = vadd.f32 %v4266_v27, %v1528_v43  ;;  %v2732_v48 = vpop.f32.mrb[139].mxu0  ;;  %v2911_v53 = vpop.f32.mrb[139].mxu1 }
 0x20d   :  { %v1789_v2 = vmax.f32 %v4065_v13, %v1740_v47  ;;  %v1283_v14 = vmax.f32 %v1120_v21, 0.0  ;;  %v1692_v57 = vmax.f32 %v1529_v8, 0.0 }
 0x20e   :  { %v1124_v60 = vpop.f32.mrb[140].mxu0  ;;  %v1533_v40 = vpop.f32.mrb[140].mxu1 }
 0x20f   :  { %1838 = vst [vmem:[%s4730_s3 + $0x98] sm:$0xff] %v1789_v2  ;;  %v1741_v25 = vmax.f32 %v1283_v14, %v1692_v57  ;;  %v1125_v50 = vadd.f32 %v4266_v27, %v1124_v60  ;;  %v1534_v41 = vadd.f32 %v4266_v27, %v1533_v40  ;;  %v2735_v5 = vpop.f32.mrb[141].mxu0  ;;  %v2914_v54 = vpop.f32.mrb[141].mxu1 }
 0x211   :  { %v1790_v63 = vmax.f32 %v4079_v29, %v1741_v25  ;;  %v1284_v17 = vmax.f32 %v1125_v50, 0.0  ;;  %v1693_v4 = vmax.f32 %v1534_v41, 0.0 }
 0x212   :  { %v1129_v13 = vpop.f32.mrb[142].mxu0  ;;  %v1538_v32 = vpop.f32.mrb[142].mxu1 }
 0x213   :  { %1839 = vst [vmem:[%s4730_s3 + $0xa0] sm:$0xff] %v1790_v63  ;;  %v1742_v6 = vmax.f32 %v1284_v17, %v1693_v4  ;;  %v1130_v26 = vadd.f32 %v4266_v27, %v1129_v13  ;;  %v1539_v39 = vadd.f32 %v4266_v27, %v1538_v32  ;;  %v2738_v9 = vpop.f32.mrb[143].mxu0  ;;  %v2917_v62 = vpop.f32.mrb[143].mxu1 }
 0x215   :  { %v1791_v11 = vmax.f32 %v4093_v45, %v1742_v6  ;;  %v1285_v15 = vmax.f32 %v1130_v26, 0.0  ;;  %v1694_v31 = vmax.f32 %v1539_v39, 0.0 }
 0x216   :  { %v1134_v29 = vpop.f32.mrb[144].mxu0  ;;  %v1543_v18 = vpop.f32.mrb[144].mxu1 }
 0x217   :  { %1840 = vst [vmem:[%s4730_s3 + $0xa8] sm:$0xff] %v1791_v11  ;;  %v1743_v30 = vmax.f32 %v1285_v15, %v1694_v31  ;;  %v1135_v1 = vadd.f32 %v4266_v27, %v1134_v29  ;;  %v1544_v33 = vadd.f32 %v4266_v27, %v1543_v18  ;;  %v2741_v35 = vpop.f32.mrb[145].mxu0  ;;  %v2920_v52 = vpop.f32.mrb[145].mxu1 }
 0x219   :  { %v1792_v37 = vmax.f32 %v4107_v61, %v1743_v30  ;;  %v1286_v38 = vmax.f32 %v1135_v1, 0.0  ;;  %v1695_v12 = vmax.f32 %v1544_v33, 0.0 }
 0x21a   :  { %v1139_v45 = vpop.f32.mrb[146].mxu0  ;;  %v1548_v46 = vpop.f32.mrb[146].mxu1 }
 0x21b   :  { %1841 = vst [vmem:[%s4730_s3 + $0xb0] sm:$0xff] %v1792_v37  ;;  %v1744_v43 = vmax.f32 %v1286_v38, %v1695_v12  ;;  %v1140_v47 = vadd.f32 %v4266_v27, %v1139_v45  ;;  %v1549_v21 = vadd.f32 %v4266_v27, %v1548_v46  ;;  %v2744_v8 = vpop.f32.mrb[147].mxu0  ;;  %v2923_v48 = vpop.f32.mrb[147].mxu1 }
 0x21d   :  { %v1793_v53 = vmax.f32 %v4121_v16, %v1744_v43  ;;  %v1287_v2 = vmax.f32 %v1140_v47, 0.0  ;;  %v1696_v14 = vmax.f32 %v1549_v21, 0.0 }
 0x21e   :  { %v1144_v61 = vpop.f32.mrb[148].mxu0  ;;  %v1553_v57 = vpop.f32.mrb[148].mxu1 }
 0x21f   :  { %1842 = vst [vmem:[%s4730_s3 + $0xb8] sm:$0xff] %v1793_v53  ;;  %v1745_v60 = vmax.f32 %v1287_v2, %v1696_v14  ;;  %v1145_v40 = vadd.f32 %v4266_v27, %v1144_v61  ;;  %v1554_v25 = vadd.f32 %v4266_v27, %v1553_v57  ;;  %v2747_v50 = vpop.f32.mrb[149].mxu0  ;;  %v2926_v41 = vpop.f32.mrb[149].mxu1  ;;  %v4601_v53 = vld [vmem:[%s4729_s2] ss:$0 sm:$0xff] }
 0x221   :  { %v1794_v5 = vmax.f32 %v4135_v34, %v1745_v60  ;;  %v1288_v54 = vmax.f32 %v1145_v40, 0.0  ;;  %v1697_v63 = vmax.f32 %v1554_v25, 0.0 }
 0x222   :  { %v1149_v16 = vpop.f32.mrb[150].mxu0  ;;  %v1558_v17 = vpop.f32.mrb[150].mxu1 }
 0x223   :  { %1843 = vst [vmem:[%s4730_s3 + $0xc0] sm:$0xff] %v1794_v5  ;;  %v1746_v4 = vmax.f32 %v1288_v54, %v1697_v63  ;;  %v1150_v13 = vadd.f32 %v4266_v27, %v1149_v16  ;;  %v1559_v32 = vadd.f32 %v4266_v27, %v1558_v17  ;;  %v2750_v6 = vpop.f32.mrb[151].mxu0  ;;  %v2929_v26 = vpop.f32.mrb[151].mxu1 }
 0x225   :  { %v1795_v39 = vmax.f32 %v4149_v51, %v1746_v4  ;;  %v1289_v9 = vmax.f32 %v1150_v13, 0.0  ;;  %v1698_v62 = vmax.f32 %v1559_v32, 0.0 }
 0x226   :  { %v1154_v34 = vpop.f32.mrb[152].mxu0  ;;  %v1563_v11 = vpop.f32.mrb[152].mxu1 }
 0x227   :  { %1844 = vst [vmem:[%s4730_s3 + $0xc8] sm:$0xff] %v1795_v39  ;;  %v1747_v15 = vmax.f32 %v1289_v9, %v1698_v62  ;;  %v1155_v31 = vadd.f32 %v4266_v27, %v1154_v34  ;;  %v1564_v29 = vadd.f32 %v4266_v27, %v1563_v11  ;;  %v2753_v18 = vpop.f32.mrb[153].mxu0  ;;  %v2932_v30 = vpop.f32.mrb[153].mxu1 }
 0x229   :  { %v1796_v1 = vmax.f32 %v4163_v7, %v1747_v15  ;;  %v1290_v33 = vmax.f32 %v1155_v31, 0.0  ;;  %v1699_v35 = vmax.f32 %v1564_v29, 0.0 }
 0x22a   :  { %v1159_v51 = vpop.f32.mrb[154].mxu0  ;;  %v1568_v52 = vpop.f32.mrb[154].mxu1 }
 0x22b   :  { %1845 = vst [vmem:[%s4730_s3 + $0xd0] sm:$0xff] %v1796_v1  ;;  %v1748_v37 = vmax.f32 %v1290_v33, %v1699_v35  ;;  %v1160_v38 = vadd.f32 %v4266_v27, %v1159_v51  ;;  %v1569_v12 = vadd.f32 %v4266_v27, %v1568_v52  ;;  %v2756_v45 = vpop.f32.mrb[155].mxu0  ;;  %v2935_v46 = vpop.f32.mrb[155].mxu1 }
 0x22d   :  { %v1797_v43 = vmax.f32 %v4177_v24, %v1748_v37  ;;  %v1291_v47 = vmax.f32 %v1160_v38, 0.0  ;;  %v1700_v21 = vmax.f32 %v1569_v12, 0.0 }
 0x22e   :  { %v1164_v7 = vpop.f32.mrb[156].mxu0  ;;  %v1573_v8 = vpop.f32.mrb[156].mxu1 }
 0x22f   :  { %1846 = vst [vmem:[%s4730_s3 + $0xd8] sm:$0xff] %v1797_v43  ;;  %v1749_v48 = vmax.f32 %v1291_v47, %v1700_v21  ;;  %v1165_v27 = vadd.f32 %v4601_v53, %v1164_v7  ;;  %v1574_v2 = vadd.f32 %v4601_v53, %v1573_v8  ;;  %v2759_v14 = vpop.f32.mrb[157].mxu0  ;;  %v2938_v24 = vpop.f32.mrb[157].mxu1 }
 0x231   :  { %v1798_v61 = vmax.f32 %v4191_v44, %v1749_v48  ;;  %v1292_v57 = vmax.f32 %v1165_v27, 0.0  ;;  %v1701_v60 = vmax.f32 %v1574_v2, 0.0 }
 0x232   :  { %v1169_v40 = vpop.f32.mrb[158].mxu0  ;;  %v1578_v25 = vpop.f32.mrb[158].mxu1 }
 0x233   :  { %1847 = vst [vmem:[%s4730_s3 + $0xe0] sm:$0xff] %v1798_v61  ;;  %v1750_v50 = vmax.f32 %v1292_v57, %v1701_v60  ;;  %v1170_v41 = vadd.f32 %v4601_v53, %v1169_v40  ;;  %v1579_v5 = vadd.f32 %v4601_v53, %v1578_v25  ;;  %v2762_v54 = vpop.f32.mrb[159].mxu0  ;;  %v2941_v63 = vpop.f32.mrb[159].mxu1 }
 0x235   :  { %v1799_v16 = vmax.f32 %v4205_v0, %v1750_v50  ;;  %v1293_v17 = vmax.f32 %v1170_v41, 0.0  ;;  %v1702_v4 = vmax.f32 %v1579_v5, 0.0 }
 0x236   :  { %v1174_v44 = vpop.f32.mrb[160].mxu0  ;;  %v1583_v13 = vpop.f32.mrb[160].mxu1 }
 0x237   :  { %1848 = vst [vmem:[%s4730_s3 + $0xe8] sm:$0xff] %v1799_v16  ;;  %v1751_v32 = vmax.f32 %v1293_v17, %v1702_v4  ;;  %v1175_v6 = vadd.f32 %v4601_v53, %v1174_v44  ;;  %v1584_v26 = vadd.f32 %v4601_v53, %v1583_v13  ;;  %v2765_v39 = vpop.f32.mrb[161].mxu0  ;;  %v2944_v9 = vpop.f32.mrb[161].mxu1 }
 0x239   :  { %v1800_v62 = vmax.f32 %v4219_v22, %v1751_v32  ;;  %v1294_v34 = vmax.f32 %v1175_v6, 0.0  ;;  %v1703_v11 = vmax.f32 %v1584_v26, 0.0 }
 0x23a   :  { %v1179_v0 = vpop.f32.mrb[162].mxu0  ;;  %v1588_v15 = vpop.f32.mrb[162].mxu1 }
 0x23b   :  { %1849 = vst [vmem:[%s4730_s3 + $0xf0] sm:$0xff] %v1800_v62  ;;  %v1752_v31 = vmax.f32 %v1294_v34, %v1703_v11  ;;  %v1180_v29 = vadd.f32 %v4601_v53, %v1179_v0  ;;  %v1589_v18 = vadd.f32 %v4601_v53, %v1588_v15  ;;  %v2768_v30 = vpop.f32.mrb[163].mxu0  ;;  %v2947_v1 = vpop.f32.mrb[163].mxu1 }
 0x23d   :  { %v1801_v33 = vmax.f32 %v4233_v42, %v1752_v31  ;;  %v1295_v35 = vmax.f32 %v1180_v29, 0.0  ;;  %v1704_v51 = vmax.f32 %v1589_v18, 0.0 }
 0x23e   :  { %v1184_v22 = vpop.f32.mrb[164].mxu0  ;;  %v1593_v52 = vpop.f32.mrb[164].mxu1 }
 0x23f   :  { %1850 = vst [vmem:[%s4730_s3 + $0xf8] sm:$0xff] %v1801_v33  ;;  %v1753_v37 = vmax.f32 %v1295_v35, %v1704_v51  ;;  %v1185_v38 = vadd.f32 %v4601_v53, %v1184_v22  ;;  %v1594_v12 = vadd.f32 %v4601_v53, %v1593_v52  ;;  %v2771_v45 = vpop.f32.mrb[165].mxu0  ;;  %v2950_v46 = vpop.f32.mrb[165].mxu1 }
 0x241   :  { %v1802_v43 = vmax.f32 %v4247_v3, %v1753_v37  ;;  %v1296_v47 = vmax.f32 %v1185_v38, 0.0  ;;  %v1705_v21 = vmax.f32 %v1594_v12, 0.0 }
 0x242   :  { %v1189_v42 = vpop.f32.mrb[166].mxu0  ;;  %v1598_v7 = vpop.f32.mrb[166].mxu1 }
 0x243   :  { %1851 = vst [vmem:[%s4730_s3 + $0x100] sm:$0xff] %v1802_v43  ;;  %v1754_v8 = vmax.f32 %v1296_v47, %v1705_v21  ;;  %v1190_v48 = vadd.f32 %v4601_v53, %v1189_v42  ;;  %v1599_v27 = vadd.f32 %v4601_v53, %v1598_v7  ;;  %v2774_v2 = vpop.f32.mrb[167].mxu0  ;;  %v2953_v14 = vpop.f32.mrb[167].mxu1 }
 0x245   :  { %v1803_v24 = vmax.f32 %v4261_v23, %v1754_v8  ;;  %v1297_v61 = vmax.f32 %v1190_v48, 0.0  ;;  %v1706_v57 = vmax.f32 %v1599_v27, 0.0 }
 0x246   :  { %v1194_v3 = vpop.f32.mrb[168].mxu0  ;;  %v1603_v60 = vpop.f32.mrb[168].mxu1 }
 0x247   :  { %1852 = vst [vmem:[%s4730_s3 + $0x108] sm:$0xff] %v1803_v24  ;;  %v1755_v40 = vmax.f32 %v1297_v61, %v1706_v57  ;;  %v1195_v25 = vadd.f32 %v4601_v53, %v1194_v3  ;;  %v1604_v50 = vadd.f32 %v4601_v53, %v1603_v60  ;;  %v2777_v41 = vpop.f32.mrb[169].mxu0  ;;  %v2956_v5 = vpop.f32.mrb[169].mxu1 }
 0x249   :  { %v1804_v54 = vmax.f32 %v4280_v49, %v1755_v40  ;;  %v1298_v63 = vmax.f32 %v1195_v25, 0.0  ;;  %v1707_v16 = vmax.f32 %v1604_v50, 0.0 }
 0x24a   :  { %v1199_v23 = vpop.f32.mrb[170].mxu0  ;;  %v1608_v17 = vpop.f32.mrb[170].mxu1 }
 0x24b   :  { %1853 = vst [vmem:[%s4730_s3 + $0x110] sm:$0xff] %v1804_v54  ;;  %v1756_v4 = vmax.f32 %v1298_v63, %v1707_v16  ;;  %v1200_v44 = vadd.f32 %v4601_v53, %v1199_v23  ;;  %v1609_v13 = vadd.f32 %v4601_v53, %v1608_v17  ;;  %v2780_v32 = vpop.f32.mrb[171].mxu0  ;;  %v2959_v6 = vpop.f32.mrb[171].mxu1 }
 0x24d   :  { %v1805_v26 = vmax.f32 %v4294_v10, %v1756_v4  ;;  %v1299_v39 = vmax.f32 %v1200_v44, 0.0  ;;  %v1708_v9 = vmax.f32 %v1609_v13, 0.0 }
 0x24e   :  { %v1204_v49 = vpop.f32.mrb[172].mxu0  ;;  %v1613_v62 = vpop.f32.mrb[172].mxu1 }
 0x24f   :  { %1854 = vst [vmem:[%s4730_s3 + $0x118] sm:$0xff] %v1805_v26  ;;  %v1757_v34 = vmax.f32 %v1299_v39, %v1708_v9  ;;  %v1205_v11 = vadd.f32 %v4601_v53, %v1204_v49  ;;  %v1614_v0 = vadd.f32 %v4601_v53, %v1613_v62  ;;  %v2783_v15 = vpop.f32.mrb[173].mxu0  ;;  %v2962_v31 = vpop.f32.mrb[173].mxu1 }
 0x251   :  { %v1806_v29 = vmax.f32 %v4308_v36, %v1757_v34  ;;  %v1300_v18 = vmax.f32 %v1205_v11, 0.0  ;;  %v1709_v30 = vmax.f32 %v1614_v0, 0.0 }
 0x252   :  { %v1209_v10 = vpop.f32.mrb[174].mxu0  ;;  %v1618_v1 = vpop.f32.mrb[174].mxu1 }
 0x253   :  { %1855 = vst [vmem:[%s4730_s3 + $0x120] sm:$0xff] %v1806_v29  ;;  %v1758_v33 = vmax.f32 %v1300_v18, %v1709_v30  ;;  %v1210_v35 = vadd.f32 %v4601_v53, %v1209_v10  ;;  %v1619_v51 = vadd.f32 %v4601_v53, %v1618_v1  ;;  %v2786_v22 = vpop.f32.mrb[175].mxu0  ;;  %v2965_v52 = vpop.f32.mrb[175].mxu1 }
 0x255   :  { %v1807_v37 = vmax.f32 %v4322_v59, %v1758_v33  ;;  %v1301_v38 = vmax.f32 %v1210_v35, 0.0  ;;  %v1710_v12 = vmax.f32 %v1619_v51, 0.0 }
 0x256   :  { %v1214_v36 = vpop.f32.mrb[176].mxu0  ;;  %v1623_v45 = vpop.f32.mrb[176].mxu1 }
 0x257   :  { %1856 = vst [vmem:[%s4730_s3 + $0x128] sm:$0xff] %v1807_v37  ;;  %v1759_v46 = vmax.f32 %v1301_v38, %v1710_v12  ;;  %v1215_v43 = vadd.f32 %v4601_v53, %v1214_v36  ;;  %v1624_v47 = vadd.f32 %v4601_v53, %v1623_v45  ;;  %v2789_v21 = vpop.f32.mrb[177].mxu0  ;;  %v2968_v42 = vpop.f32.mrb[177].mxu1 }
 0x258   :  { %v4736_v21 = vld [vmem:[#allocation2_spill] sm:$0xff] }
 0x259   :  { %v1808_v7 = vmax.f32 %v4336_v28, %v1759_v46  ;;  %v1302_v8 = vmax.f32 %v1215_v43, 0.0  ;;  %v1711_v48 = vmax.f32 %v1624_v47, 0.0 }
 0x25a   :  { %v1219_v59 = vpop.f32.mrb[178].mxu0  ;;  %v1628_v27 = vpop.f32.mrb[178].mxu1 }
 0x25b   :  { %1857 = vst [vmem:[%s4730_s3 + $0x130] sm:$0xff] %v1808_v7  ;;  %v1760_v2 = vmax.f32 %v1302_v8, %v1711_v48  ;;  %v1220_v14 = vadd.f32 %v4601_v53, %v1219_v59  ;;  %v1629_v24 = vadd.f32 %v4601_v53, %v1628_v27  ;;  %v2792_v61 = vpop.f32.mrb[179].mxu0  ;;  %v2971_v57 = vpop.f32.mrb[179].mxu1 }
 0x25c   :  { %v4737_v61 = vld [vmem:[#allocation3_spill] sm:$0xff] }
 0x25d   :  { %v1809_v3 = vmax.f32 %v4350_v56, %v1760_v2  ;;  %v1303_v60 = vmax.f32 %v1220_v14, 0.0  ;;  %v1712_v40 = vmax.f32 %v1629_v24, 0.0 }
 0x25e   :  { %v1224_v28 = vpop.f32.mrb[180].mxu0  ;;  %v1633_v25 = vpop.f32.mrb[180].mxu1 }
 0x25f   :  { %1858 = vst [vmem:[%s4730_s3 + $0x138] sm:$0xff] %v1809_v3  ;;  %v1761_v50 = vmax.f32 %v1303_v60, %v1712_v40  ;;  %v1225_v41 = vadd.f32 %v4601_v53, %v1224_v28  ;;  %v1634_v5 = vadd.f32 %v4601_v53, %v1633_v25  ;;  %v2795_v54 = vpop.f32.mrb[181].mxu0  ;;  %v2974_v63 = vpop.f32.mrb[181].mxu1 }
 0x260   :  { %v4738_v63 = vld [vmem:[#allocation4_spill] sm:$0xff] }
 0x261   :  { %v1810_v16 = vmax.f32 %v4364_v19, %v1761_v50  ;;  %v1304_v23 = vmax.f32 %v1225_v41, 0.0  ;;  %v1713_v17 = vmax.f32 %v1634_v5, 0.0 }
 0x262   :  { %v1229_v56 = vpop.f32.mrb[182].mxu0  ;;  %v1638_v4 = vpop.f32.mrb[182].mxu1 }
 0x263   :  { %1859 = vst [vmem:[%s4730_s3 + $0x140] sm:$0xff] %v1810_v16  ;;  %v1762_v44 = vmax.f32 %v1304_v23, %v1713_v17  ;;  %v1230_v13 = vadd.f32 %v4601_v53, %v1229_v56  ;;  %v1639_v32 = vadd.f32 %v4601_v53, %v1638_v4  ;;  %v2798_v6 = vpop.f32.mrb[183].mxu0  ;;  %v2977_v26 = vpop.f32.mrb[183].mxu1 }
 0x265   :  { %v1811_v39 = vmax.f32 %v4378_v55, %v1762_v44  ;;  %v1305_v9 = vmax.f32 %v1230_v13, 0.0  ;;  %v1714_v49 = vmax.f32 %v1639_v32, 0.0 }
 0x266   :  { %v1234_v19 = vpop.f32.mrb[184].mxu0  ;;  %v1643_v62 = vpop.f32.mrb[184].mxu1 }
 0x267   :  { %1860 = vst [vmem:[%s4730_s3 + $0x148] sm:$0xff] %v1811_v39  ;;  %v1763_v34 = vmax.f32 %v1305_v9, %v1714_v49  ;;  %v1235_v11 = vadd.f32 %v4601_v53, %v1234_v19  ;;  %v1644_v0 = vadd.f32 %v4601_v53, %v1643_v62  ;;  %v2801_v15 = vpop.f32.mrb[185].mxu0  ;;  %v2980_v31 = vpop.f32.mrb[185].mxu1  ;;  %v4739_v39 = vld [vmem:[#allocation5_spill] sm:$0xff] }
 0x269   :  { %v1812_v29 = vmax.f32 %v4392_v20, %v1763_v34  ;;  %v1306_v18 = vmax.f32 %v1235_v11, 0.0  ;;  %v1715_v30 = vmax.f32 %v1644_v0, 0.0  ;;  %v4740_v34 = vld [vmem:[#allocation6_spill] sm:$0xff] }
 0x26a   :  { %v1239_v55 = vpop.f32.mrb[186].mxu0  ;;  %v1648_v10 = vpop.f32.mrb[186].mxu1 }
 0x26b   :  { %1861 = vst [vmem:[%s4730_s3 + $0x150] sm:$0xff] %v1812_v29  ;;  %v1764_v1 = vmax.f32 %v1306_v18, %v1715_v30  ;;  %v1240_v33 = vadd.f32 %v4601_v53, %v1239_v55  ;;  %v1649_v35 = vadd.f32 %v4601_v53, %v1648_v10  ;;  %v2804_v51 = vpop.f32.mrb[187].mxu0  ;;  %v2983_v22 = vpop.f32.mrb[187].mxu1 }
 0x26d   :  { %v1813_v52 = vmax.f32 %v4406_v58, %v1764_v1  ;;  %v1307_v37 = vmax.f32 %v1240_v33, 0.0  ;;  %v1716_v38 = vmax.f32 %v1649_v35, 0.0 }
 0x26e   :  { %v1244_v20 = vpop.f32.mrb[188].mxu0  ;;  %v1653_v12 = vpop.f32.mrb[188].mxu1 }
 0x26f   :  { %1862 = vst [vmem:[%s4730_s3 + $0x158] sm:$0xff] %v1813_v52  ;;  %v1765_v36 = vmax.f32 %v1307_v37, %v1716_v38  ;;  %v1245_v45 = vadd.f32 %v4601_v53, %v1244_v20  ;;  %v1654_v46 = vadd.f32 %v4601_v53, %v1653_v12  ;;  %v2807_v43 = vpop.f32.mrb[189].mxu0  ;;  %v2986_v47 = vpop.f32.mrb[189].mxu1 }
 0x271   :  { %v1814_v42 = vmax.f32 %v4736_v21, %v1765_v36  ;;  %v1308_v7 = vmax.f32 %v1245_v45, 0.0  ;;  %v1717_v8 = vmax.f32 %v1654_v46, 0.0 }
 0x272   :  { %v1249_v58 = vpop.f32.mrb[190].mxu0  ;;  %v1658_v48 = vpop.f32.mrb[190].mxu1 }
 0x273   :  { %1863 = vst [vmem:[%s4730_s3 + $0x160] sm:$0xff] %v1814_v42  ;;  %v1766_v59 = vmax.f32 %v1308_v7, %v1717_v8  ;;  %v1250_v27 = vadd.f32 %v4601_v53, %v1249_v58  ;;  %v1659_v2 = vadd.f32 %v4601_v53, %v1658_v48  ;;  %v2810_v14 = vpop.f32.mrb[191].mxu0  ;;  %v2989_v24 = vpop.f32.mrb[191].mxu1 }
 0x275   :  { %v1815_v57 = vmax.f32 %v4737_v61, %v1766_v59  ;;  %v1309_v3 = vmax.f32 %v1250_v27, 0.0  ;;  %v1718_v60 = vmax.f32 %v1659_v2, 0.0 }
 0x276   :  { %v1254_v40 = vpop.f32.mrb[192].mxu0  ;;  %v1663_v28 = vpop.f32.mrb[192].mxu1 }
 0x277   :  { %1864 = vst [vmem:[%s4730_s3 + $0x168] sm:$0xff] %v1815_v57  ;;  %v1767_v25 = vmax.f32 %v1309_v3, %v1718_v60  ;;  %v1255_v50 = vadd.f32 %v4601_v53, %v1254_v40  ;;  %v1664_v41 = vadd.f32 %v4601_v53, %v1663_v28  ;;  %v2813_v5 = vpop.f32.mrb[193].mxu0  ;;  %v2992_v54 = vpop.f32.mrb[193].mxu1 }
 0x279   :  { %v1816_v16 = vmax.f32 %v4738_v63, %v1767_v25  ;;  %v1310_v23 = vmax.f32 %v1255_v50, 0.0  ;;  %v1719_v17 = vmax.f32 %v1664_v41, 0.0 }
 0x27a   :  { %v1259_v56 = vpop.f32.mrb[194].mxu0  ;;  %v1668_v4 = vpop.f32.mrb[194].mxu1 }
 0x27b   :  { %1865 = vst [vmem:[%s4730_s3 + $0x170] sm:$0xff] %v1816_v16  ;;  %v1768_v44 = vmax.f32 %v1310_v23, %v1719_v17  ;;  %v1260_v13 = vadd.f32 %v4601_v53, %v1259_v56  ;;  %v1669_v32 = vadd.f32 %v4601_v53, %v1668_v4  ;;  %v2816_v6 = vpop.f32.mrb[195].mxu0  ;;  %v2995_v26 = vpop.f32.mrb[195].mxu1 }
 0x27d   :  { %v1817_v9 = vmax.f32 %v4739_v39, %v1768_v44  ;;  %v1311_v49 = vmax.f32 %v1260_v13, 0.0  ;;  %v1720_v19 = vmax.f32 %v1669_v32, 0.0 }
 0x27f   :  { %1866 = vst [vmem:[%s4730_s3 + $0x178] sm:$0xff] %v1817_v9  ;;  %v1769_v62 = vmax.f32 %v1311_v49, %v1720_v19 }
 0x281   :  { %v1818_v11 = vmax.f32 %v4740_v34, %v1769_v62 }
 0x283   :  { %1867 = vst [vmem:[%s4730_s3 + $0x180] sm:$0xff] %v1818_v11 }

// kernel: lenet_forward.4
= control target key start
LH: loop header
LB: loop body
LE: loop exit
PB: predicated region body
PF: predicated region fallthrough
CT: control target
= control target key end

     0   :  { %s1410_s1 = inlined_call_operand.vmem [shape: f32[256,128], index: 1, kind: input, shape index: {}]   ;;  %s1411_s0 = inlined_call_operand.vmem [shape: f32[4,56,256], index: 0, kind: input, shape index: {}]   ;;  %s1412_s2 = inlined_call_operand.vmem [shape: f32[1,128], index: 2, kind: input, shape index: {}]   ;;  %s1413_s3 = inlined_call_operand.vmem [shape: f32[56,128], index: 3, kind: output, shape index: {}]  }
   0x1   :  { %v30_v0 = vld [vmem:[%s1410_s1 + $0x80] sm:$0xff]  ;;  %v31_v1 = vld [vmem:[%s1410_s1 + $0x88] sm:$0xff]  ;;  %v32_v5 = vld [vmem:[%s1410_s1 + $0x90] sm:$0xff] }
   0x2   :  { %v14_v2 = vld [vmem:[%s1410_s1] sm:$0xff]  ;;  %v984_v3 = vpack.c.bf16 %v31_v1, %v30_v0  ;;  %v15_v4 = vld [vmem:[%s1410_s1 + $0x8] sm:$0xff]  ;;  %v33_v6 = vld [vmem:[%s1410_s1 + $0x98] sm:$0xff] }
   0x3   :  { %v995_v7 = vpack.c.bf16 %v15_v4, %v14_v2  ;;  %v997_v8 = vpack.c.bf16 %v33_v6, %v32_v5  ;;  %v16_v9 = vld [vmem:[%s1410_s1 + $0x10] sm:$0xff]  ;;  %v17_v10 = vld [vmem:[%s1410_s1 + $0x18] sm:$0xff]  ;;  %v34_v11 = vld [vmem:[%s1410_s1 + $0xa0] sm:$0xff] }
   0x4   :  { %828 = vmatprep.subr.bf16.mxu0 %v984_v3  ;;  %860 = vmatprep.subr.bf16.mxu1 %v984_v3  ;;  %v35_v12 = vld [vmem:[%s1410_s1 + $0xa8] sm:$0xff]  ;;  %v1015_v13 = vpack.c.bf16 %v17_v10, %v16_v9  ;;  %v18_v15 = vld [vmem:[%s1410_s1 + $0x20] sm:$0xff]  ;;  %v36_v17 = vld [vmem:[%s1410_s1 + $0xb0] sm:$0xff] }
   0x5   :  { %830 = vmatpush3.bf16.msra.mxu0 %v995_v7  ;;  %862 = vmatpush3.bf16.msra.mxu1 %v995_v7  ;;  %v1019_v14 = vpack.c.bf16 %v35_v12, %v34_v11  ;;  %v19_v16 = vld [vmem:[%s1410_s1 + $0x28] sm:$0xff]  ;;  %v37_v18 = vld [vmem:[%s1410_s1 + $0xb8] sm:$0xff]  ;;  %v20_v21 = vld [vmem:[%s1410_s1 + $0x30] sm:$0xff] }
   0x6   :  { %832 = vmatprep.subr.bf16.mxu0 %v997_v8  ;;  %864 = vmatprep.subr.bf16.mxu1 %v997_v8  ;;  %v1035_v19 = vpack.c.bf16 %v19_v16, %v18_v15  ;;  %v1039_v20 = vpack.c.bf16 %v37_v18, %v36_v17  ;;  %v21_v22 = vld [vmem:[%s1410_s1 + $0x38] sm:$0xff]  ;;  %v38_v23 = vld [vmem:[%s1410_s1 + $0xc0] sm:$0xff]  ;;  %v39_v24 = vld [vmem:[%s1410_s1 + $0xc8] sm:$0xff] }
   0x7   :  { %v48_v25 = vld [vmem:[%s1411_s0 + $0x8] sm:$0xff]  ;;  %v574_v26 = vld [vmem:[%s1411_s0 + $0x78] sm:$0xff]  ;;  %v1061_v27 = vpack.c.bf16 %v21_v22, %v20_v21  ;;  %v1065_v28 = vpack.c.bf16 %v39_v24, %v38_v23  ;;  %v22_v29 = vld [vmem:[%s1410_s1 + $0x40] sm:$0xff] }
   0x8   :  { %131 = vmatprep.mubr.f32.mxu0 %v48_v25  ;;  %v23_v30 = vld [vmem:[%s1410_s1 + $0x48] sm:$0xff]  ;;  %v40_v31 = vld [vmem:[%s1410_s1 + $0xd0] sm:$0xff]  ;;  %v41_v32 = vld [vmem:[%s1410_s1 + $0xd8] sm:$0xff]  ;;  %253 = vmatprep.mubr.f32.mxu1 %v574_v26 }
   0x9   :  { %834 = vmatpush3.bf16.msra.mxu0 %v1015_v13  ;;  %866 = vmatpush3.bf16.msra.mxu1 %v1015_v13  ;;  %v1081_v33 = vpack.c.bf16 %v23_v30, %v22_v29  ;;  %v1085_v34 = vpack.c.bf16 %v41_v32, %v40_v31  ;;  %v24_v35 = vld [vmem:[%s1410_s1 + $0x50] sm:$0xff]  ;;  %v25_v36 = vld [vmem:[%s1410_s1 + $0x58] sm:$0xff]  ;;  %v42_v37 = vld [vmem:[%s1410_s1 + $0xe0] sm:$0xff] }
   0xa   :  { %836 = vmatprep.subr.bf16.mxu0 %v1019_v14  ;;  %868 = vmatprep.subr.bf16.mxu1 %v1019_v14  ;;  %v43_v38 = vld [vmem:[%s1410_s1 + $0xe8] sm:$0xff]  ;;  %v1101_v39 = vpack.c.bf16 %v25_v36, %v24_v35  ;;  %v26_v41 = vld [vmem:[%s1410_s1 + $0x60] sm:$0xff]  ;;  %v44_v43 = vld [vmem:[%s1410_s1 + $0xf0] sm:$0xff] }
   0xb   :  { %v1105_v40 = vpack.c.bf16 %v43_v38, %v42_v37  ;;  %v27_v42 = vld [vmem:[%s1410_s1 + $0x68] sm:$0xff]  ;;  %v45_v44 = vld [vmem:[%s1410_s1 + $0xf8] sm:$0xff]  ;;  %v28_v47 = vld [vmem:[%s1410_s1 + $0x70] sm:$0xff] }
   0xc   :  { %v1121_v45 = vpack.c.bf16 %v27_v42, %v26_v41  ;;  %v1125_v46 = vpack.c.bf16 %v45_v44, %v44_v43  ;;  %v29_v48 = vld [vmem:[%s1410_s1 + $0x78] sm:$0xff]  ;;  %v47_v50 = vld [vmem:[%s1411_s0] sm:$0xff]  ;;  %v573_v51 = vld [vmem:[%s1411_s0 + $0x70] sm:$0xff] }
   0xd   :  { %838 = vmatpush3.bf16.msra.mxu0 %v1035_v19  ;;  %870 = vmatpush3.bf16.msra.mxu1 %v1035_v19  ;;  %v1135_v49 = vpack.c.bf16 %v29_v48, %v28_v47  ;;  %v50_v52 = vld [vmem:[%s1411_s0 + $0x18] sm:$0xff]  ;;  %v576_v53 = vld [vmem:[%s1411_s0 + $0x88] sm:$0xff]  ;;  %v49_v54 = vld [vmem:[%s1411_s0 + $0x10] sm:$0xff] }
   0xe   :  { %840 = vmatprep.subr.bf16.mxu0 %v1039_v20  ;;  %872 = vmatprep.subr.bf16.mxu1 %v1039_v20  ;;  %v575_v55 = vld [vmem:[%s1411_s0 + $0x80] sm:$0xff]  ;;  %v52_v56 = vld [vmem:[%s1411_s0 + $0x28] sm:$0xff]  ;;  %v578_v57 = vld [vmem:[%s1411_s0 + $0x98] sm:$0xff] }
   0xf   :  { %v51_v58 = vld [vmem:[%s1411_s0 + $0x20] sm:$0xff]  ;;  %v577_v59 = vld [vmem:[%s1411_s0 + $0x90] sm:$0xff]  ;;  %v54_v60 = vld [vmem:[%s1411_s0 + $0x38] sm:$0xff] }
  0x10   :  { %v580_v61 = vld [vmem:[%s1411_s0 + $0xa8] sm:$0xff]  ;;  %v53_v62 = vld [vmem:[%s1411_s0 + $0x30] sm:$0xff]  ;;  %v579_v63 = vld [vmem:[%s1411_s0 + $0xa0] sm:$0xff] }
  0x11   :  { %842 = vmatpush3.bf16.msra.mxu0 %v1061_v27  ;;  %874 = vmatpush3.bf16.msra.mxu1 %v1061_v27  ;;  %v56_v0 = vld [vmem:[%s1411_s0 + $0x48] sm:$0xff]  ;;  %v582_v1 = vld [vmem:[%s1411_s0 + $0xb8] sm:$0xff]  ;;  %v55_v2 = vld [vmem:[%s1411_s0 + $0x40] sm:$0xff] }
  0x12   :  { %844 = vmatprep.subr.bf16.mxu0 %v1065_v28  ;;  %876 = vmatprep.subr.bf16.mxu1 %v1065_v28  ;;  %v58_v4 = vld [vmem:[%s1411_s0 + $0x58] sm:$0xff]  ;;  %v584_v5 = vld [vmem:[%s1411_s0 + $0xc8] sm:$0xff]  ;;  %v57_v6 = vld [vmem:[%s1411_s0 + $0x50] sm:$0xff] }
  0x13   :  { %v586_v9 = vld [vmem:[%s1411_s0 + $0xd8] sm:$0xff]  ;;  %v59_v10 = vld [vmem:[%s1411_s0 + $0x60] sm:$0xff]  ;;  %v585_v11 = vld [vmem:[%s1411_s0 + $0xd0] sm:$0xff] }
  0x14   :  { %v588_v12 = vld [vmem:[%s1411_s0 + $0xe8] sm:$0xff]  ;;  %v601_v15 = vld [vmem:[%s1411_s0 + $0x150] sm:$0xff]  ;;  %v590_v16 = vld [vmem:[%s1411_s0 + $0xf8] sm:$0xff] }
  0x15   :  { %846 = vmatpush3.bf16.msra.mxu0 %v1081_v33  ;;  %878 = vmatpush3.bf16.msra.mxu1 %v1081_v33  ;;  %v604_v17 = vld [vmem:[%s1411_s0 + $0x168] sm:$0xff]  ;;  %v589_v18 = vld [vmem:[%s1411_s0 + $0xf0] sm:$0xff]  ;;  %v606_v21 = vld [vmem:[%s1411_s0 + $0x178] sm:$0xff] }
  0x16   :  { %848 = vmatprep.subr.bf16.mxu0 %v1085_v34  ;;  %880 = vmatprep.subr.bf16.mxu1 %v1085_v34  ;;  %v591_v22 = vld [vmem:[%s1411_s0 + $0x100] sm:$0xff]  ;;  %v605_v23 = vld [vmem:[%s1411_s0 + $0x170] sm:$0xff]  ;;  %v594_v24 = vld [vmem:[%s1411_s0 + $0x118] sm:$0xff] }
  0x17   :  { %v608_v25 = vld [vmem:[%s1411_s0 + $0x188] sm:$0xff]  ;;  %v593_v26 = vld [vmem:[%s1411_s0 + $0x110] sm:$0xff]  ;;  %v610_v29 = vld [vmem:[%s1411_s0 + $0x198] sm:$0xff] }
  0x18   :  { %v595_v30 = vld [vmem:[%s1411_s0 + $0x120] sm:$0xff]  ;;  %v609_v31 = vld [vmem:[%s1411_s0 + $0x190] sm:$0xff]  ;;  %v598_v32 = vld [vmem:[%s1411_s0 + $0x138] sm:$0xff] }
  0x19   :  { %850 = vmatpush3.bf16.msra.mxu0 %v1101_v39  ;;  %882 = vmatpush3.bf16.msra.mxu1 %v1101_v39  ;;  %v611_v35 = vld [vmem:[%s1411_s0 + $0x1a0] sm:$0xff]  ;;  %v600_v36 = vld [vmem:[%s1411_s0 + $0x148] sm:$0xff]  ;;  %v614_v37 = vld [vmem:[%s1411_s0 + $0x1b8] sm:$0xff] }
  0x1a   :  { %852 = vmatprep.subr.bf16.mxu0 %v1105_v40  ;;  %884 = vmatprep.subr.bf16.mxu1 %v1105_v40  ;;  %v599_v38 = vld [vmem:[%s1411_s0 + $0x140] sm:$0xff] }
  0x1b   :  { %v1338_v42 = vld [vmem:[%s1412_s2] ss:$0 sm:$0xff] }
  0x1d   :  { %854 = vmatpush3.bf16.msra.mxu0 %v1121_v45  ;;  %886 = vmatpush3.bf16.msra.mxu1 %v1121_v45 }
  0x1e   :  { %856 = vmatprep.subr.bf16.mxu0 %v1125_v46  ;;  %888 = vmatprep.subr.bf16.mxu1 %v1125_v46 }
  0x21   :  { %858 = vmatpush3.bf16.msra.mxu0 %v1135_v49  ;;  %890 = vmatpush3.bf16.msra.mxu1 %v1135_v49 }
  0x22   :  { %892 = vmatprep.subr.bf16.mxu0 %v984_v3  ;;  %924 = vmatprep.subr.bf16.mxu1 %v984_v3  ;;  %v581_v3 = vld [vmem:[%s1411_s0 + $0xb0] sm:$0xff] }
  0x24   :  { %132 = vmatmul.mubr.f32.vlgmr.msra.gmra.mrb[0].mxu0 %v47_v50  ;;  %254 = vmatmul.mubr.f32.vlgmr.msra.gmra.mrb[0].mxu1 %v573_v51 }
  0x25   :  { %894 = vmatpush3.bf16.msra.mxu0 %v995_v7  ;;  %926 = vmatpush3.bf16.msra.mxu1 %v995_v7  ;;  %v583_v7 = vld [vmem:[%s1411_s0 + $0xc0] sm:$0xff] }
  0x26   :  { %896 = vmatprep.subr.bf16.mxu0 %v997_v8  ;;  %928 = vmatprep.subr.bf16.mxu1 %v997_v8  ;;  %v60_v8 = vld [vmem:[%s1411_s0 + $0x68] sm:$0xff] }
  0x27   :  { %136 = vmatprep.mubr.f32.mxu0 %v50_v52  ;;  %258 = vmatprep.mubr.f32.mxu1 %v576_v53 }
  0x28   :  { %137 = vmatmul.mubr.f32.gmra.mrb[2].mxu0 %v49_v54  ;;  %259 = vmatmul.mubr.f32.gmra.mrb[2].mxu1 %v575_v55 }
  0x29   :  { %898 = vmatpush3.bf16.msra.mxu0 %v1015_v13  ;;  %930 = vmatpush3.bf16.msra.mxu1 %v1015_v13  ;;  %v602_v13 = vld [vmem:[%s1411_s0 + $0x158] sm:$0xff] }
  0x2a   :  { %900 = vmatprep.subr.bf16.mxu0 %v1019_v14  ;;  %932 = vmatprep.subr.bf16.mxu1 %v1019_v14  ;;  %v587_v14 = vld [vmem:[%s1411_s0 + $0xe0] sm:$0xff] }
  0x2b   :  { %141 = vmatprep.mubr.f32.mxu0 %v52_v56  ;;  %263 = vmatprep.mubr.f32.mxu1 %v578_v57 }
  0x2c   :  { %142 = vmatmul.mubr.f32.gmra.mrb[4].mxu0 %v51_v58  ;;  %264 = vmatmul.mubr.f32.gmra.mrb[4].mxu1 %v577_v59 }
  0x2d   :  { %902 = vmatpush3.bf16.msra.mxu0 %v1035_v19  ;;  %934 = vmatpush3.bf16.msra.mxu1 %v1035_v19  ;;  %v603_v19 = vld [vmem:[%s1411_s0 + $0x160] sm:$0xff] }
  0x2e   :  { %904 = vmatprep.subr.bf16.mxu0 %v1039_v20  ;;  %936 = vmatprep.subr.bf16.mxu1 %v1039_v20  ;;  %v592_v20 = vld [vmem:[%s1411_s0 + $0x108] sm:$0xff] }
  0x2f   :  { %146 = vmatprep.mubr.f32.mxu0 %v54_v60  ;;  %268 = vmatprep.mubr.f32.mxu1 %v580_v61 }
  0x30   :  { %147 = vmatmul.mubr.f32.gmra.mrb[6].mxu0 %v53_v62  ;;  %269 = vmatmul.mubr.f32.gmra.mrb[6].mxu1 %v579_v63 }
  0x31   :  { %906 = vmatpush3.bf16.msra.mxu0 %v1061_v27  ;;  %938 = vmatpush3.bf16.msra.mxu1 %v1061_v27  ;;  %v607_v27 = vld [vmem:[%s1411_s0 + $0x180] sm:$0xff] }
  0x32   :  { %908 = vmatprep.subr.bf16.mxu0 %v1065_v28  ;;  %940 = vmatprep.subr.bf16.mxu1 %v1065_v28  ;;  %v596_v28 = vld [vmem:[%s1411_s0 + $0x128] sm:$0xff] }
  0x33   :  { %151 = vmatprep.mubr.f32.mxu0 %v56_v0  ;;  %273 = vmatprep.mubr.f32.mxu1 %v582_v1 }
  0x34   :  { %152 = vmatmul.mubr.f32.gmra.mrb[8].mxu0 %v55_v2  ;;  %274 = vmatmul.mubr.f32.gmra.mrb[8].mxu1 %v581_v3 }
  0x35   :  { %910 = vmatpush3.bf16.msra.mxu0 %v1081_v33  ;;  %942 = vmatpush3.bf16.msra.mxu1 %v1081_v33  ;;  %v612_v33 = vld [vmem:[%s1411_s0 + $0x1a8] sm:$0xff] }
  0x36   :  { %912 = vmatprep.subr.bf16.mxu0 %v1085_v34  ;;  %944 = vmatprep.subr.bf16.mxu1 %v1085_v34  ;;  %v597_v34 = vld [vmem:[%s1411_s0 + $0x130] sm:$0xff] }
  0x37   :  { %156 = vmatprep.mubr.f32.mxu0 %v58_v4  ;;  %278 = vmatprep.mubr.f32.mxu1 %v584_v5 }
  0x38   :  { %157 = vmatmul.mubr.f32.gmra.mrb[10].mxu0 %v57_v6  ;;  %279 = vmatmul.mubr.f32.gmra.mrb[10].mxu1 %v583_v7 }
  0x39   :  { %914 = vmatpush3.bf16.msra.mxu0 %v1101_v39  ;;  %946 = vmatpush3.bf16.msra.mxu1 %v1101_v39  ;;  %v613_v39 = vld [vmem:[%s1411_s0 + $0x1b0] sm:$0xff] }
  0x3a   :  { %916 = vmatprep.subr.bf16.mxu0 %v1105_v40  ;;  %948 = vmatprep.subr.bf16.mxu1 %v1105_v40 }
  0x3b   :  { %161 = vmatprep.mubr.f32.mxu0 %v60_v8  ;;  %283 = vmatprep.mubr.f32.mxu1 %v586_v9 }
  0x3c   :  { %162 = vmatmul.mubr.f32.gmra.mrb[12].mxu0 %v59_v10  ;;  %284 = vmatmul.mubr.f32.gmra.mrb[12].mxu1 %v585_v11 }
  0x3d   :  { %918 = vmatpush3.bf16.msra.mxu0 %v1121_v45  ;;  %950 = vmatpush3.bf16.msra.mxu1 %v1121_v45 }
  0x3e   :  { %920 = vmatprep.subr.bf16.mxu0 %v1125_v46  ;;  %952 = vmatprep.subr.bf16.mxu1 %v1125_v46 }
  0x3f   :  { %382 = vmatprep.mubr.f32.mxu0 %v588_v12  ;;  %504 = vmatprep.mubr.f32.mxu1 %v602_v13 }
  0x41   :  { %922 = vmatpush3.bf16.msra.mxu0 %v1135_v49  ;;  %954 = vmatpush3.bf16.msra.mxu1 %v1135_v49 }
  0x44   :  { %383 = vmatmul.mubr.f32.vlgmr.msra.gmra.mrb[14].mxu0 %v587_v14  ;;  %505 = vmatmul.mubr.f32.vlgmr.msra.gmra.mrb[14].mxu1 %v601_v15 }
  0x45   :  { %387 = vmatprep.mubr.f32.mxu0 %v590_v16  ;;  %509 = vmatprep.mubr.f32.mxu1 %v604_v17 }
  0x48   :  { %388 = vmatmul.mubr.f32.gmra.mrb[16].mxu0 %v589_v18  ;;  %510 = vmatmul.mubr.f32.gmra.mrb[16].mxu1 %v603_v19 }
  0x49   :  { %392 = vmatprep.mubr.f32.mxu0 %v592_v20  ;;  %514 = vmatprep.mubr.f32.mxu1 %v606_v21 }
  0x4c   :  { %393 = vmatmul.mubr.f32.gmra.mrb[18].mxu0 %v591_v22  ;;  %515 = vmatmul.mubr.f32.gmra.mrb[18].mxu1 %v605_v23 }
  0x4d   :  { %397 = vmatprep.mubr.f32.mxu0 %v594_v24  ;;  %519 = vmatprep.mubr.f32.mxu1 %v608_v25 }
  0x50   :  { %398 = vmatmul.mubr.f32.gmra.mrb[20].mxu0 %v593_v26  ;;  %520 = vmatmul.mubr.f32.gmra.mrb[20].mxu1 %v607_v27 }
  0x51   :  { %402 = vmatprep.mubr.f32.mxu0 %v596_v28  ;;  %524 = vmatprep.mubr.f32.mxu1 %v610_v29 }
  0x54   :  { %403 = vmatmul.mubr.f32.gmra.mrb[22].mxu0 %v595_v30  ;;  %525 = vmatmul.mubr.f32.gmra.mrb[22].mxu1 %v609_v31 }
  0x55   :  { %407 = vmatprep.mubr.f32.mxu0 %v598_v32  ;;  %529 = vmatprep.mubr.f32.mxu1 %v612_v33 }
  0x58   :  { %408 = vmatmul.mubr.f32.gmra.mrb[24].mxu0 %v597_v34  ;;  %530 = vmatmul.mubr.f32.gmra.mrb[24].mxu1 %v611_v35 }
  0x59   :  { %412 = vmatprep.mubr.f32.mxu0 %v600_v36  ;;  %534 = vmatprep.mubr.f32.mxu1 %v614_v37 }
  0x5c   :  { %413 = vmatmul.mubr.f32.gmra.mrb[26].mxu0 %v599_v38  ;;  %535 = vmatmul.mubr.f32.gmra.mrb[26].mxu1 %v613_v39 }
  0xf7   :  { %v647_v40 = vpop.f32.mrb[0].mxu0  ;;  %v700_v41 = vpop.f32.mrb[0].mxu1 }
  0xf8   :  { %v648_v43 = vpop.f32.mrb[1].mxu0  ;;  %v701_v44 = vpop.f32.mrb[1].mxu1 }
  0xf9   :  { %v649_v45 = vadd.f32 %v648_v43, %v647_v40  ;;  %v702_v46 = vadd.f32 %v701_v44, %v700_v41 }
  0xfb   :  { %v134_v47 = vadd.f32 %v649_v45, %v1338_v42  ;;  %v256_v48 = vadd.f32 %v702_v46, %v1338_v42  ;;  %v650_v49 = vpop.f32.mrb[2].mxu0  ;;  %v703_v50 = vpop.f32.mrb[2].mxu1 }
  0xfc   :  { %v651_v51 = vpop.f32.mrb[3].mxu0  ;;  %v704_v52 = vpop.f32.mrb[3].mxu1 }
  0xfd   :  { %v167_v53 = vmax.f32 %v134_v47, 0.0  ;;  %v289_v54 = vmax.f32 %v256_v48, 0.0  ;;  %v652_v55 = vadd.f32 %v651_v51, %v650_v49  ;;  %v705_v56 = vadd.f32 %v704_v52, %v703_v50 }
  0xff   :  { %v1342_v57 = vmax.f32 %v167_v53, %v289_v54  ;;  %v139_v58 = vadd.f32 %v652_v55, %v1338_v42  ;;  %v261_v59 = vadd.f32 %v705_v56, %v1338_v42  ;;  %v653_v60 = vpop.f32.mrb[4].mxu0  ;;  %v706_v61 = vpop.f32.mrb[4].mxu1 }
 0x100   :  { %v654_v62 = vpop.f32.mrb[5].mxu0  ;;  %v707_v63 = vpop.f32.mrb[5].mxu1 }
 0x101   :  { %v168_v0 = vmax.f32 %v139_v58, 0.0  ;;  %v290_v1 = vmax.f32 %v261_v59, 0.0  ;;  %v655_v2 = vadd.f32 %v654_v62, %v653_v60  ;;  %v708_v3 = vadd.f32 %v707_v63, %v706_v61 }
 0x103   :  { %v1346_v4 = vmax.f32 %v168_v0, %v290_v1  ;;  %v144_v5 = vadd.f32 %v655_v2, %v1338_v42  ;;  %v266_v6 = vadd.f32 %v708_v3, %v1338_v42  ;;  %v656_v7 = vpop.f32.mrb[6].mxu0  ;;  %v709_v8 = vpop.f32.mrb[6].mxu1 }
 0x104   :  { %v657_v9 = vpop.f32.mrb[7].mxu0  ;;  %v710_v10 = vpop.f32.mrb[7].mxu1 }
 0x105   :  { %v169_v11 = vmax.f32 %v144_v5, 0.0  ;;  %v291_v12 = vmax.f32 %v266_v6, 0.0  ;;  %v658_v13 = vadd.f32 %v657_v9, %v656_v7  ;;  %v711_v14 = vadd.f32 %v710_v10, %v709_v8 }
 0x107   :  { %v1350_v15 = vmax.f32 %v169_v11, %v291_v12  ;;  %v149_v16 = vadd.f32 %v658_v13, %v1338_v42  ;;  %v271_v17 = vadd.f32 %v711_v14, %v1338_v42  ;;  %v659_v18 = vpop.f32.mrb[8].mxu0  ;;  %v712_v19 = vpop.f32.mrb[8].mxu1 }
 0x108   :  { %v660_v20 = vpop.f32.mrb[9].mxu0  ;;  %v713_v21 = vpop.f32.mrb[9].mxu1 }
 0x109   :  { %v170_v22 = vmax.f32 %v149_v16, 0.0  ;;  %v292_v23 = vmax.f32 %v271_v17, 0.0  ;;  %v661_v24 = vadd.f32 %v660_v20, %v659_v18  ;;  %v714_v25 = vadd.f32 %v713_v21, %v712_v19 }
 0x10b   :  { %v1354_v26 = vmax.f32 %v170_v22, %v292_v23  ;;  %v154_v27 = vadd.f32 %v661_v24, %v1338_v42  ;;  %v276_v28 = vadd.f32 %v714_v25, %v1338_v42  ;;  %v662_v29 = vpop.f32.mrb[10].mxu0  ;;  %v715_v30 = vpop.f32.mrb[10].mxu1 }
 0x10c   :  { %v663_v31 = vpop.f32.mrb[11].mxu0  ;;  %v716_v32 = vpop.f32.mrb[11].mxu1 }
 0x10d   :  { %v171_v33 = vmax.f32 %v154_v27, 0.0  ;;  %v293_v34 = vmax.f32 %v276_v28, 0.0  ;;  %v664_v35 = vadd.f32 %v663_v31, %v662_v29  ;;  %v717_v36 = vadd.f32 %v716_v32, %v715_v30 }
 0x10f   :  { %v1358_v37 = vmax.f32 %v171_v33, %v293_v34  ;;  %v159_v38 = vadd.f32 %v664_v35, %v1338_v42  ;;  %v281_v39 = vadd.f32 %v717_v36, %v1338_v42  ;;  %v665_v40 = vpop.f32.mrb[12].mxu0  ;;  %v718_v41 = vpop.f32.mrb[12].mxu1 }
 0x110   :  { %v666_v43 = vpop.f32.mrb[13].mxu0  ;;  %v719_v44 = vpop.f32.mrb[13].mxu1 }
 0x111   :  { %v172_v45 = vmax.f32 %v159_v38, 0.0  ;;  %v294_v46 = vmax.f32 %v281_v39, 0.0  ;;  %v667_v47 = vadd.f32 %v666_v43, %v665_v40  ;;  %v720_v48 = vadd.f32 %v719_v44, %v718_v41 }
 0x113   :  { %v1362_v49 = vmax.f32 %v172_v45, %v294_v46  ;;  %v164_v50 = vadd.f32 %v667_v47, %v1338_v42  ;;  %v286_v51 = vadd.f32 %v720_v48, %v1338_v42 }
 0x115   :  { %v173_v52 = vmax.f32 %v164_v50, 0.0  ;;  %v295_v53 = vmax.f32 %v286_v51, 0.0 }
 0x117   :  { %v1366_v54 = vmax.f32 %v173_v52, %v295_v53  ;;  %v753_v55 = vpop.f32.mrb[14].mxu0  ;;  %v806_v56 = vpop.f32.mrb[14].mxu1 }
 0x118   :  { %v754_v58 = vpop.f32.mrb[15].mxu0  ;;  %v807_v59 = vpop.f32.mrb[15].mxu1 }
 0x119   :  { %v755_v60 = vadd.f32 %v754_v58, %v753_v55  ;;  %v808_v61 = vadd.f32 %v807_v59, %v806_v56 }
 0x11b   :  { %v385_v62 = vadd.f32 %v755_v60, %v1338_v42  ;;  %v507_v63 = vadd.f32 %v808_v61, %v1338_v42  ;;  %v756_v0 = vpop.f32.mrb[16].mxu0  ;;  %v809_v1 = vpop.f32.mrb[16].mxu1 }
 0x11c   :  { %v757_v2 = vpop.f32.mrb[17].mxu0  ;;  %v810_v3 = vpop.f32.mrb[17].mxu1 }
 0x11d   :  { %v418_v5 = vmax.f32 %v385_v62, 0.0  ;;  %v540_v6 = vmax.f32 %v507_v63, 0.0  ;;  %v758_v7 = vadd.f32 %v757_v2, %v756_v0  ;;  %v811_v8 = vadd.f32 %v810_v3, %v809_v1 }
 0x11f   :  { %v547_v9 = vmax.f32 %v418_v5, %v540_v6  ;;  %v390_v10 = vadd.f32 %v758_v7, %v1338_v42  ;;  %v512_v11 = vadd.f32 %v811_v8, %v1338_v42  ;;  %v759_v12 = vpop.f32.mrb[18].mxu0  ;;  %v812_v13 = vpop.f32.mrb[18].mxu1 }
 0x120   :  { %v760_v14 = vpop.f32.mrb[19].mxu0  ;;  %v813_v16 = vpop.f32.mrb[19].mxu1 }
 0x121   :  { %v554_v17 = vmax.f32 %v1342_v57, %v547_v9  ;;  %v419_v18 = vmax.f32 %v390_v10, 0.0  ;;  %v541_v19 = vmax.f32 %v512_v11, 0.0  ;;  %v761_v20 = vadd.f32 %v760_v14, %v759_v12 }
 0x122   :  { %v814_v21 = vadd.f32 %v813_v16, %v812_v13 }
 0x123   :  { %561 = vst [vmem:[%s1413_s3] sm:$0xff] %v554_v17  ;;  %v548_v22 = vmax.f32 %v419_v18, %v541_v19  ;;  %v395_v23 = vadd.f32 %v761_v20, %v1338_v42  ;;  %v762_v24 = vpop.f32.mrb[20].mxu0  ;;  %v815_v25 = vpop.f32.mrb[20].mxu1 }
 0x124   :  { %v517_v27 = vadd.f32 %v814_v21, %v1338_v42  ;;  %v763_v28 = vpop.f32.mrb[21].mxu0  ;;  %v816_v29 = vpop.f32.mrb[21].mxu1 }
 0x125   :  { %v555_v30 = vmax.f32 %v1346_v4, %v548_v22  ;;  %v420_v57 = vmax.f32 %v395_v23, 0.0  ;;  %v764_v31 = vadd.f32 %v763_v28, %v762_v24  ;;  %v817_v32 = vadd.f32 %v816_v29, %v815_v25 }
 0x126   :  { %v542_v33 = vmax.f32 %v517_v27, 0.0 }
 0x127   :  { %562 = vst [vmem:[%s1413_s3 + $0x8] sm:$0xff] %v555_v30  ;;  %v400_v34 = vadd.f32 %v764_v31, %v1338_v42  ;;  %v522_v35 = vadd.f32 %v817_v32, %v1338_v42  ;;  %v765_v36 = vpop.f32.mrb[22].mxu0  ;;  %v818_v38 = vpop.f32.mrb[22].mxu1 }
 0x128   :  { %v549_v39 = vmax.f32 %v420_v57, %v542_v33  ;;  %v766_v40 = vpop.f32.mrb[23].mxu0  ;;  %v819_v41 = vpop.f32.mrb[23].mxu1 }
 0x129   :  { %v421_v43 = vmax.f32 %v400_v34, 0.0  ;;  %v543_v44 = vmax.f32 %v522_v35, 0.0  ;;  %v767_v4 = vadd.f32 %v766_v40, %v765_v36  ;;  %v820_v45 = vadd.f32 %v819_v41, %v818_v38 }
 0x12a   :  { %v556_v46 = vmax.f32 %v1350_v15, %v549_v39 }
 0x12b   :  { %v550_v47 = vmax.f32 %v421_v43, %v543_v44  ;;  %v405_v48 = vadd.f32 %v767_v4, %v1338_v42  ;;  %v527_v50 = vadd.f32 %v820_v45, %v1338_v42  ;;  %v768_v51 = vpop.f32.mrb[24].mxu0  ;;  %v821_v52 = vpop.f32.mrb[24].mxu1 }
 0x12c   :  { %563 = vst [vmem:[%s1413_s3 + $0x10] sm:$0xff] %v556_v46  ;;  %v769_v53 = vpop.f32.mrb[25].mxu0  ;;  %v822_v55 = vpop.f32.mrb[25].mxu1 }
 0x12d   :  { %v557_v56 = vmax.f32 %v1354_v26, %v550_v47  ;;  %v422_v58 = vmax.f32 %v405_v48, 0.0  ;;  %v544_v59 = vmax.f32 %v527_v50, 0.0  ;;  %v770_v60 = vadd.f32 %v769_v53, %v768_v51 }
 0x12e   :  { %v823_v61 = vadd.f32 %v822_v55, %v821_v52 }
 0x12f   :  { %564 = vst [vmem:[%s1413_s3 + $0x18] sm:$0xff] %v557_v56  ;;  %v551_v15 = vmax.f32 %v422_v58, %v544_v59  ;;  %v410_v62 = vadd.f32 %v770_v60, %v1338_v42  ;;  %v771_v63 = vpop.f32.mrb[26].mxu0  ;;  %v824_v0 = vpop.f32.mrb[26].mxu1 }
 0x130   :  { %v532_v1 = vadd.f32 %v823_v61, %v1338_v42  ;;  %v772_v2 = vpop.f32.mrb[27].mxu0  ;;  %v825_v3 = vpop.f32.mrb[27].mxu1 }
 0x131   :  { %v558_v5 = vmax.f32 %v1358_v37, %v551_v15  ;;  %v423_v26 = vmax.f32 %v410_v62, 0.0  ;;  %v773_v6 = vadd.f32 %v772_v2, %v771_v63  ;;  %v826_v7 = vadd.f32 %v825_v3, %v824_v0 }
 0x132   :  { %v545_v8 = vmax.f32 %v532_v1, 0.0 }
 0x133   :  { %565 = vst [vmem:[%s1413_s3 + $0x20] sm:$0xff] %v558_v5  ;;  %v415_v9 = vadd.f32 %v773_v6, %v1338_v42  ;;  %v537_v10 = vadd.f32 %v826_v7, %v1338_v42 }
 0x134   :  { %v552_v11 = vmax.f32 %v423_v26, %v545_v8 }
 0x135   :  { %v424_v12 = vmax.f32 %v415_v9, 0.0  ;;  %v546_v13 = vmax.f32 %v537_v10, 0.0 }
 0x136   :  { %v559_v14 = vmax.f32 %v1362_v49, %v552_v11 }
 0x137   :  { %v553_v16 = vmax.f32 %v424_v12, %v546_v13 }
 0x138   :  { %566 = vst [vmem:[%s1413_s3 + $0x28] sm:$0xff] %v559_v14 }
 0x139   :  { %v560_v37 = vmax.f32 %v1366_v54, %v553_v16 }
 0x13b   :  { %567 = vst [vmem:[%s1413_s3 + $0x30] sm:$0xff] %v560_v37 }

// kernel: lenet_forward.5
= control target key start
LH: loop header
LB: loop body
LE: loop exit
PB: predicated region body
PF: predicated region fallthrough
CT: control target
= control target key end

     0   :  { %v677_v2 = vmov 0.0|0.0   ;;  %vm87_vm0 = vcmask 130048   ;;  %vm678_vm1 = vmmov 0   ;;  %s1016_s1 = inlined_call_operand.vmem [shape: f32[400,128], index: 1, kind: input, shape index: {}]   ;;  %s1017_s0 = inlined_call_operand.vmem [shape: f32[8,400], index: 0, kind: input, shape index: {}]   ;;  %s1018_s3 = inlined_call_operand.vmem [shape: f32[128,128], index: 3, kind: input, shape index: {}]   ;;  %s1019_s5 = inlined_call_operand.vmem [shape: f32[128,128], index: 5, kind: input, shape index: {}]   ;;  %s1020_s2 = inlined_call_operand.vmem [shape: f32[1,128], index: 2, kind: input, shape index: {}]   ;;  %s1021_s4 = inlined_call_operand.vmem [shape: f32[1,128], index: 4, kind: input, shape index: {}]   ;;  %s1022_s6 = inlined_call_operand.vmem [shape: f32[1,128], index: 6, kind: input, shape index: {}]   ;;  %s1023_s7 = inlined_call_operand.vmem [shape: f32[8,128], index: 7, kind: output, shape index: {}]  }
   0x1   :  { %v46_v0 = vld [vmem:[%s1016_s1 + $0x80] sm:$0xff]  ;;  %v47_v1 = vld [vmem:[%s1016_s1 + $0x88] sm:$0xff]  ;;  %599 = vmatprep.subr.bf16.mxu1 %v677_v2  ;;  %v48_v10 = vld [vmem:[%s1016_s1 + $0x90] sm:$0xff] }
   0x2   :  { %v30_v3 = vld [vmem:[%s1016_s1] sm:$0xff]  ;;  %v567_v4 = vpack.c.bf16 %v47_v1, %v46_v0  ;;  %v31_v5 = vld [vmem:[%s1016_s1 + $0x8] sm:$0xff]  ;;  %v49_v11 = vld [vmem:[%s1016_s1 + $0x98] sm:$0xff] }
   0x3   :  { %v62_v6 = vld [vmem:[%s1016_s1 + $0x100] sm:$0xff]  ;;  %v63_v7 = vld [vmem:[%s1016_s1 + $0x108] sm:$0xff]  ;;  %v569_v8 = vpack.c.bf16 %v31_v5, %v30_v3  ;;  %v32_v12 = vld [vmem:[%s1016_s1 + $0x10] sm:$0xff]  ;;  %v571_v13 = vpack.c.bf16 %v49_v11, %v48_v10 }
   0x4   :  { %v600_v9 = vpack.c.bf16 %v63_v7, %v62_v6  ;;  %568 = vmatprep.subr.bf16.mxu0 %v567_v4  ;;  %v33_v14 = vld [vmem:[%s1016_s1 + $0x18] sm:$0xff]  ;;  %v64_v15 = vld [vmem:[%s1016_s1 + $0x110] sm:$0xff]  ;;  %v50_v19 = vld [vmem:[%s1016_s1 + $0xa0] sm:$0xff] }
   0x5   :  { %v65_v16 = vld [vmem:[%s1016_s1 + $0x118] sm:$0xff]  ;;  %570 = vmatpush3.bf16.msra.mxu0 %v569_v8  ;;  %v573_v17 = vpack.c.bf16 %v33_v14, %v32_v12  ;;  %v51_v20 = vld [vmem:[%s1016_s1 + $0xa8] sm:$0xff]  ;;  %v34_v21 = vld [vmem:[%s1016_s1 + $0x20] sm:$0xff] }
   0x6   :  { %601 = vmatpush1.bf16.msra.mxu1 %v600_v9  ;;  %v603_v18 = vpack.c.bf16 %v65_v16, %v64_v15  ;;  %572 = vmatprep.subr.bf16.mxu0 %v571_v13  ;;  %v575_v22 = vpack.c.bf16 %v51_v20, %v50_v19  ;;  %v35_v23 = vld [vmem:[%s1016_s1 + $0x28] sm:$0xff]  ;;  %v66_v24 = vld [vmem:[%s1016_s1 + $0x120] sm:$0xff]  ;;  %v52_v26 = vld [vmem:[%s1016_s1 + $0xb0] sm:$0xff] }
   0x7   :  { %602 = vmatprep.subr.bf16.mxu1 %v677_v2  ;;  %v67_v25 = vld [vmem:[%s1016_s1 + $0x128] sm:$0xff]  ;;  %v53_v27 = vld [vmem:[%s1016_s1 + $0xb8] sm:$0xff]  ;;  %v577_v28 = vpack.c.bf16 %v35_v23, %v34_v21  ;;  %v36_v30 = vld [vmem:[%s1016_s1 + $0x30] sm:$0xff] }
   0x8   :  { %v606_v29 = vpack.c.bf16 %v67_v25, %v66_v24  ;;  %v579_v31 = vpack.c.bf16 %v53_v27, %v52_v26  ;;  %v37_v32 = vld [vmem:[%s1016_s1 + $0x38] sm:$0xff]  ;;  %v68_v33 = vld [vmem:[%s1016_s1 + $0x130] sm:$0xff]  ;;  %v54_v35 = vld [vmem:[%s1016_s1 + $0xc0] sm:$0xff] }
   0x9   :  { %574 = vmatpush3.bf16.msra.mxu0 %v573_v17  ;;  %v69_v34 = vld [vmem:[%s1016_s1 + $0x138] sm:$0xff]  ;;  %v55_v36 = vld [vmem:[%s1016_s1 + $0xc8] sm:$0xff]  ;;  %v581_v37 = vpack.c.bf16 %v37_v32, %v36_v30  ;;  %v38_v39 = vld [vmem:[%s1016_s1 + $0x40] sm:$0xff] }
   0xa   :  { %604 = vmatpush1.bf16.msra.mxu1 %v603_v18  ;;  %576 = vmatprep.subr.bf16.mxu0 %v575_v22  ;;  %v609_v38 = vpack.c.bf16 %v69_v34, %v68_v33  ;;  %v583_v40 = vpack.c.bf16 %v55_v36, %v54_v35  ;;  %v39_v41 = vld [vmem:[%s1016_s1 + $0x48] sm:$0xff]  ;;  %v70_v42 = vld [vmem:[%s1016_s1 + $0x140] sm:$0xff]  ;;  %v56_v44 = vld [vmem:[%s1016_s1 + $0xd0] sm:$0xff] }
   0xb   :  { %605 = vmatprep.subr.bf16.mxu1 %v677_v2  ;;  %v71_v43 = vld [vmem:[%s1016_s1 + $0x148] sm:$0xff]  ;;  %v57_v45 = vld [vmem:[%s1016_s1 + $0xd8] sm:$0xff]  ;;  %v585_v46 = vpack.c.bf16 %v39_v41, %v38_v39  ;;  %v40_v48 = vld [vmem:[%s1016_s1 + $0x50] sm:$0xff]  ;;  %v679_v41 = vmov 0.0  }
   0xc   :  { %v612_v47 = vpack.c.bf16 %v71_v43, %v70_v42  ;;  %v41_v49 = vld [vmem:[%s1016_s1 + $0x58] sm:$0xff]  ;;  %v27_v50 = vld [vmem:[%s1017_s0 + $0x8] sm:$0xff]  ;;  %v587_v51 = vpack.c.bf16 %v57_v45, %v56_v44  ;;  %v72_v52 = vld [vmem:[%s1016_s1 + $0x150] sm:$0xff] }
   0xd   :  { %578 = vmatpush3.bf16.msra.mxu0 %v577_v28  ;;  %v73_v53 = vld [vmem:[%s1016_s1 + $0x158] sm:$0xff]  ;;  %v58_v55 = vld [vmem:[%s1016_s1 + $0xe0] sm:$0xff]  ;;  %v59_v56 = vld [vmem:[%s1016_s1 + $0xe8] sm:$0xff]  ;;  %155 = vmatprep.mubr.f32.mxu0 %v27_v50  ;;  %v589_v57 = vpack.c.bf16 %v41_v49, %v40_v48 }
   0xe   :  { %607 = vmatpush1.bf16.msra.mxu1 %v606_v29  ;;  %580 = vmatprep.subr.bf16.mxu0 %v579_v31  ;;  %v29_v54 = vld [vmem:[%s1017_s0 + $0x18] sm:$0xff]  ;;  %v615_v58 = vpack.c.bf16 %v73_v53, %v72_v52  ;;  %v42_v59 = vld [vmem:[%s1016_s1 + $0x60] sm:$0xff]  ;;  %v591_v60 = vpack.c.bf16 %v59_v56, %v58_v55  ;;  %v43_v61 = vld [vmem:[%s1016_s1 + $0x68] sm:$0xff] }
   0xf   :  { %608 = vmatprep.subr.bf16.mxu1 %v677_v2  ;;  %425 = vmatprep.mubr.msk.f32.mxu1 %vm87_vm0, %v29_v54  ;;  %v74_v62 = vld [vmem:[%s1016_s1 + $0x160] sm:$0xff]  ;;  %v75_v63 = vld [vmem:[%s1016_s1 + $0x168] sm:$0xff]  ;;  %v60_v0 = vld [vmem:[%s1016_s1 + $0xf0] sm:$0xff]  ;;  %v593_v3 = vpack.c.bf16 %v43_v61, %v42_v59 }
  0x10   :  { %v61_v1 = vld [vmem:[%s1016_s1 + $0xf8] sm:$0xff]  ;;  %v618_v4 = vpack.c.bf16 %v75_v63, %v74_v62  ;;  %v44_v5 = vld [vmem:[%s1016_s1 + $0x70] sm:$0xff]  ;;  %v78_v12 = vld [vmem:[%s1016_s1 + $0x180] sm:$0xff] }
  0x11   :  { %582 = vmatpush3.bf16.msra.mxu0 %v581_v37  ;;  %v595_v6 = vpack.c.bf16 %v61_v1, %v60_v0  ;;  %v45_v7 = vld [vmem:[%s1016_s1 + $0x78] sm:$0xff]  ;;  %v76_v8 = vld [vmem:[%s1016_s1 + $0x170] sm:$0xff]  ;;  %v79_v13 = vld [vmem:[%s1016_s1 + $0x188] sm:$0xff] }
  0x12   :  { %610 = vmatpush1.bf16.msra.mxu1 %v609_v38  ;;  %584 = vmatprep.subr.bf16.mxu0 %v583_v40  ;;  %v77_v9 = vld [vmem:[%s1016_s1 + $0x178] sm:$0xff]  ;;  %v597_v10 = vpack.c.bf16 %v45_v7, %v44_v5  ;;  %v232_v14 = vld [vmem:[%s1018_s3] sm:$0xff]  ;;  %v233_v15 = vld [vmem:[%s1018_s3 + $0x8] sm:$0xff]  ;;  %v624_v17 = vpack.c.bf16 %v79_v13, %v78_v12 }
  0x13   :  { %611 = vmatprep.subr.bf16.mxu1 %v677_v2  ;;  %v621_v11 = vpack.c.bf16 %v77_v9, %v76_v8  ;;  %v26_v16 = vld [vmem:[%s1017_s0] sm:$0xff]  ;;  %v627_v18 = vpack.c.bf16 %v233_v15, %v232_v14  ;;  %v234_v19 = vld [vmem:[%s1018_s3 + $0x10] sm:$0xff]  ;;  %v235_v20 = vld [vmem:[%s1018_s3 + $0x18] sm:$0xff] }
  0x14   :  { %v28_v21 = vld [vmem:[%s1017_s0 + $0x10] sm:$0xff]  ;;  %v630_v22 = vpack.c.bf16 %v235_v20, %v234_v19  ;;  %v236_v23 = vld [vmem:[%s1018_s3 + $0x20] sm:$0xff]  ;;  %v237_v24 = vld [vmem:[%s1018_s3 + $0x28] sm:$0xff] }
  0x15   :  { %586 = vmatpush3.bf16.msra.mxu0 %v585_v46  ;;  %v633_v25 = vpack.c.bf16 %v237_v24, %v236_v23  ;;  %v238_v26 = vld [vmem:[%s1018_s3 + $0x30] sm:$0xff]  ;;  %v239_v27 = vld [vmem:[%s1018_s3 + $0x38] sm:$0xff]  ;;  %v240_v29 = vld [vmem:[%s1018_s3 + $0x40] sm:$0xff] }
  0x16   :  { %613 = vmatpush1.bf16.msra.mxu1 %v612_v47  ;;  %588 = vmatprep.subr.bf16.mxu0 %v587_v51  ;;  %v636_v28 = vpack.c.bf16 %v239_v27, %v238_v26  ;;  %v241_v30 = vld [vmem:[%s1018_s3 + $0x48] sm:$0xff]  ;;  %v242_v32 = vld [vmem:[%s1018_s3 + $0x50] sm:$0xff]  ;;  %v243_v33 = vld [vmem:[%s1018_s3 + $0x58] sm:$0xff] }
  0x17   :  { %614 = vmatprep.subr.bf16.mxu1 %v677_v2  ;;  %v639_v31 = vpack.c.bf16 %v241_v30, %v240_v29  ;;  %v642_v34 = vpack.c.bf16 %v243_v33, %v242_v32  ;;  %v244_v35 = vld [vmem:[%s1018_s3 + $0x60] sm:$0xff]  ;;  %v245_v36 = vld [vmem:[%s1018_s3 + $0x68] sm:$0xff]  ;;  %v246_v38 = vld [vmem:[%s1018_s3 + $0x70] sm:$0xff] }
  0x18   :  { %v645_v37 = vpack.c.bf16 %v245_v36, %v244_v35  ;;  %v247_v39 = vld [vmem:[%s1018_s3 + $0x78] sm:$0xff]  ;;  %v326_v42 = vld [vmem:[%s1019_s5] sm:$0xff]  ;;  %v327_v43 = vld [vmem:[%s1019_s5 + $0x8] sm:$0xff] }
  0x19   :  { %590 = vmatpush3.bf16.msra.mxu0 %v589_v57  ;;  %v648_v40 = vpack.c.bf16 %v247_v39, %v246_v38  ;;  %v328_v44 = vld [vmem:[%s1019_s5 + $0x10] sm:$0xff]  ;;  %v651_v45 = vpack.c.bf16 %v327_v43, %v326_v42  ;;  %v329_v46 = vld [vmem:[%s1019_s5 + $0x18] sm:$0xff]  ;;  %v330_v48 = vld [vmem:[%s1019_s5 + $0x20] sm:$0xff] }
  0x1a   :  { %616 = vmatpush1.bf16.msra.mxu1 %v615_v58  ;;  %592 = vmatprep.subr.bf16.mxu0 %v591_v60  ;;  %v654_v47 = vpack.c.bf16 %v329_v46, %v328_v44  ;;  %v331_v49 = vld [vmem:[%s1019_s5 + $0x28] sm:$0xff]  ;;  %v332_v51 = vld [vmem:[%s1019_s5 + $0x30] sm:$0xff]  ;;  %v333_v52 = vld [vmem:[%s1019_s5 + $0x38] sm:$0xff] }
  0x1b   :  { %617 = vmatprep.subr.bf16.mxu1 %v677_v2  ;;  %v657_v50 = vpack.c.bf16 %v331_v49, %v330_v48  ;;  %v660_v53 = vpack.c.bf16 %v333_v52, %v332_v51  ;;  %v334_v54 = vld [vmem:[%s1019_s5 + $0x40] sm:$0xff]  ;;  %v335_v55 = vld [vmem:[%s1019_s5 + $0x48] sm:$0xff]  ;;  %v336_v57 = vld [vmem:[%s1019_s5 + $0x50] sm:$0xff] }
  0x1c   :  { %v663_v56 = vpack.c.bf16 %v335_v55, %v334_v54  ;;  %v337_v58 = vld [vmem:[%s1019_s5 + $0x58] sm:$0xff]  ;;  %v338_v60 = vld [vmem:[%s1019_s5 + $0x60] sm:$0xff]  ;;  %v339_v61 = vld [vmem:[%s1019_s5 + $0x68] sm:$0xff] }
  0x1d   :  { %594 = vmatpush3.bf16.msra.mxu0 %v593_v3  ;;  %v666_v59 = vpack.c.bf16 %v337_v58, %v336_v57  ;;  %v669_v62 = vpack.c.bf16 %v339_v61, %v338_v60  ;;  %v424_v1 = vld [vmem:[%s1020_s2] ss:$0 sm:$0xff]  ;;  %v340_v9 = vld [vmem:[%s1019_s5 + $0x70] sm:$0xff] }
  0x1e   :  { %619 = vmatpush1.bf16.msra.mxu1 %v618_v4  ;;  %596 = vmatprep.subr.bf16.mxu0 %v595_v6 }
  0x1f   :  { %620 = vmatprep.subr.bf16.mxu1 %v677_v2 }
  0x21   :  { %598 = vmatpush3.bf16.msra.mxu0 %v597_v10 }
  0x22   :  { %622 = vmatpush1.bf16.msra.mxu1 %v621_v11  ;;  %626 = vmatprep.subr.bf16.mxu0 %v677_v2  ;;  %v426_v11 = vld [vmem:[%s1021_s4] ss:$0 sm:$0xff] }
  0x23   :  { %623 = vmatprep.subr.bf16.mxu1 %v677_v2 }
  0x24   :  { %156 = vmatmul.mubr.f32.vlgmr.msra.gmra.mrb[0].mxu0 %v26_v16  ;;  %v427_v16 = vld [vmem:[%s1022_s6] ss:$0 sm:$0xff] }
  0x25   :  { %628 = vmatpush3.bf16.msra.mxu0 %v627_v18  ;;  %529 = vmatprep.mubr.msk.f32.mxu0 %vm678_vm1, %v679_v41 }
  0x26   :  { %625 = vmatpush1.bf16.msra.mxu1 %v624_v17  ;;  %629 = vmatprep.subr.bf16.mxu0 %v677_v2 }
  0x27   :  { %650 = vmatprep.subr.bf16.mxu1 %v677_v2 }
  0x29   :  { %226 = vmatmul.mubr.f32.vlgmr.msra.gmra.mrb[0].mxu1 %v28_v21  ;;  %631 = vmatpush3.bf16.msra.mxu0 %v630_v22 }
  0x2a   :  { %632 = vmatprep.subr.bf16.mxu0 %v677_v2  ;;  %564 = vmatprep.mubr.msk.f32.mxu1 %vm678_vm1, %v679_v41 }
  0x2b   :  { %652 = vmatpush3.bf16.msra.mxu1 %v651_v45 }
  0x2c   :  { %653 = vmatprep.subr.bf16.mxu1 %v677_v2 }
  0x2d   :  { %634 = vmatpush3.bf16.msra.mxu0 %v633_v25 }
  0x2e   :  { %635 = vmatprep.subr.bf16.mxu0 %v677_v2 }
  0x2f   :  { %655 = vmatpush3.bf16.msra.mxu1 %v654_v47 }
  0x30   :  { %656 = vmatprep.subr.bf16.mxu1 %v677_v2 }
  0x31   :  { %637 = vmatpush3.bf16.msra.mxu0 %v636_v28 }
  0x32   :  { %638 = vmatprep.subr.bf16.mxu0 %v677_v2 }
  0x33   :  { %658 = vmatpush3.bf16.msra.mxu1 %v657_v50 }
  0x34   :  { %659 = vmatprep.subr.bf16.mxu1 %v677_v2 }
  0x35   :  { %640 = vmatpush3.bf16.msra.mxu0 %v639_v31 }
  0x36   :  { %641 = vmatprep.subr.bf16.mxu0 %v677_v2 }
  0x37   :  { %661 = vmatpush3.bf16.msra.mxu1 %v660_v53 }
  0x38   :  { %662 = vmatprep.subr.bf16.mxu1 %v677_v2 }
  0x39   :  { %643 = vmatpush3.bf16.msra.mxu0 %v642_v34 }
  0x3a   :  { %644 = vmatprep.subr.bf16.mxu0 %v677_v2 }
  0x3b   :  { %664 = vmatpush3.bf16.msra.mxu1 %v663_v56 }
  0x3c   :  { %665 = vmatprep.subr.bf16.mxu1 %v677_v2 }
  0x3d   :  { %646 = vmatpush3.bf16.msra.mxu0 %v645_v37 }
  0x3e   :  { %647 = vmatprep.subr.bf16.mxu0 %v677_v2 }
  0x3f   :  { %667 = vmatpush3.bf16.msra.mxu1 %v666_v59 }
  0x40   :  { %668 = vmatprep.subr.bf16.mxu1 %v677_v2 }
  0x41   :  { %649 = vmatpush3.bf16.msra.mxu0 %v648_v40 }
  0x43   :  { %670 = vmatpush3.bf16.msra.mxu1 %v669_v62 }
  0x44   :  { %671 = vmatprep.subr.bf16.mxu1 %v677_v2  ;;  %v341_v2 = vld [vmem:[%s1019_s5 + $0x78] sm:$0xff] }
  0x45   :  { %v672_v10 = vpack.c.bf16 %v341_v2, %v340_v9 }
  0x47   :  { %673 = vmatpush3.bf16.msra.mxu1 %v672_v10 }
  0xf7   :  { %v460_v63 = vpop.f32.mrb[0].mxu0 }
  0xf8   :  { %v461_v0 = vpop.f32.mrb[1].mxu0 }
  0xf9   :  { %v462_v3 = vadd.f32 %v461_v0, %v460_v63 }
  0xfb   :  { %v158_v4 = vadd.f32 %v462_v3, %v424_v1 }
  0xfc   :  { %v227_v5 = vpop.f32.mrb[0].mxu1 }
  0xfd   :  { %v229_v6 = vpop.f32.mrb[1].mxu1  ;;  %v228_v7 = vadd.f32 %v227_v5, %v158_v4 }
  0xff   :  { %v231_v8 = vmax.f32 %v228_v7, 0.0 }
 0x101   :  { %530 = vmatmul.mubr.f32.vlgmr.msra.gmra.mrb[2].mxu0 %v231_v8 }
 0x1d4   :  { %v321_v12 = vpop.f32.mrb[2].mxu0 }
 0x1d5   :  { %v322_v13 = vadd.f32 %v426_v11, %v321_v12  ;;  %v531_v14 = vpop.f32.mrb[3].mxu0 }
 0x1d7   :  { %v325_v15 = vmax.f32 %v322_v13, 0.0 }
 0x1d9   :  { %565 = vmatmul.mubr.f32.vlgmr.msra.gmra.mrb[2].mxu1 %v325_v15 }
 0x2ac   :  { %v415_v17 = vpop.f32.mrb[2].mxu1 }
 0x2ad   :  { %v416_v18 = vadd.f32 %v427_v16, %v415_v17  ;;  %v566_v19 = vpop.f32.mrb[3].mxu1 }
 0x2af   :  { %419 = vst [vmem:[%s1023_s7] sm:$0xff] %v416_v18 }

</bundles_post_ra>
